<compile_context>
chip_gen: v7x
topology: tpu7x:2x2x1
jax: 0.10.0
libtpu: 0.0.40
codegen_flags: <defaults>
</compile_context>

<pallas_src>
import jax
import jax.numpy as jnp
from jax.experimental import pallas as pl
from jax.experimental.pallas import tpu as pltpu

HIDDEN = 128        # self.hidden_size
HEAD_HIDDEN = 64
OUT = 4             # self.output_size
SUBLANE = 8         # f32 sublane width
LANE = 128


def make_kernel(T, Bp, I):
    H = HIDDEN

    def sigmoid(x):
        # exact logistic via one EUP tanh + cheap VPU fma
        return 0.5 * jnp.tanh(0.5 * x) + 0.5

    def gates_to_hc(gates, c):
        # gate column order is (i, f, o, g): one wide sigmoid + one tanh
        sig = sigmoid(gates[:, :3 * H])
        i_g = sig[:, 0 * H:1 * H]
        f_g = sig[:, 1 * H:2 * H]
        o_g = sig[:, 2 * H:3 * H]
        g_g = jnp.tanh(gates[:, 3 * H:])
        c_new = f_g * c + i_g * g_g
        h_new = o_g * jnp.tanh(c_new)
        return h_new, c_new

    def kernel(x_ref, wslab_ref, hwslab_ref, bslab_ref, out_ref, proj_ref):
        # ---- unpack the consolidated weight/bias slabs (static slices) ----
        wih1 = wslab_ref[0:I, :]                 # (I, 4H)   bf16
        whh1 = wslab_ref[I:I + H, :]             # (H, 4H)   bf16
        w2 = wslab_ref[I + H:I + 3 * H, :]       # (2H, 4H)  bf16 (fused l1 ih|hh)

        b1 = bslab_ref[0:1, :]                                   # (1, 4H) f32
        b2 = jnp.broadcast_to(bslab_ref[1:2, :], (Bp, 4 * H))    # hoisted once

        # ---- layer-1 input projection for ALL timesteps, bias folded in ----
        # x_ref is time-major-flattened and batch-padded: row t*Bp + b.
        proj_ref[...] = (jnp.dot(x_ref[...].astype(jnp.bfloat16), wih1,
                                 preferred_element_type=jnp.float32)
                         + b1)                                    # (T*Bp, 4H)

        h1 = c1 = h2 = c2 = jnp.zeros((Bp, H), jnp.float32)
        # TODO(synk): if the bundle dump shows whh1/w2 being re-pushed to the
        # MXU every step, switch to pltpu.matmul_push_rhs before the loop and
        # matmul_acc_lhs/matmul_pop per step (chip-specific MXU geometry).
        for t in range(T):                 # fully unrolled (T static, small)
            p_t = proj_ref[t * Bp:(t + 1) * Bp, :]   # sublane-aligned (Bp=8)
            gates1 = p_t + jnp.dot(h1.astype(jnp.bfloat16), whh1,
                                   preferred_element_type=jnp.float32)
            h1, c1 = gates_to_hc(gates1, c1)
            # nn.LSTM inter-layer dropout(0.2) inactive at inference -> no-op
            hcat = jnp.concatenate([h1, h2], axis=-1).astype(jnp.bfloat16)
            gates2 = (jnp.dot(hcat, w2, preferred_element_type=jnp.float32)
                      + b2)
            h2, c2 = gates_to_hc(gates2, c2)

        # ---- head: Linear(128,64) -> ReLU -> Dropout(inactive) -> Linear(64,4)
        # head weights are lane-padded to 128 so every store is unmasked.
        w3 = hwslab_ref[0:H, :]          # (H, 128)  cols >= 64 are zero
        w4 = hwslab_ref[H:2 * H, :]      # (128,128) rows >= 64 / cols >= 4 zero
        b3 = bslab_ref[2:3, 0:LANE]      # (1, 128)  entries >= 64 are zero
        b4 = bslab_ref[3:4, 0:LANE]      # (1, 128)  entries >= 4 are zero
        hidden = jnp.maximum(
            jnp.dot(h2.astype(jnp.bfloat16), w3,
                    preferred_element_type=jnp.float32) + b3, 0.0)
        out_ref[...] = (jnp.dot(hidden.astype(jnp.bfloat16), w4,
                                preferred_element_type=jnp.float32)
                        + b4)                                     # (Bp, 128)

    return kernel


def model_lstm_forward(x, kp):
    """x: (B, T, I) float32, batch-first like PyTorch. Returns (B, 4)."""
    B, T, I = x.shape
    # pad batch to the sublane width so per-step tiles are (8, .) aligned
    Bp = max(SUBLANE, ((B + SUBLANE - 1) // SUBLANE) * SUBLANE)
    xp = x if Bp == B else jnp.zeros((Bp, T, I), x.dtype).at[:B].set(x)
    # time-major flatten so per-step rows are contiguous: row t*Bp + b
    x2d = jnp.transpose(xp, (1, 0, 2)).reshape(T * Bp, I)

    vmem = pl.BlockSpec(memory_space=pltpu.MemorySpace.VMEM)
    out = pl.pallas_call(
        make_kernel(T, Bp, I),
        out_shape=jax.ShapeDtypeStruct((Bp, LANE), jnp.float32),
        in_specs=[vmem, vmem, vmem, vmem],
        out_specs=vmem,
        scratch_shapes=[pltpu.VMEM((T * Bp, 4 * HIDDEN), jnp.float32)],
    )(x2d, kp['wslab'], kp['hwslab'], kp['bslab'])
    return out[:B, :OUT]


# ----------------------------- parameters --------------------------------- #

def init_params(key, input_size):
    """PyTorch-layout parameters: LSTM weights U(-1/sqrt(H), 1/sqrt(H)),
    head Linear weights U(-1/sqrt(fan_in), ...).  Gate row order i,f,g,o."""
    H = HIDDEN
    kH = 1.0 / jnp.sqrt(jnp.float32(H))
    k64 = 1.0 / jnp.sqrt(jnp.float32(HEAD_HIDDEN))
    keys = jax.random.split(key, 12)

    def u(kk, shape, bound):
        return jax.random.uniform(kk, shape, jnp.float32, -bound, bound)

    return {
        # LSTM layer 0
        'w_ih_l0': u(keys[0], (4 * H, input_size), kH),
        'w_hh_l0': u(keys[1], (4 * H, H), kH),
        'b_ih_l0': u(keys[2], (4 * H,), kH),
        'b_hh_l0': u(keys[3], (4 * H,), kH),
        # LSTM layer 1 (input is layer-0 hidden, size H)
        'w_ih_l1': u(keys[4], (4 * H, H), kH),
        'w_hh_l1': u(keys[5], (4 * H, H), kH),
        'b_ih_l1': u(keys[6], (4 * H,), kH),
        'b_hh_l1': u(keys[7], (4 * H,), kH),
        # head
        'w3': u(keys[8], (HEAD_HIDDEN, H), kH),
        'b3': u(keys[9], (HEAD_HIDDEN,), kH),
        'w4': u(keys[10], (OUT, HEAD_HIDDEN), k64),
        'b4': u(keys[11], (OUT,), k64),
    }


def pack_kernel_params(p):
    """Convert PyTorch-layout params to the kernel layout:
       * transpose to input-on-the-left form,
       * reorder gates (i,f,g,o) -> (i,f,o,g),
       * fold b_ih + b_hh,
       * fuse layer-1's W_ih/W_hh into one (2H, 4H) weight,
       * consolidate everything into 3 slabs (big weights bf16, head weights
         bf16 lane-padded to 128, biases f32)."""
    H = HIDDEN

    def reorder_rows(w):    # rows grouped (i,f,g,o) -> (i,f,o,g)
        return jnp.concatenate(
            [w[0 * H:1 * H], w[1 * H:2 * H], w[3 * H:4 * H], w[2 * H:3 * H]],
            axis=0)

    def reorder_vec(b):
        return jnp.concatenate(
            [b[0 * H:1 * H], b[1 * H:2 * H], b[3 * H:4 * H], b[2 * H:3 * H]],
            axis=0)

    wih1 = reorder_rows(p['w_ih_l0']).T                          # (I, 4H)
    whh1 = reorder_rows(p['w_hh_l0']).T                          # (H, 4H)
    w2 = jnp.concatenate([reorder_rows(p['w_ih_l1']).T,
                          reorder_rows(p['w_hh_l1']).T], axis=0)  # (2H, 4H)
    b1 = reorder_vec(p['b_ih_l0'] + p['b_hh_l0'])                # (4H,)
    b2 = reorder_vec(p['b_ih_l1'] + p['b_hh_l1'])                # (4H,)

    # big LSTM weight slab (bf16): one DMA instead of three
    wslab = jnp.concatenate([wih1, whh1, w2], axis=0).astype(jnp.bfloat16)

    # head weight slab (bf16), lane-padded to 128 for unmasked stores
    w3p = jnp.zeros((H, LANE), jnp.float32).at[:, :HEAD_HIDDEN].set(p['w3'].T)
    w4p = jnp.zeros((LANE, LANE), jnp.float32).at[:HEAD_HIDDEN, :OUT].set(p['w4'].T)
    hwslab = jnp.concatenate([w3p, w4p], axis=0).astype(jnp.bfloat16)

    # bias slab (f32): rows = b1, b2, b3(padded), b4(padded)
    b3p = jnp.zeros((4 * H,), jnp.float32).at[:HEAD_HIDDEN].set(p['b3'])
    b4p = jnp.zeros((4 * H,), jnp.float32).at[:OUT].set(p['b4'])
    bslab = jnp.stack([b1, b2, b3p, b4p], axis=0)                # (4, 4H)

    return {'wslab': wslab, 'hwslab': hwslab, 'bslab': bslab}


# ----------------------------- reference ---------------------------------- #

def reference_forward(x, p):
    """Pure-JAX replica of the PyTorch forward (standard gate order i,f,g,o)."""
    B, T, _ = x.shape
    H = HIDDEN

    def cell(x_t, h, c, w_ih, w_hh, b_ih, b_hh):
        g = x_t @ w_ih.T + h @ w_hh.T + b_ih + b_hh
        i = jax.nn.sigmoid(g[:, :H])
        f = jax.nn.sigmoid(g[:, H:2 * H])
        gg = jnp.tanh(g[:, 2 * H:3 * H])
        o = jax.nn.sigmoid(g[:, 3 * H:])
        c = f * c + i * gg
        h = o * jnp.tanh(c)
        return h, c

    h1 = c1 = h2 = c2 = jnp.zeros((B, H), jnp.float32)
    for t in range(T):
        h1, c1 = cell(x[:, t, :], h1, c1,
                      p['w_ih_l0'], p['w_hh_l0'], p['b_ih_l0'], p['b_hh_l0'])
        h2, c2 = cell(h1, h2, c2,
                      p['w_ih_l1'], p['w_hh_l1'], p['b_ih_l1'], p['b_hh_l1'])
    hid = jnp.maximum(h2 @ p['w3'].T + p['b3'], 0.0)
    return hid @ p['w4'].T + p['b4']


if __name__ == "__main__":
    key = jax.random.PRNGKey(0)
    k_x, k_p = jax.random.split(key)

    BATCH, SEQ, ATTRS = 2, 8, 16          # attributes_size = 16
    x = jax.random.normal(k_x, (BATCH, SEQ, ATTRS), jnp.float32)
    params = init_params(k_p, ATTRS)
    kparams = pack_kernel_params(params)

    out = model_lstm_forward(x, kparams)
    out = jax.block_until_ready(out)

    ref = reference_forward(x, params)
    assert out.shape == (BATCH, OUT)
    # bf16 MXU operands compound slight rounding through the h/c recurrence;
    # tolerance loosened accordingly (still catches any gate/layout bug).
    assert jnp.allclose(out, ref, atol=2e-3, rtol=2e-3), "mismatch vs reference"

    print("KERNEL_OK")
</pallas_src>

<mosaic_0001>
module attributes {stable_mosaic.version = 11 : i64} {
  func.func @kernel(%arg0: memref<64x16xf32, #tpu.memory_space<vmem>>, %arg1: memref<400x512xbf16, #tpu.memory_space<vmem>>, %arg2: memref<256x128xbf16, #tpu.memory_space<vmem>>, %arg3: memref<4x512xf32, #tpu.memory_space<vmem>>, %arg4: memref<8x128xf32, #tpu.memory_space<vmem>>, %arg5: memref<64x512xf32, #tpu.memory_space<vmem>>) attributes {dimension_semantics = [], scalar_prefetch = 0 : i64, scratch_operands = 1 : i64, tpu.core_type = #tpu.core_type<tc>} {
    %c0 = arith.constant 0 : index
    %c0_0 = arith.constant 0 : index
    %0 = vector.load %arg1[%c0, %c0_0] : memref<400x512xbf16, #tpu.memory_space<vmem>>, vector<16x512xbf16>
    %c16 = arith.constant 16 : index
    %c0_1 = arith.constant 0 : index
    %1 = vector.load %arg1[%c16, %c0_1] : memref<400x512xbf16, #tpu.memory_space<vmem>>, vector<128x512xbf16>
    %c144 = arith.constant 144 : index
    %c0_2 = arith.constant 0 : index
    %2 = vector.load %arg1[%c144, %c0_2] : memref<400x512xbf16, #tpu.memory_space<vmem>>, vector<256x512xbf16>
    %c0_3 = arith.constant 0 : index
    %c0_4 = arith.constant 0 : index
    %3 = vector.load %arg3[%c0_3, %c0_4] : memref<4x512xf32, #tpu.memory_space<vmem>>, vector<1x512xf32>
    %c1 = arith.constant 1 : index
    %c0_5 = arith.constant 0 : index
    %4 = vector.load %arg3[%c1, %c0_5] : memref<4x512xf32, #tpu.memory_space<vmem>>, vector<1x512xf32>
    %5 = vector.shape_cast %4 : vector<1x512xf32> to vector<1x512xf32>
    %6 = vector.broadcast %5 : vector<1x512xf32> to vector<8x512xf32>
    %c0_6 = arith.constant 0 : index
    %c0_7 = arith.constant 0 : index
    %7 = vector.load %arg0[%c0_6, %c0_7] : memref<64x16xf32, #tpu.memory_space<vmem>>, vector<64x16xf32>
    %8 = arith.truncf %7 : vector<64x16xf32> to vector<64x16xbf16>
    %cst = arith.constant dense<0.000000e+00> : vector<64x512xf32>
    %9 = tpu.matmul %8, %0, %cst {dimension_numbers = #tpu.dot_dimension_numbers<[1], [0], [0], [1], [0, 0, 1, 1], [], []>} : vector<64x16xbf16>, vector<16x512xbf16>, vector<64x512xf32> -> vector<64x512xf32>
    %10 = vector.broadcast %3 : vector<1x512xf32> to vector<64x512xf32>
    %11 = arith.addf %9, %10 : vector<64x512xf32>
    %c0_8 = arith.constant 0 : index
    %c0_9 = arith.constant 0 : index
    %12 = vector.load %arg5[%c0_8, %c0_9] : memref<64x512xf32, #tpu.memory_space<vmem>>, vector<64x512xf32>
    tpu.vector_store %arg5[%c0_8, %c0_9], %11 {strides = array<i32>} : memref<64x512xf32, #tpu.memory_space<vmem>>, vector<64x512xf32>,
    %cst_10 = arith.constant 0.000000e+00 : f32
    %13 = vector.broadcast %cst_10 : f32 to vector<8x128xf32>
    %c0_11 = arith.constant 0 : index
    %c0_12 = arith.constant 0 : index
    %14 = vector.load %arg5[%c0_11, %c0_12] : memref<64x512xf32, #tpu.memory_space<vmem>>, vector<8x512xf32>
    %15 = arith.truncf %13 : vector<8x128xf32> to vector<8x128xbf16>
    %cst_13 = arith.constant dense<0.000000e+00> : vector<8x512xf32>
    %16 = tpu.matmul %15, %1, %cst_13 {dimension_numbers = #tpu.dot_dimension_numbers<[1], [0], [0], [1], [0, 0, 1, 1], [], []>} : vector<8x128xbf16>, vector<128x512xbf16>, vector<8x512xf32> -> vector<8x512xf32>
    %17 = arith.addf %14, %16 : vector<8x512xf32>
    %18 = vector.extract_strided_slice %17 {offsets = [0, 0], sizes = [8, 384], strides = [1, 1]} : vector<8x512xf32> to vector<8x384xf32>
    %cst_14 = arith.constant 5.000000e-01 : f32
    %19 = vector.broadcast %cst_14 : f32 to vector<8x384xf32>
    %20 = arith.mulf %19, %18 : vector<8x384xf32>
    %21 = math.tanh %20 : vector<8x384xf32>
    %cst_15 = arith.constant 5.000000e-01 : f32
    %22 = vector.broadcast %cst_15 : f32 to vector<8x384xf32>
    %23 = arith.mulf %22, %21 : vector<8x384xf32>
    %cst_16 = arith.constant 5.000000e-01 : f32
    %24 = vector.broadcast %cst_16 : f32 to vector<8x384xf32>
    %25 = arith.addf %23, %24 : vector<8x384xf32>
    %26 = vector.extract_strided_slice %25 {offsets = [0, 0], sizes = [8, 128], strides = [1, 1]} : vector<8x384xf32> to vector<8x128xf32>
    %27 = vector.extract_strided_slice %25 {offsets = [0, 128], sizes = [8, 128], strides = [1, 1]} : vector<8x384xf32> to vector<8x128xf32>
    %28 = vector.extract_strided_slice %25 {offsets = [0, 256], sizes = [8, 128], strides = [1, 1]} : vector<8x384xf32> to vector<8x128xf32>
    %29 = vector.extract_strided_slice %17 {offsets = [0, 384], sizes = [8, 128], strides = [1, 1]} : vector<8x512xf32> to vector<8x128xf32>
    %30 = math.tanh %29 : vector<8x128xf32>
    %31 = arith.mulf %27, %13 : vector<8x128xf32>
    %32 = arith.mulf %26, %30 : vector<8x128xf32>
    %33 = arith.addf %31, %32 : vector<8x128xf32>
    %34 = math.tanh %33 : vector<8x128xf32>
    %35 = arith.mulf %28, %34 : vector<8x128xf32>
    %36 = tpu.concatenate %35, %13 in 1 : vector<8x128xf32>, vector<8x128xf32> -> vector<8x256xf32>
    %37 = arith.truncf %36 : vector<8x256xf32> to vector<8x256xbf16>
    %cst_17 = arith.constant dense<0.000000e+00> : vector<8x512xf32>
    %38 = tpu.matmul %37, %2, %cst_17 {dimension_numbers = #tpu.dot_dimension_numbers<[1], [0], [0], [1], [0, 0, 1, 1], [], []>} : vector<8x256xbf16>, vector<256x512xbf16>, vector<8x512xf32> -> vector<8x512xf32>
    %39 = arith.addf %38, %6 : vector<8x512xf32>
    %40 = vector.extract_strided_slice %39 {offsets = [0, 0], sizes = [8, 384], strides = [1, 1]} : vector<8x512xf32> to vector<8x384xf32>
    %cst_18 = arith.constant 5.000000e-01 : f32
    %41 = vector.broadcast %cst_18 : f32 to vector<8x384xf32>
    %42 = arith.mulf %41, %40 : vector<8x384xf32>
    %43 = math.tanh %42 : vector<8x384xf32>
    %cst_19 = arith.constant 5.000000e-01 : f32
    %44 = vector.broadcast %cst_19 : f32 to vector<8x384xf32>
    %45 = arith.mulf %44, %43 : vector<8x384xf32>
    %cst_20 = arith.constant 5.000000e-01 : f32
    %46 = vector.broadcast %cst_20 : f32 to vector<8x384xf32>
    %47 = arith.addf %45, %46 : vector<8x384xf32>
    %48 = vector.extract_strided_slice %47 {offsets = [0, 0], sizes = [8, 128], strides = [1, 1]} : vector<8x384xf32> to vector<8x128xf32>
    %49 = vector.extract_strided_slice %47 {offsets = [0, 128], sizes = [8, 128], strides = [1, 1]} : vector<8x384xf32> to vector<8x128xf32>
    %50 = vector.extract_strided_slice %47 {offsets = [0, 256], sizes = [8, 128], strides = [1, 1]} : vector<8x384xf32> to vector<8x128xf32>
    %51 = vector.extract_strided_slice %39 {offsets = [0, 384], sizes = [8, 128], strides = [1, 1]} : vector<8x512xf32> to vector<8x128xf32>
    %52 = math.tanh %51 : vector<8x128xf32>
    %53 = arith.mulf %49, %13 : vector<8x128xf32>
    %54 = arith.mulf %48, %52 : vector<8x128xf32>
    %55 = arith.addf %53, %54 : vector<8x128xf32>
    %56 = math.tanh %55 : vector<8x128xf32>
    %57 = arith.mulf %50, %56 : vector<8x128xf32>
    %c8 = arith.constant 8 : index
    %c0_21 = arith.constant 0 : index
    %58 = vector.load %arg5[%c8, %c0_21] : memref<64x512xf32, #tpu.memory_space<vmem>>, vector<8x512xf32>
    %59 = arith.truncf %35 : vector<8x128xf32> to vector<8x128xbf16>
    %cst_22 = arith.constant dense<0.000000e+00> : vector<8x512xf32>
    %60 = tpu.matmul %59, %1, %cst_22 {dimension_numbers = #tpu.dot_dimension_numbers<[1], [0], [0], [1], [0, 0, 1, 1], [], []>} : vector<8x128xbf16>, vector<128x512xbf16>, vector<8x512xf32> -> vector<8x512xf32>
    %61 = arith.addf %58, %60 : vector<8x512xf32>
    %62 = vector.extract_strided_slice %61 {offsets = [0, 0], sizes = [8, 384], strides = [1, 1]} : vector<8x512xf32> to vector<8x384xf32>
    %cst_23 = arith.constant 5.000000e-01 : f32
    %63 = vector.broadcast %cst_23 : f32 to vector<8x384xf32>
    %64 = arith.mulf %63, %62 : vector<8x384xf32>
    %65 = math.tanh %64 : vector<8x384xf32>
    %cst_24 = arith.constant 5.000000e-01 : f32
    %66 = vector.broadcast %cst_24 : f32 to vector<8x384xf32>
    %67 = arith.mulf %66, %65 : vector<8x384xf32>
    %cst_25 = arith.constant 5.000000e-01 : f32
    %68 = vector.broadcast %cst_25 : f32 to vector<8x384xf32>
    %69 = arith.addf %67, %68 : vector<8x384xf32>
    %70 = vector.extract_strided_slice %69 {offsets = [0, 0], sizes = [8, 128], strides = [1, 1]} : vector<8x384xf32> to vector<8x128xf32>
    %71 = vector.extract_strided_slice %69 {offsets = [0, 128], sizes = [8, 128], strides = [1, 1]} : vector<8x384xf32> to vector<8x128xf32>
    %72 = vector.extract_strided_slice %69 {offsets = [0, 256], sizes = [8, 128], strides = [1, 1]} : vector<8x384xf32> to vector<8x128xf32>
    %73 = vector.extract_strided_slice %61 {offsets = [0, 384], sizes = [8, 128], strides = [1, 1]} : vector<8x512xf32> to vector<8x128xf32>
    %74 = math.tanh %73 : vector<8x128xf32>
    %75 = arith.mulf %71, %33 : vector<8x128xf32>
    %76 = arith.mulf %70, %74 : vector<8x128xf32>
    %77 = arith.addf %75, %76 : vector<8x128xf32>
    %78 = math.tanh %77 : vector<8x128xf32>
    %79 = arith.mulf %72, %78 : vector<8x128xf32>
    %80 = tpu.concatenate %79, %57 in 1 : vector<8x128xf32>, vector<8x128xf32> -> vector<8x256xf32>
    %81 = arith.truncf %80 : vector<8x256xf32> to vector<8x256xbf16>
    %cst_26 = arith.constant dense<0.000000e+00> : vector<8x512xf32>
    %82 = tpu.matmul %81, %2, %cst_26 {dimension_numbers = #tpu.dot_dimension_numbers<[1], [0], [0], [1], [0, 0, 1, 1], [], []>} : vector<8x256xbf16>, vector<256x512xbf16>, vector<8x512xf32> -> vector<8x512xf32>
    %83 = arith.addf %82, %6 : vector<8x512xf32>
    %84 = vector.extract_strided_slice %83 {offsets = [0, 0], sizes = [8, 384], strides = [1, 1]} : vector<8x512xf32> to vector<8x384xf32>
    %cst_27 = arith.constant 5.000000e-01 : f32
    %85 = vector.broadcast %cst_27 : f32 to vector<8x384xf32>
    %86 = arith.mulf %85, %84 : vector<8x384xf32>
    %87 = math.tanh %86 : vector<8x384xf32>
    %cst_28 = arith.constant 5.000000e-01 : f32
    %88 = vector.broadcast %cst_28 : f32 to vector<8x384xf32>
    %89 = arith.mulf %88, %87 : vector<8x384xf32>
    %cst_29 = arith.constant 5.000000e-01 : f32
    %90 = vector.broadcast %cst_29 : f32 to vector<8x384xf32>
    %91 = arith.addf %89, %90 : vector<8x384xf32>
    %92 = vector.extract_strided_slice %91 {offsets = [0, 0], sizes = [8, 128], strides = [1, 1]} : vector<8x384xf32> to vector<8x128xf32>
    %93 = vector.extract_strided_slice %91 {offsets = [0, 128], sizes = [8, 128], strides = [1, 1]} : vector<8x384xf32> to vector<8x128xf32>
    %94 = vector.extract_strided_slice %91 {offsets = [0, 256], sizes = [8, 128], strides = [1, 1]} : vector<8x384xf32> to vector<8x128xf32>
    %95 = vector.extract_strided_slice %83 {offsets = [0, 384], sizes = [8, 128], strides = [1, 1]} : vector<8x512xf32> to vector<8x128xf32>
    %96 = math.tanh %95 : vector<8x128xf32>
    %97 = arith.mulf %93, %55 : vector<8x128xf32>
    %98 = arith.mulf %92, %96 : vector<8x128xf32>
    %99 = arith.addf %97, %98 : vector<8x128xf32>
    %100 = math.tanh %99 : vector<8x128xf32>
    %101 = arith.mulf %94, %100 : vector<8x128xf32>
    %c16_30 = arith.constant 16 : index
    %c0_31 = arith.constant 0 : index
    %102 = vector.load %arg5[%c16_30, %c0_31] : memref<64x512xf32, #tpu.memory_space<vmem>>, vector<8x512xf32>
    %103 = arith.truncf %79 : vector<8x128xf32> to vector<8x128xbf16>
    %cst_32 = arith.constant dense<0.000000e+00> : vector<8x512xf32>
    %104 = tpu.matmul %103, %1, %cst_32 {dimension_numbers = #tpu.dot_dimension_numbers<[1], [0], [0], [1], [0, 0, 1, 1], [], []>} : vector<8x128xbf16>, vector<128x512xbf16>, vector<8x512xf32> -> vector<8x512xf32>
    %105 = arith.addf %102, %104 : vector<8x512xf32>
    %106 = vector.extract_strided_slice %105 {offsets = [0, 0], sizes = [8, 384], strides = [1, 1]} : vector<8x512xf32> to vector<8x384xf32>
    %cst_33 = arith.constant 5.000000e-01 : f32
    %107 = vector.broadcast %cst_33 : f32 to vector<8x384xf32>
    %108 = arith.mulf %107, %106 : vector<8x384xf32>
    %109 = math.tanh %108 : vector<8x384xf32>
    %cst_34 = arith.constant 5.000000e-01 : f32
    %110 = vector.broadcast %cst_34 : f32 to vector<8x384xf32>
    %111 = arith.mulf %110, %109 : vector<8x384xf32>
    %cst_35 = arith.constant 5.000000e-01 : f32
    %112 = vector.broadcast %cst_35 : f32 to vector<8x384xf32>
    %113 = arith.addf %111, %112 : vector<8x384xf32>
    %114 = vector.extract_strided_slice %113 {offsets = [0, 0], sizes = [8, 128], strides = [1, 1]} : vector<8x384xf32> to vector<8x128xf32>
    %115 = vector.extract_strided_slice %113 {offsets = [0, 128], sizes = [8, 128], strides = [1, 1]} : vector<8x384xf32> to vector<8x128xf32>
    %116 = vector.extract_strided_slice %113 {offsets = [0, 256], sizes = [8, 128], strides = [1, 1]} : vector<8x384xf32> to vector<8x128xf32>
    %117 = vector.extract_strided_slice %105 {offsets = [0, 384], sizes = [8, 128], strides = [1, 1]} : vector<8x512xf32> to vector<8x128xf32>
    %118 = math.tanh %117 : vector<8x128xf32>
    %119 = arith.mulf %115, %77 : vector<8x128xf32>
    %120 = arith.mulf %114, %118 : vector<8x128xf32>
    %121 = arith.addf %119, %120 : vector<8x128xf32>
    %122 = math.tanh %121 : vector<8x128xf32>
    %123 = arith.mulf %116, %122 : vector<8x128xf32>
    %124 = tpu.concatenate %123, %101 in 1 : vector<8x128xf32>, vector<8x128xf32> -> vector<8x256xf32>
    %125 = arith.truncf %124 : vector<8x256xf32> to vector<8x256xbf16>
    %cst_36 = arith.constant dense<0.000000e+00> : vector<8x512xf32>
    %126 = tpu.matmul %125, %2, %cst_36 {dimension_numbers = #tpu.dot_dimension_numbers<[1], [0], [0], [1], [0, 0, 1, 1], [], []>} : vector<8x256xbf16>, vector<256x512xbf16>, vector<8x512xf32> -> vector<8x512xf32>
    %127 = arith.addf %126, %6 : vector<8x512xf32>
    %128 = vector.extract_strided_slice %127 {offsets = [0, 0], sizes = [8, 384], strides = [1, 1]} : vector<8x512xf32> to vector<8x384xf32>
    %cst_37 = arith.constant 5.000000e-01 : f32
    %129 = vector.broadcast %cst_37 : f32 to vector<8x384xf32>
    %130 = arith.mulf %129, %128 : vector<8x384xf32>
    %131 = math.tanh %130 : vector<8x384xf32>
    %cst_38 = arith.constant 5.000000e-01 : f32
    %132 = vector.broadcast %cst_38 : f32 to vector<8x384xf32>
    %133 = arith.mulf %132, %131 : vector<8x384xf32>
    %cst_39 = arith.constant 5.000000e-01 : f32
    %134 = vector.broadcast %cst_39 : f32 to vector<8x384xf32>
    %135 = arith.addf %133, %134 : vector<8x384xf32>
    %136 = vector.extract_strided_slice %135 {offsets = [0, 0], sizes = [8, 128], strides = [1, 1]} : vector<8x384xf32> to vector<8x128xf32>
    %137 = vector.extract_strided_slice %135 {offsets = [0, 128], sizes = [8, 128], strides = [1, 1]} : vector<8x384xf32> to vector<8x128xf32>
    %138 = vector.extract_strided_slice %135 {offsets = [0, 256], sizes = [8, 128], strides = [1, 1]} : vector<8x384xf32> to vector<8x128xf32>
    %139 = vector.extract_strided_slice %127 {offsets = [0, 384], sizes = [8, 128], strides = [1, 1]} : vector<8x512xf32> to vector<8x128xf32>
    %140 = math.tanh %139 : vector<8x128xf32>
    %141 = arith.mulf %137, %99 : vector<8x128xf32>
    %142 = arith.mulf %136, %140 : vector<8x128xf32>
    %143 = arith.addf %141, %142 : vector<8x128xf32>
    %144 = math.tanh %143 : vector<8x128xf32>
    %145 = arith.mulf %138, %144 : vector<8x128xf32>
    %c24 = arith.constant 24 : index
    %c0_40 = arith.constant 0 : index
    %146 = vector.load %arg5[%c24, %c0_40] : memref<64x512xf32, #tpu.memory_space<vmem>>, vector<8x512xf32>
    %147 = arith.truncf %123 : vector<8x128xf32> to vector<8x128xbf16>
    %cst_41 = arith.constant dense<0.000000e+00> : vector<8x512xf32>
    %148 = tpu.matmul %147, %1, %cst_41 {dimension_numbers = #tpu.dot_dimension_numbers<[1], [0], [0], [1], [0, 0, 1, 1], [], []>} : vector<8x128xbf16>, vector<128x512xbf16>, vector<8x512xf32> -> vector<8x512xf32>
    %149 = arith.addf %146, %148 : vector<8x512xf32>
    %150 = vector.extract_strided_slice %149 {offsets = [0, 0], sizes = [8, 384], strides = [1, 1]} : vector<8x512xf32> to vector<8x384xf32>
    %cst_42 = arith.constant 5.000000e-01 : f32
    %151 = vector.broadcast %cst_42 : f32 to vector<8x384xf32>
    %152 = arith.mulf %151, %150 : vector<8x384xf32>
    %153 = math.tanh %152 : vector<8x384xf32>
    %cst_43 = arith.constant 5.000000e-01 : f32
    %154 = vector.broadcast %cst_43 : f32 to vector<8x384xf32>
    %155 = arith.mulf %154, %153 : vector<8x384xf32>
    %cst_44 = arith.constant 5.000000e-01 : f32
    %156 = vector.broadcast %cst_44 : f32 to vector<8x384xf32>
    %157 = arith.addf %155, %156 : vector<8x384xf32>
    %158 = vector.extract_strided_slice %157 {offsets = [0, 0], sizes = [8, 128], strides = [1, 1]} : vector<8x384xf32> to vector<8x128xf32>
    %159 = vector.extract_strided_slice %157 {offsets = [0, 128], sizes = [8, 128], strides = [1, 1]} : vector<8x384xf32> to vector<8x128xf32>
    %160 = vector.extract_strided_slice %157 {offsets = [0, 256], sizes = [8, 128], strides = [1, 1]} : vector<8x384xf32> to vector<8x128xf32>
    %161 = vector.extract_strided_slice %149 {offsets = [0, 384], sizes = [8, 128], strides = [1, 1]} : vector<8x512xf32> to vector<8x128xf32>
    %162 = math.tanh %161 : vector<8x128xf32>
    %163 = arith.mulf %159, %121 : vector<8x128xf32>
    %164 = arith.mulf %158, %162 : vector<8x128xf32>
    %165 = arith.addf %163, %164 : vector<8x128xf32>
    %166 = math.tanh %165 : vector<8x128xf32>
    %167 = arith.mulf %160, %166 : vector<8x128xf32>
    %168 = tpu.concatenate %167, %145 in 1 : vector<8x128xf32>, vector<8x128xf32> -> vector<8x256xf32>
    %169 = arith.truncf %168 : vector<8x256xf32> to vector<8x256xbf16>
    %cst_45 = arith.constant dense<0.000000e+00> : vector<8x512xf32>
    %170 = tpu.matmul %169, %2, %cst_45 {dimension_numbers = #tpu.dot_dimension_numbers<[1], [0], [0], [1], [0, 0, 1, 1], [], []>} : vector<8x256xbf16>, vector<256x512xbf16>, vector<8x512xf32> -> vector<8x512xf32>
    %171 = arith.addf %170, %6 : vector<8x512xf32>
    %172 = vector.extract_strided_slice %171 {offsets = [0, 0], sizes = [8, 384], strides = [1, 1]} : vector<8x512xf32> to vector<8x384xf32>
    %cst_46 = arith.constant 5.000000e-01 : f32
    %173 = vector.broadcast %cst_46 : f32 to vector<8x384xf32>
    %174 = arith.mulf %173, %172 : vector<8x384xf32>
    %175 = math.tanh %174 : vector<8x384xf32>
    %cst_47 = arith.constant 5.000000e-01 : f32
    %176 = vector.broadcast %cst_47 : f32 to vector<8x384xf32>
    %177 = arith.mulf %176, %175 : vector<8x384xf32>
    %cst_48 = arith.constant 5.000000e-01 : f32
    %178 = vector.broadcast %cst_48 : f32 to vector<8x384xf32>
    %179 = arith.addf %177, %178 : vector<8x384xf32>
    %180 = vector.extract_strided_slice %179 {offsets = [0, 0], sizes = [8, 128], strides = [1, 1]} : vector<8x384xf32> to vector<8x128xf32>
    %181 = vector.extract_strided_slice %179 {offsets = [0, 128], sizes = [8, 128], strides = [1, 1]} : vector<8x384xf32> to vector<8x128xf32>
    %182 = vector.extract_strided_slice %179 {offsets = [0, 256], sizes = [8, 128], strides = [1, 1]} : vector<8x384xf32> to vector<8x128xf32>
    %183 = vector.extract_strided_slice %171 {offsets = [0, 384], sizes = [8, 128], strides = [1, 1]} : vector<8x512xf32> to vector<8x128xf32>
    %184 = math.tanh %183 : vector<8x128xf32>
    %185 = arith.mulf %181, %143 : vector<8x128xf32>
    %186 = arith.mulf %180, %184 : vector<8x128xf32>
    %187 = arith.addf %185, %186 : vector<8x128xf32>
    %188 = math.tanh %187 : vector<8x128xf32>
    %189 = arith.mulf %182, %188 : vector<8x128xf32>
    %c32 = arith.constant 32 : index
    %c0_49 = arith.constant 0 : index
    %190 = vector.load %arg5[%c32, %c0_49] : memref<64x512xf32, #tpu.memory_space<vmem>>, vector<8x512xf32>
    %191 = arith.truncf %167 : vector<8x128xf32> to vector<8x128xbf16>
    %cst_50 = arith.constant dense<0.000000e+00> : vector<8x512xf32>
    %192 = tpu.matmul %191, %1, %cst_50 {dimension_numbers = #tpu.dot_dimension_numbers<[1], [0], [0], [1], [0, 0, 1, 1], [], []>} : vector<8x128xbf16>, vector<128x512xbf16>, vector<8x512xf32> -> vector<8x512xf32>
    %193 = arith.addf %190, %192 : vector<8x512xf32>
    %194 = vector.extract_strided_slice %193 {offsets = [0, 0], sizes = [8, 384], strides = [1, 1]} : vector<8x512xf32> to vector<8x384xf32>
    %cst_51 = arith.constant 5.000000e-01 : f32
    %195 = vector.broadcast %cst_51 : f32 to vector<8x384xf32>
    %196 = arith.mulf %195, %194 : vector<8x384xf32>
    %197 = math.tanh %196 : vector<8x384xf32>
    %cst_52 = arith.constant 5.000000e-01 : f32
    %198 = vector.broadcast %cst_52 : f32 to vector<8x384xf32>
    %199 = arith.mulf %198, %197 : vector<8x384xf32>
    %cst_53 = arith.constant 5.000000e-01 : f32
    %200 = vector.broadcast %cst_53 : f32 to vector<8x384xf32>
    %201 = arith.addf %199, %200 : vector<8x384xf32>
    %202 = vector.extract_strided_slice %201 {offsets = [0, 0], sizes = [8, 128], strides = [1, 1]} : vector<8x384xf32> to vector<8x128xf32>
    %203 = vector.extract_strided_slice %201 {offsets = [0, 128], sizes = [8, 128], strides = [1, 1]} : vector<8x384xf32> to vector<8x128xf32>
    %204 = vector.extract_strided_slice %201 {offsets = [0, 256], sizes = [8, 128], strides = [1, 1]} : vector<8x384xf32> to vector<8x128xf32>
    %205 = vector.extract_strided_slice %193 {offsets = [0, 384], sizes = [8, 128], strides = [1, 1]} : vector<8x512xf32> to vector<8x128xf32>
    %206 = math.tanh %205 : vector<8x128xf32>
    %207 = arith.mulf %203, %165 : vector<8x128xf32>
    %208 = arith.mulf %202, %206 : vector<8x128xf32>
    %209 = arith.addf %207, %208 : vector<8x128xf32>
    %210 = math.tanh %209 : vector<8x128xf32>
    %211 = arith.mulf %204, %210 : vector<8x128xf32>
    %212 = tpu.concatenate %211, %189 in 1 : vector<8x128xf32>, vector<8x128xf32> -> vector<8x256xf32>
    %213 = arith.truncf %212 : vector<8x256xf32> to vector<8x256xbf16>
    %cst_54 = arith.constant dense<0.000000e+00> : vector<8x512xf32>
    %214 = tpu.matmul %213, %2, %cst_54 {dimension_numbers = #tpu.dot_dimension_numbers<[1], [0], [0], [1], [0, 0, 1, 1], [], []>} : vector<8x256xbf16>, vector<256x512xbf16>, vector<8x512xf32> -> vector<8x512xf32>
    %215 = arith.addf %214, %6 : vector<8x512xf32>
    %216 = vector.extract_strided_slice %215 {offsets = [0, 0], sizes = [8, 384], strides = [1, 1]} : vector<8x512xf32> to vector<8x384xf32>
    %cst_55 = arith.constant 5.000000e-01 : f32
    %217 = vector.broadcast %cst_55 : f32 to vector<8x384xf32>
    %218 = arith.mulf %217, %216 : vector<8x384xf32>
    %219 = math.tanh %218 : vector<8x384xf32>
    %cst_56 = arith.constant 5.000000e-01 : f32
    %220 = vector.broadcast %cst_56 : f32 to vector<8x384xf32>
    %221 = arith.mulf %220, %219 : vector<8x384xf32>
    %cst_57 = arith.constant 5.000000e-01 : f32
    %222 = vector.broadcast %cst_57 : f32 to vector<8x384xf32>
    %223 = arith.addf %221, %222 : vector<8x384xf32>
    %224 = vector.extract_strided_slice %223 {offsets = [0, 0], sizes = [8, 128], strides = [1, 1]} : vector<8x384xf32> to vector<8x128xf32>
    %225 = vector.extract_strided_slice %223 {offsets = [0, 128], sizes = [8, 128], strides = [1, 1]} : vector<8x384xf32> to vector<8x128xf32>
    %226 = vector.extract_strided_slice %223 {offsets = [0, 256], sizes = [8, 128], strides = [1, 1]} : vector<8x384xf32> to vector<8x128xf32>
    %227 = vector.extract_strided_slice %215 {offsets = [0, 384], sizes = [8, 128], strides = [1, 1]} : vector<8x512xf32> to vector<8x128xf32>
    %228 = math.tanh %227 : vector<8x128xf32>
    %229 = arith.mulf %225, %187 : vector<8x128xf32>
    %230 = arith.mulf %224, %228 : vector<8x128xf32>
    %231 = arith.addf %229, %230 : vector<8x128xf32>
    %232 = math.tanh %231 : vector<8x128xf32>
    %233 = arith.mulf %226, %232 : vector<8x128xf32>
    %c40 = arith.constant 40 : index
    %c0_58 = arith.constant 0 : index
    %234 = vector.load %arg5[%c40, %c0_58] : memref<64x512xf32, #tpu.memory_space<vmem>>, vector<8x512xf32>
    %235 = arith.truncf %211 : vector<8x128xf32> to vector<8x128xbf16>
    %cst_59 = arith.constant dense<0.000000e+00> : vector<8x512xf32>
    %236 = tpu.matmul %235, %1, %cst_59 {dimension_numbers = #tpu.dot_dimension_numbers<[1], [0], [0], [1], [0, 0, 1, 1], [], []>} : vector<8x128xbf16>, vector<128x512xbf16>, vector<8x512xf32> -> vector<8x512xf32>
    %237 = arith.addf %234, %236 : vector<8x512xf32>
    %238 = vector.extract_strided_slice %237 {offsets = [0, 0], sizes = [8, 384], strides = [1, 1]} : vector<8x512xf32> to vector<8x384xf32>
    %cst_60 = arith.constant 5.000000e-01 : f32
    %239 = vector.broadcast %cst_60 : f32 to vector<8x384xf32>
    %240 = arith.mulf %239, %238 : vector<8x384xf32>
    %241 = math.tanh %240 : vector<8x384xf32>
    %cst_61 = arith.constant 5.000000e-01 : f32
    %242 = vector.broadcast %cst_61 : f32 to vector<8x384xf32>
    %243 = arith.mulf %242, %241 : vector<8x384xf32>
    %cst_62 = arith.constant 5.000000e-01 : f32
    %244 = vector.broadcast %cst_62 : f32 to vector<8x384xf32>
    %245 = arith.addf %243, %244 : vector<8x384xf32>
    %246 = vector.extract_strided_slice %245 {offsets = [0, 0], sizes = [8, 128], strides = [1, 1]} : vector<8x384xf32> to vector<8x128xf32>
    %247 = vector.extract_strided_slice %245 {offsets = [0, 128], sizes = [8, 128], strides = [1, 1]} : vector<8x384xf32> to vector<8x128xf32>
    %248 = vector.extract_strided_slice %245 {offsets = [0, 256], sizes = [8, 128], strides = [1, 1]} : vector<8x384xf32> to vector<8x128xf32>
    %249 = vector.extract_strided_slice %237 {offsets = [0, 384], sizes = [8, 128], strides = [1, 1]} : vector<8x512xf32> to vector<8x128xf32>
    %250 = math.tanh %249 : vector<8x128xf32>
    %251 = arith.mulf %247, %209 : vector<8x128xf32>
    %252 = arith.mulf %246, %250 : vector<8x128xf32>
    %253 = arith.addf %251, %252 : vector<8x128xf32>
    %254 = math.tanh %253 : vector<8x128xf32>
    %255 = arith.mulf %248, %254 : vector<8x128xf32>
    %256 = tpu.concatenate %255, %233 in 1 : vector<8x128xf32>, vector<8x128xf32> -> vector<8x256xf32>
    %257 = arith.truncf %256 : vector<8x256xf32> to vector<8x256xbf16>
    %cst_63 = arith.constant dense<0.000000e+00> : vector<8x512xf32>
    %258 = tpu.matmul %257, %2, %cst_63 {dimension_numbers = #tpu.dot_dimension_numbers<[1], [0], [0], [1], [0, 0, 1, 1], [], []>} : vector<8x256xbf16>, vector<256x512xbf16>, vector<8x512xf32> -> vector<8x512xf32>
    %259 = arith.addf %258, %6 : vector<8x512xf32>
    %260 = vector.extract_strided_slice %259 {offsets = [0, 0], sizes = [8, 384], strides = [1, 1]} : vector<8x512xf32> to vector<8x384xf32>
    %cst_64 = arith.constant 5.000000e-01 : f32
    %261 = vector.broadcast %cst_64 : f32 to vector<8x384xf32>
    %262 = arith.mulf %261, %260 : vector<8x384xf32>
    %263 = math.tanh %262 : vector<8x384xf32>
    %cst_65 = arith.constant 5.000000e-01 : f32
    %264 = vector.broadcast %cst_65 : f32 to vector<8x384xf32>
    %265 = arith.mulf %264, %263 : vector<8x384xf32>
    %cst_66 = arith.constant 5.000000e-01 : f32
    %266 = vector.broadcast %cst_66 : f32 to vector<8x384xf32>
    %267 = arith.addf %265, %266 : vector<8x384xf32>
    %268 = vector.extract_strided_slice %267 {offsets = [0, 0], sizes = [8, 128], strides = [1, 1]} : vector<8x384xf32> to vector<8x128xf32>
    %269 = vector.extract_strided_slice %267 {offsets = [0, 128], sizes = [8, 128], strides = [1, 1]} : vector<8x384xf32> to vector<8x128xf32>
    %270 = vector.extract_strided_slice %267 {offsets = [0, 256], sizes = [8, 128], strides = [1, 1]} : vector<8x384xf32> to vector<8x128xf32>
    %271 = vector.extract_strided_slice %259 {offsets = [0, 384], sizes = [8, 128], strides = [1, 1]} : vector<8x512xf32> to vector<8x128xf32>
    %272 = math.tanh %271 : vector<8x128xf32>
    %273 = arith.mulf %269, %231 : vector<8x128xf32>
    %274 = arith.mulf %268, %272 : vector<8x128xf32>
    %275 = arith.addf %273, %274 : vector<8x128xf32>
    %276 = math.tanh %275 : vector<8x128xf32>
    %277 = arith.mulf %270, %276 : vector<8x128xf32>
    %c48 = arith.constant 48 : index
    %c0_67 = arith.constant 0 : index
    %278 = vector.load %arg5[%c48, %c0_67] : memref<64x512xf32, #tpu.memory_space<vmem>>, vector<8x512xf32>
    %279 = arith.truncf %255 : vector<8x128xf32> to vector<8x128xbf16>
    %cst_68 = arith.constant dense<0.000000e+00> : vector<8x512xf32>
    %280 = tpu.matmul %279, %1, %cst_68 {dimension_numbers = #tpu.dot_dimension_numbers<[1], [0], [0], [1], [0, 0, 1, 1], [], []>} : vector<8x128xbf16>, vector<128x512xbf16>, vector<8x512xf32> -> vector<8x512xf32>
    %281 = arith.addf %278, %280 : vector<8x512xf32>
    %282 = vector.extract_strided_slice %281 {offsets = [0, 0], sizes = [8, 384], strides = [1, 1]} : vector<8x512xf32> to vector<8x384xf32>
    %cst_69 = arith.constant 5.000000e-01 : f32
    %283 = vector.broadcast %cst_69 : f32 to vector<8x384xf32>
    %284 = arith.mulf %283, %282 : vector<8x384xf32>
    %285 = math.tanh %284 : vector<8x384xf32>
    %cst_70 = arith.constant 5.000000e-01 : f32
    %286 = vector.broadcast %cst_70 : f32 to vector<8x384xf32>
    %287 = arith.mulf %286, %285 : vector<8x384xf32>
    %cst_71 = arith.constant 5.000000e-01 : f32
    %288 = vector.broadcast %cst_71 : f32 to vector<8x384xf32>
    %289 = arith.addf %287, %288 : vector<8x384xf32>
    %290 = vector.extract_strided_slice %289 {offsets = [0, 0], sizes = [8, 128], strides = [1, 1]} : vector<8x384xf32> to vector<8x128xf32>
    %291 = vector.extract_strided_slice %289 {offsets = [0, 128], sizes = [8, 128], strides = [1, 1]} : vector<8x384xf32> to vector<8x128xf32>
    %292 = vector.extract_strided_slice %289 {offsets = [0, 256], sizes = [8, 128], strides = [1, 1]} : vector<8x384xf32> to vector<8x128xf32>
    %293 = vector.extract_strided_slice %281 {offsets = [0, 384], sizes = [8, 128], strides = [1, 1]} : vector<8x512xf32> to vector<8x128xf32>
    %294 = math.tanh %293 : vector<8x128xf32>
    %295 = arith.mulf %291, %253 : vector<8x128xf32>
    %296 = arith.mulf %290, %294 : vector<8x128xf32>
    %297 = arith.addf %295, %296 : vector<8x128xf32>
    %298 = math.tanh %297 : vector<8x128xf32>
    %299 = arith.mulf %292, %298 : vector<8x128xf32>
    %300 = tpu.concatenate %299, %277 in 1 : vector<8x128xf32>, vector<8x128xf32> -> vector<8x256xf32>
    %301 = arith.truncf %300 : vector<8x256xf32> to vector<8x256xbf16>
    %cst_72 = arith.constant dense<0.000000e+00> : vector<8x512xf32>
    %302 = tpu.matmul %301, %2, %cst_72 {dimension_numbers = #tpu.dot_dimension_numbers<[1], [0], [0], [1], [0, 0, 1, 1], [], []>} : vector<8x256xbf16>, vector<256x512xbf16>, vector<8x512xf32> -> vector<8x512xf32>
    %303 = arith.addf %302, %6 : vector<8x512xf32>
    %304 = vector.extract_strided_slice %303 {offsets = [0, 0], sizes = [8, 384], strides = [1, 1]} : vector<8x512xf32> to vector<8x384xf32>
    %cst_73 = arith.constant 5.000000e-01 : f32
    %305 = vector.broadcast %cst_73 : f32 to vector<8x384xf32>
    %306 = arith.mulf %305, %304 : vector<8x384xf32>
    %307 = math.tanh %306 : vector<8x384xf32>
    %cst_74 = arith.constant 5.000000e-01 : f32
    %308 = vector.broadcast %cst_74 : f32 to vector<8x384xf32>
    %309 = arith.mulf %308, %307 : vector<8x384xf32>
    %cst_75 = arith.constant 5.000000e-01 : f32
    %310 = vector.broadcast %cst_75 : f32 to vector<8x384xf32>
    %311 = arith.addf %309, %310 : vector<8x384xf32>
    %312 = vector.extract_strided_slice %311 {offsets = [0, 0], sizes = [8, 128], strides = [1, 1]} : vector<8x384xf32> to vector<8x128xf32>
    %313 = vector.extract_strided_slice %311 {offsets = [0, 128], sizes = [8, 128], strides = [1, 1]} : vector<8x384xf32> to vector<8x128xf32>
    %314 = vector.extract_strided_slice %311 {offsets = [0, 256], sizes = [8, 128], strides = [1, 1]} : vector<8x384xf32> to vector<8x128xf32>
    %315 = vector.extract_strided_slice %303 {offsets = [0, 384], sizes = [8, 128], strides = [1, 1]} : vector<8x512xf32> to vector<8x128xf32>
    %316 = math.tanh %315 : vector<8x128xf32>
    %317 = arith.mulf %313, %275 : vector<8x128xf32>
    %318 = arith.mulf %312, %316 : vector<8x128xf32>
    %319 = arith.addf %317, %318 : vector<8x128xf32>
    %320 = math.tanh %319 : vector<8x128xf32>
    %321 = arith.mulf %314, %320 : vector<8x128xf32>
    %c56 = arith.constant 56 : index
    %c0_76 = arith.constant 0 : index
    %322 = vector.load %arg5[%c56, %c0_76] : memref<64x512xf32, #tpu.memory_space<vmem>>, vector<8x512xf32>
    %323 = arith.truncf %299 : vector<8x128xf32> to vector<8x128xbf16>
    %cst_77 = arith.constant dense<0.000000e+00> : vector<8x512xf32>
    %324 = tpu.matmul %323, %1, %cst_77 {dimension_numbers = #tpu.dot_dimension_numbers<[1], [0], [0], [1], [0, 0, 1, 1], [], []>} : vector<8x128xbf16>, vector<128x512xbf16>, vector<8x512xf32> -> vector<8x512xf32>
    %325 = arith.addf %322, %324 : vector<8x512xf32>
    %326 = vector.extract_strided_slice %325 {offsets = [0, 0], sizes = [8, 384], strides = [1, 1]} : vector<8x512xf32> to vector<8x384xf32>
    %cst_78 = arith.constant 5.000000e-01 : f32
    %327 = vector.broadcast %cst_78 : f32 to vector<8x384xf32>
    %328 = arith.mulf %327, %326 : vector<8x384xf32>
    %329 = math.tanh %328 : vector<8x384xf32>
    %cst_79 = arith.constant 5.000000e-01 : f32
    %330 = vector.broadcast %cst_79 : f32 to vector<8x384xf32>
    %331 = arith.mulf %330, %329 : vector<8x384xf32>
    %cst_80 = arith.constant 5.000000e-01 : f32
    %332 = vector.broadcast %cst_80 : f32 to vector<8x384xf32>
    %333 = arith.addf %331, %332 : vector<8x384xf32>
    %334 = vector.extract_strided_slice %333 {offsets = [0, 0], sizes = [8, 128], strides = [1, 1]} : vector<8x384xf32> to vector<8x128xf32>
    %335 = vector.extract_strided_slice %333 {offsets = [0, 128], sizes = [8, 128], strides = [1, 1]} : vector<8x384xf32> to vector<8x128xf32>
    %336 = vector.extract_strided_slice %333 {offsets = [0, 256], sizes = [8, 128], strides = [1, 1]} : vector<8x384xf32> to vector<8x128xf32>
    %337 = vector.extract_strided_slice %325 {offsets = [0, 384], sizes = [8, 128], strides = [1, 1]} : vector<8x512xf32> to vector<8x128xf32>
    %338 = math.tanh %337 : vector<8x128xf32>
    %339 = arith.mulf %335, %297 : vector<8x128xf32>
    %340 = arith.mulf %334, %338 : vector<8x128xf32>
    %341 = arith.addf %339, %340 : vector<8x128xf32>
    %342 = math.tanh %341 : vector<8x128xf32>
    %343 = arith.mulf %336, %342 : vector<8x128xf32>
    %344 = tpu.concatenate %343, %321 in 1 : vector<8x128xf32>, vector<8x128xf32> -> vector<8x256xf32>
    %345 = arith.truncf %344 : vector<8x256xf32> to vector<8x256xbf16>
    %cst_81 = arith.constant dense<0.000000e+00> : vector<8x512xf32>
    %346 = tpu.matmul %345, %2, %cst_81 {dimension_numbers = #tpu.dot_dimension_numbers<[1], [0], [0], [1], [0, 0, 1, 1], [], []>} : vector<8x256xbf16>, vector<256x512xbf16>, vector<8x512xf32> -> vector<8x512xf32>
    %347 = arith.addf %346, %6 : vector<8x512xf32>
    %348 = vector.extract_strided_slice %347 {offsets = [0, 0], sizes = [8, 384], strides = [1, 1]} : vector<8x512xf32> to vector<8x384xf32>
    %cst_82 = arith.constant 5.000000e-01 : f32
    %349 = vector.broadcast %cst_82 : f32 to vector<8x384xf32>
    %350 = arith.mulf %349, %348 : vector<8x384xf32>
    %351 = math.tanh %350 : vector<8x384xf32>
    %cst_83 = arith.constant 5.000000e-01 : f32
    %352 = vector.broadcast %cst_83 : f32 to vector<8x384xf32>
    %353 = arith.mulf %352, %351 : vector<8x384xf32>
    %cst_84 = arith.constant 5.000000e-01 : f32
    %354 = vector.broadcast %cst_84 : f32 to vector<8x384xf32>
    %355 = arith.addf %353, %354 : vector<8x384xf32>
    %356 = vector.extract_strided_slice %355 {offsets = [0, 0], sizes = [8, 128], strides = [1, 1]} : vector<8x384xf32> to vector<8x128xf32>
    %357 = vector.extract_strided_slice %355 {offsets = [0, 128], sizes = [8, 128], strides = [1, 1]} : vector<8x384xf32> to vector<8x128xf32>
    %358 = vector.extract_strided_slice %355 {offsets = [0, 256], sizes = [8, 128], strides = [1, 1]} : vector<8x384xf32> to vector<8x128xf32>
    %359 = vector.extract_strided_slice %347 {offsets = [0, 384], sizes = [8, 128], strides = [1, 1]} : vector<8x512xf32> to vector<8x128xf32>
    %360 = math.tanh %359 : vector<8x128xf32>
    %361 = arith.mulf %357, %319 : vector<8x128xf32>
    %362 = arith.mulf %356, %360 : vector<8x128xf32>
    %363 = arith.addf %361, %362 : vector<8x128xf32>
    %364 = math.tanh %363 : vector<8x128xf32>
    %365 = arith.mulf %358, %364 : vector<8x128xf32>
    %c0_85 = arith.constant 0 : index
    %c0_86 = arith.constant 0 : index
    %366 = vector.load %arg2[%c0_85, %c0_86] : memref<256x128xbf16, #tpu.memory_space<vmem>>, vector<128x128xbf16>
    %c128 = arith.constant 128 : index
    %c0_87 = arith.constant 0 : index
    %367 = vector.load %arg2[%c128, %c0_87] : memref<256x128xbf16, #tpu.memory_space<vmem>>, vector<128x128xbf16>
    %c2 = arith.constant 2 : index
    %c0_88 = arith.constant 0 : index
    %368 = vector.load %arg3[%c2, %c0_88] : memref<4x512xf32, #tpu.memory_space<vmem>>, vector<1x128xf32>
    %c3 = arith.constant 3 : index
    %c0_89 = arith.constant 0 : index
    %369 = vector.load %arg3[%c3, %c0_89] : memref<4x512xf32, #tpu.memory_space<vmem>>, vector<1x128xf32>
    %370 = arith.truncf %365 : vector<8x128xf32> to vector<8x128xbf16>
    %cst_90 = arith.constant dense<0.000000e+00> : vector<8x128xf32>
    %371 = tpu.matmul %370, %366, %cst_90 {dimension_numbers = #tpu.dot_dimension_numbers<[1], [0], [0], [1], [0, 0, 1, 1], [], []>} : vector<8x128xbf16>, vector<128x128xbf16>, vector<8x128xf32> -> vector<8x128xf32>
    %372 = vector.broadcast %368 : vector<1x128xf32> to vector<8x128xf32>
    %373 = arith.addf %371, %372 : vector<8x128xf32>
    %cst_91 = arith.constant 0.000000e+00 : f32
    %374 = vector.broadcast %cst_91 : f32 to vector<8x128xf32>
    %375 = arith.maximumf %373, %374 : vector<8x128xf32>
    %376 = arith.truncf %375 : vector<8x128xf32> to vector<8x128xbf16>
    %cst_92 = arith.constant dense<0.000000e+00> : vector<8x128xf32>
    %377 = tpu.matmul %376, %367, %cst_92 {dimension_numbers = #tpu.dot_dimension_numbers<[1], [0], [0], [1], [0, 0, 1, 1], [], []>} : vector<8x128xbf16>, vector<128x128xbf16>, vector<8x128xf32> -> vector<8x128xf32>
    %378 = vector.broadcast %369 : vector<1x128xf32> to vector<8x128xf32>
    %379 = arith.addf %377, %378 : vector<8x128xf32>
    %c0_93 = arith.constant 0 : index
    %c0_94 = arith.constant 0 : index
    %380 = vector.load %arg4[%c0_93, %c0_94] : memref<8x128xf32, #tpu.memory_space<vmem>>, vector<8x128xf32>
    tpu.vector_store %arg4[%c0_93, %c0_94], %379 {strides = array<i32>} : memref<8x128xf32, #tpu.memory_space<vmem>>, vector<8x128xf32>,
    return
  }
}

</mosaic_0001>

<bundles_post_ra>
// kernel: tpu_custom_call.1
= control target key start
LH: loop header
LB: loop body
LE: loop exit
PB: predicated region body
PF: predicated region fallthrough
CT: control target
= control target key end

     0   :  { %9 = vsyncpa [#allocation4], 0  ;;  %s5343_s0 = inlined_call_operand.vmem [shape: f32[64,16], index: 0, kind: input, shape index: {}]   ;;  %s5344_s1 = inlined_call_operand.hbm [shape: bf16[400,512], index: 1, kind: input, shape index: {}]   ;;  %s5345_s2 = inlined_call_operand.hbm [shape: bf16[256,128], index: 2, kind: input, shape index: {}]   ;;  %s5346_s3 = inlined_call_operand.vmem [shape: f32[4,512], index: 3, kind: input, shape index: {}]   ;;  %s5347_s4 = inlined_call_operand.hbm [shape: f32[8,128], index: 4, kind: output, shape index: {}]  }
   0x1   :  { %10 = vsyncpa [#allocation7], 0 }
   0x2   :  { %11 = vsyncpa [#allocation5], 0  ;;  %s3599_s15 = smov [#allocation3]   ;;  %s3527_s19 = scalar_lea.hbm %s5344_s1, 12800 }
   0x3   :  { %s19_s16 = sshll.u32 %s3599_s15, 4  ;;  %p3528_p0 = scmp.ne.s32.totalorder %s5344_s1, %s3527_s19  ;;  %s20_s16 = int_to_ptr.vmem [resolvable:$true] %s19_s16 }
   0x4   :  { %p3531_p1 = scmp.lt.u32.totalorder %s3527_s19, %s5344_s1 }
   0x6   :  { %p3533_p2 = pnand %p3531_p1, %p3528_p0 }
   0x8   :  { %3536 = shalt.err (!%p3533_p2)
}
   0x9   :  { %s3537_s24 = scalar_lea.vmem %s20_s16, 12800  ;;  %p3542_p4 = scmp.lt.s32.totalorder %s20_s16, %s20_s16 }
   0xa   :  { %p3538_p3 = scmp.ne.s32.totalorder %s20_s16, %s3537_s24  ;;  %p3543_p5 = scmp.lt.s32.totalorder %s3537_s24, %s3537_s24 }
   0xc   :  { %p3544_p6 = por %p3543_p5, %p3542_p4 }
   0xe   :  { %p3545_p7 = pnand %p3544_p6, %p3538_p3 }
  0x10   :  { %3548 = shalt.err (!%p3545_p7)
}
  0x11   :  { %s3600_s25 = smov 256   ;;  %s3601_s26 = smov 16  }
  0x12   :  { %25 = dma.hbm_to_vmem [thread:$0]  %s5344_s1, 12800, %s20_s16, [#allocation4], %s3600_s25, %s3600_s25, %s3601_s26  }
  0x13   :  { %s3602_s29 = smov [#allocation6]   ;;  %s3549_s7 = scalar_lea.hbm %s5345_s2, 2048 }
  0x14   :  { %s31_s30 = sshll.u32 %s3602_s29, 4  ;;  %p3550_p8 = scmp.ne.s32.totalorder %s5345_s2, %s3549_s7  ;;  %s32_s30 = int_to_ptr.vmem [resolvable:$true] %s31_s30 }
  0x15   :  { %p3553_p9 = scmp.lt.u32.totalorder %s3549_s7, %s5345_s2 }
  0x17   :  { %p3555_p10 = pnand %p3553_p9, %p3550_p8 }
  0x19   :  { %3558 = shalt.err (!%p3555_p10)
}
  0x1a   :  { %s3559_s12 = scalar_lea.vmem %s32_s30, 2048  ;;  %p3564_p12 = scmp.lt.s32.totalorder %s32_s30, %s32_s30 }
  0x1b   :  { %p3560_p11 = scmp.ne.s32.totalorder %s32_s30, %s3559_s12  ;;  %p3565_p13 = scmp.lt.s32.totalorder %s3559_s12, %s3559_s12 }
  0x1d   :  { %p3566_p0 = por %p3565_p13, %p3564_p12 }
  0x1f   :  { %p3567_p1 = pnand %p3566_p0, %p3560_p11 }
  0x21   :  { %3570 = shalt.err (!%p3567_p1)
}
  0x22   :  { %s3603_s1 = smov 64   ;;  %s3604_s13 = smov 4  }
  0x23   :  { %37 = dma.hbm_to_vmem [thread:$0]  %s5345_s2, 2048, %s32_s30, [#allocation7], %s3603_s1, %s3603_s1, %s3604_s13  }
  0x24   :  { %3593 = dma.done.wait [#allocation4], 12800  }
  0x25   :  { %3594 = vsyncadd [#allocation4], 4294954496 }
  0x26   :  { %3595 = dma.done.wait [#allocation7], 2048  }
  0x27   :  { %3596 = vsyncadd [#allocation7], 4294965248  ;;  %v5348_v0 = vmov 0   ;;  %v3009_v1 = vld [vmem:[#allocation3 + $0x4] ss:$16 sps:$4 sm:$0xff]   ;;  %v172_v6 = vld [vmem:[%s5343_s0 + $0x8] sm:$0xff] }
  0x28   :  { %269 = vmatprep.mubr.bf16.mxu0 %v5348_v0  ;;  %342 = vmatprep.mubr.bf16.mxu1 %v5348_v0  ;;  %v3011_v2 = vld [vmem:[#allocation3 + $0xc] ss:$16 sps:$4 sm:$0xff]   ;;  %v3013_v3 = vld [vmem:[#allocation3] ss:$16 sps:$4 sm:$0xff]   ;;  %v3014_v4 = vld [vmem:[#allocation3 + $0x8] ss:$16 sps:$4 sm:$0xff]  }
  0x29   :  { %237 = vmatprep.subr.bf16.mxu0 %v3009_v1  ;;  %v171_v5 = vld [vmem:[%s5343_s0] sm:$0xff]  ;;  %310 = vmatprep.subr.bf16.mxu1 %v3011_v2  ;;  %vm224_vm0 = vcmask 130048   ;;  %v3669_v9 = vld [vmem:[#allocation3 + $0x2c] ss:$16 sps:$4 sm:$0xff]   ;;  %v3673_v11 = vld [vmem:[#allocation3 + $0x28] ss:$16 sps:$4 sm:$0xff]  }
  0x2a   :  { %238 = vmatpush1.bf16.msra.mxu0 %v3013_v3  ;;  %311 = vmatpush1.bf16.msra.mxu1 %v3014_v4  ;;  %v179_v7 = vpack.c.bf16 %v172_v6, %v171_v5  ;;  %v3667_v8 = vld [vmem:[#allocation3 + $0x24] ss:$16 sps:$4 sm:$0xff]   ;;  %v3671_v10 = vld [vmem:[#allocation3 + $0x20] ss:$16 sps:$4 sm:$0xff]   ;;  %v3680_v13 = vld [vmem:[#allocation3 + $0x4c] ss:$16 sps:$4 sm:$0xff]  }
  0x2b   :  { %579 = vmatprep.subr.bf16.mxu0 %v3667_v8  ;;  %v3676_v12 = vld [vmem:[#allocation3 + $0x44] ss:$16 sps:$4 sm:$0xff]   ;;  %620 = vmatprep.subr.bf16.mxu1 %v3669_v9  ;;  %v3684_v14 = vld [vmem:[#allocation3 + $0x40] ss:$16 sps:$4 sm:$0xff]   ;;  %v3686_v15 = vld [vmem:[#allocation3 + $0x48] ss:$16 sps:$4 sm:$0xff]  }
  0x2c   :  { %v173_v16 = vld [vmem:[%s5343_s0 + $0x10] sm:$0xff]  ;;  %v174_v17 = vld [vmem:[%s5343_s0 + $0x18] sm:$0xff]  ;;  %v175_v26 = vld [vmem:[%s5343_s0 + $0x20] sm:$0xff]  ;;  %vm3608_vm1 = vmmov 0   ;;  %s3609_s12 = smov [#allocation8]  }
  0x2d   :  { %2818 = vmatmul.mubr.msk.bf16.vlgmr.msra.gmra.mrb[0].mxu0 %vm224_vm0, %v179_v7  ;;  %2822 = vmatmul.mubr.msk.bf16.vlgmr.msra.gmra.mrb[0].mxu1 %vm224_vm0, %v179_v7  ;;  %v3698_v18 = vld [vmem:[#allocation3 + $0x64] ss:$16 sps:$4 sm:$0xff]   ;;  %v180_v19 = vpack.c.bf16 %v174_v17, %v173_v16  ;;  %v3701_v20 = vld [vmem:[#allocation3 + $0x6c] ss:$16 sps:$4 sm:$0xff]   ;;  %v3703_v21 = vld [vmem:[#allocation3 + $0x60] ss:$16 sps:$4 sm:$0xff]  }
  0x2e   :  { %580 = vmatpush1.bf16.msra.mxu0 %v3671_v10  ;;  %621 = vmatpush1.bf16.msra.mxu1 %v3673_v11  ;;  %v3706_v22 = vld [vmem:[#allocation3 + $0x68] ss:$16 sps:$4 sm:$0xff]   ;;  %v3710_v23 = vld [vmem:[#allocation3 + $0x84] ss:$16 sps:$4 sm:$0xff]   ;;  %v3713_v24 = vld [vmem:[#allocation3 + $0x8c] ss:$16 sps:$4 sm:$0xff]  }
  0x2f   :  { %581 = vmatprep.subr.bf16.mxu0 %v3676_v12  ;;  %622 = vmatprep.subr.bf16.mxu1 %v3680_v13  ;;  %v3715_v25 = vld [vmem:[#allocation3 + $0x80] ss:$16 sps:$4 sm:$0xff]   ;;  %v176_v27 = vld [vmem:[%s5343_s0 + $0x28] sm:$0xff]  ;;  %v3731_v29 = vld [vmem:[#allocation3 + $0xa4] ss:$16 sps:$4 sm:$0xff]   ;;  %s2803_s1 = sshll.u32 %s3609_s12, 4  ;;  %s2804_s1 = int_to_ptr.vmem [resolvable:$true] %s2803_s1 }
  0x30   :  { %279 = vmatprep.mubr.bf16.mxu0 %v5348_v0  ;;  %352 = vmatprep.mubr.bf16.mxu1 %v5348_v0  ;;  %v3729_v28 = vld [vmem:[#allocation3 + $0x88] ss:$16 sps:$4 sm:$0xff]   ;;  %v3735_v30 = vld [vmem:[#allocation3 + $0xac] ss:$16 sps:$4 sm:$0xff]   ;;  %v181_v31 = vpack.c.bf16 %v176_v27, %v175_v26  ;;  %v3738_v32 = vld [vmem:[#allocation3 + $0xa0] ss:$16 sps:$4 sm:$0xff]   ;;  %p3576_p3 = scmp.lt.s32.totalorder %s2804_s1, %s2804_s1 }
  0x31   :  { %v3740_v33 = vld [vmem:[#allocation3 + $0xa8] ss:$16 sps:$4 sm:$0xff]   ;;  %v3744_v34 = vld [vmem:[#allocation3 + $0xc4] ss:$16 sps:$4 sm:$0xff]   ;;  %v3747_v35 = vld [vmem:[#allocation3 + $0xcc] ss:$16 sps:$4 sm:$0xff]  }
  0x32   :  { %582 = vmatpush1.bf16.msra.mxu0 %v3684_v14  ;;  %623 = vmatpush1.bf16.msra.mxu1 %v3686_v15  ;;  %v3751_v36 = vld [vmem:[#allocation3 + $0xc0] ss:$16 sps:$4 sm:$0xff]   ;;  %v3753_v37 = vld [vmem:[#allocation3 + $0xc8] ss:$16 sps:$4 sm:$0xff]   ;;  %v3765_v40 = vld [vmem:[#allocation3 + $0xe4] ss:$16 sps:$4 sm:$0xff]  }
  0x33   :  { %583 = vmatprep.subr.bf16.mxu0 %v3698_v18  ;;  %624 = vmatprep.subr.bf16.mxu1 %v3701_v20  ;;  %v177_v38 = vld [vmem:[%s5343_s0 + $0x30] sm:$0xff]  ;;  %v178_v39 = vld [vmem:[%s5343_s0 + $0x38] sm:$0xff]  ;;  %s3571_s13 = scalar_lea.vmem %s2804_s1, 128 }
  0x34   :  { %v3769_v41 = vld [vmem:[#allocation3 + $0xec] ss:$16 sps:$4 sm:$0xff]   ;;  %v3771_v42 = vld [vmem:[#allocation3 + $0xe0] ss:$16 sps:$4 sm:$0xff]   ;;  %v182_v43 = vpack.c.bf16 %v178_v39, %v177_v38  ;;  %v3773_v44 = vld [vmem:[#allocation3 + $0xe8] ss:$16 sps:$4 sm:$0xff]   ;;  %p3572_p2 = scmp.ne.s32.totalorder %s2804_s1, %s3571_s13  ;;  %p3577_p4 = scmp.lt.s32.totalorder %s3571_s13, %s3571_s13 }
  0x35   :  { %2819 = vmatmul.mubr.msk.bf16.gmra.mrb[4].mxu0 %vm224_vm0, %v180_v19  ;;  %2823 = vmatmul.mubr.msk.bf16.gmra.mrb[4].mxu1 %vm224_vm0, %v180_v19  ;;  %v3775_v45 = vld [vmem:[#allocation3 + $0x104] ss:$16 sps:$4 sm:$0xff]   ;;  %v3778_v46 = vld [vmem:[#allocation3 + $0x10c] ss:$16 sps:$4 sm:$0xff]   ;;  %v3783_v47 = vld [vmem:[#allocation3 + $0x100] ss:$16 sps:$4 sm:$0xff]  }
  0x36   :  { %584 = vmatpush1.bf16.msra.mxu0 %v3703_v21  ;;  %289 = vmatprep.mubr.bf16.mxu0 %v5348_v0  ;;  %v3787_v48 = vld [vmem:[#allocation3 + $0x108] ss:$16 sps:$4 sm:$0xff]   ;;  %v3799_v49 = vld [vmem:[#allocation3 + $0x124] ss:$16 sps:$4 sm:$0xff]   ;;  %v3801_v50 = vld [vmem:[#allocation3 + $0x12c] ss:$16 sps:$4 sm:$0xff]   ;;  %p3578_p5 = por %p3577_p4, %p3576_p3 }
  0x37   :  { %625 = vmatpush1.bf16.msra.mxu1 %v3706_v22  ;;  %585 = vmatprep.subr.bf16.mxu0 %v3710_v23  ;;  %v3805_v51 = vld [vmem:[#allocation3 + $0x120] ss:$16 sps:$4 sm:$0xff]   ;;  %v3807_v52 = vld [vmem:[#allocation3 + $0x128] ss:$16 sps:$4 sm:$0xff]   ;;  %v3811_v53 = vld [vmem:[#allocation3 + $0x144] ss:$16 sps:$4 sm:$0xff]  }
  0x38   :  { %626 = vmatprep.subr.bf16.mxu1 %v3713_v24  ;;  %362 = vmatprep.mubr.bf16.mxu1 %v5348_v0  ;;  %v3813_v54 = vld [vmem:[#allocation3 + $0x14c] ss:$16 sps:$4 sm:$0xff]   ;;  %v3815_v55 = vld [vmem:[#allocation3 + $0x140] ss:$16 sps:$4 sm:$0xff]   ;;  %v3817_v56 = vld [vmem:[#allocation3 + $0x148] ss:$16 sps:$4 sm:$0xff]   ;;  %p3579_p6 = pnand %p3578_p5, %p3572_p2 }
  0x39   :  { %v3821_v57 = vld [vmem:[#allocation3 + $0x164] ss:$16 sps:$4 sm:$0xff]   ;;  %v3823_v58 = vld [vmem:[#allocation3 + $0x16c] ss:$16 sps:$4 sm:$0xff]   ;;  %v3829_v59 = vld [vmem:[#allocation3 + $0x160] ss:$16 sps:$4 sm:$0xff]  }
  0x3a   :  { %586 = vmatpush1.bf16.msra.mxu0 %v3715_v25  ;;  %5692 = vst [vmem:[#allocation12_spill] sm:$0xff] %v3823_v58  ;;  %5693 = vst [vmem:[#allocation13_spill] sm:$0xff] %v3829_v59  ;;  %v3831_v60 = vld [vmem:[#allocation3 + $0x168] ss:$16 sps:$4 sm:$0xff]   ;;  %v3835_v61 = vld [vmem:[#allocation3 + $0x184] ss:$16 sps:$4 sm:$0xff]  }
  0x3b   :  { %627 = vmatpush1.bf16.msra.mxu1 %v3729_v28  ;;  %587 = vmatprep.subr.bf16.mxu0 %v3731_v29  ;;  %5694 = vst [vmem:[#allocation14_spill] sm:$0xff] %v3831_v60  ;;  %5695 = vst [vmem:[#allocation15_spill] sm:$0xff] %v3835_v61  ;;  %v3837_v62 = vld [vmem:[#allocation3 + $0x18c] ss:$16 sps:$4 sm:$0xff]   ;;  %v3839_v63 = vld [vmem:[#allocation3 + $0x180] ss:$16 sps:$4 sm:$0xff]  }
  0x3c   :  { %628 = vmatprep.subr.bf16.mxu1 %v3735_v30  ;;  %5696 = vst [vmem:[#allocation16_spill] sm:$0xff] %v3837_v62  ;;  %5697 = vst [vmem:[#allocation17_spill] sm:$0xff] %v3839_v63  ;;  %v3841_v1 = vld [vmem:[#allocation3 + $0x188] ss:$16 sps:$4 sm:$0xff]   ;;  %v3845_v2 = vld [vmem:[#allocation3 + $0x1a4] ss:$16 sps:$4 sm:$0xff]  }
  0x3d   :  { %2820 = vmatmul.mubr.msk.bf16.gmra.mrb[8].mxu0 %vm224_vm0, %v181_v31  ;;  %2824 = vmatmul.mubr.msk.bf16.gmra.mrb[8].mxu1 %vm224_vm0, %v181_v31  ;;  %5698 = vst [vmem:[#allocation18_spill] sm:$0xff] %v3841_v1  ;;  %5699 = vst [vmem:[#allocation19_spill] sm:$0xff] %v3845_v2  ;;  %v3847_v3 = vld [vmem:[#allocation3 + $0x1ac] ss:$16 sps:$4 sm:$0xff]   ;;  %v3853_v4 = vld [vmem:[#allocation3 + $0x1a0] ss:$16 sps:$4 sm:$0xff]  }
  0x3e   :  { %588 = vmatpush1.bf16.msra.mxu0 %v3738_v32  ;;  %299 = vmatprep.mubr.bf16.mxu0 %v5348_v0  ;;  %5700 = vst [vmem:[#allocation20_spill] sm:$0xff] %v3847_v3  ;;  %5701 = vst [vmem:[#allocation21_spill] sm:$0xff] %v3853_v4  ;;  %v3855_v5 = vld [vmem:[#allocation3 + $0x1a8] ss:$16 sps:$4 sm:$0xff]   ;;  %v3859_v6 = vld [vmem:[#allocation3 + $0x1c4] ss:$16 sps:$4 sm:$0xff]  }
  0x3f   :  { %629 = vmatpush1.bf16.msra.mxu1 %v3740_v33  ;;  %589 = vmatprep.subr.bf16.mxu0 %v3744_v34  ;;  %5702 = vst [vmem:[#allocation22_spill] sm:$0xff] %v3855_v5  ;;  %5703 = vst [vmem:[#allocation23_spill] sm:$0xff] %v3859_v6  ;;  %v3861_v7 = vld [vmem:[#allocation3 + $0x1cc] ss:$16 sps:$4 sm:$0xff]   ;;  %v3863_v16 = vld [vmem:[#allocation3 + $0x1c0] ss:$16 sps:$4 sm:$0xff]  }
  0x40   :  { %630 = vmatprep.subr.bf16.mxu1 %v3747_v35  ;;  %372 = vmatprep.mubr.bf16.mxu1 %v5348_v0  ;;  %5704 = vst [vmem:[#allocation24_spill] sm:$0xff] %v3861_v7  ;;  %5705 = vst [vmem:[#allocation25_spill] sm:$0xff] %v3863_v16  ;;  %v3865_v17 = vld [vmem:[#allocation3 + $0x1c8] ss:$16 sps:$4 sm:$0xff]   ;;  %v3869_v19 = vld [vmem:[#allocation3 + $0x1e4] ss:$16 sps:$4 sm:$0xff]  }
  0x41   :  { %5706 = vst [vmem:[#allocation26_spill] sm:$0xff] %v3865_v17  ;;  %5707 = vst [vmem:[#allocation27_spill] sm:$0xff] %v3869_v19  ;;  %v3871_v26 = vld [vmem:[#allocation3 + $0x1ec] ss:$16 sps:$4 sm:$0xff]   ;;  %v3877_v27 = vld [vmem:[#allocation3 + $0x1e0] ss:$16 sps:$4 sm:$0xff]  }
  0x42   :  { %590 = vmatpush1.bf16.msra.mxu0 %v3751_v36  ;;  %5708 = vst [vmem:[#allocation28_spill] sm:$0xff] %v3871_v26  ;;  %5709 = vst [vmem:[#allocation29_spill] sm:$0xff] %v3877_v27  ;;  %v3879_v31 = vld [vmem:[#allocation3 + $0x1e8] ss:$16 sps:$4 sm:$0xff]   ;;  %v3883_v38 = vld [vmem:[#allocation3 + $0x204] ss:$16 sps:$4 sm:$0xff]  }
  0x43   :  { %631 = vmatpush1.bf16.msra.mxu1 %v3753_v37  ;;  %591 = vmatprep.subr.bf16.mxu0 %v3765_v40  ;;  %5710 = vst [vmem:[#allocation30_spill] sm:$0xff] %v3879_v31  ;;  %5711 = vst [vmem:[#allocation31_spill] sm:$0xff] %v3883_v38  ;;  %v3885_v39 = vld [vmem:[#allocation3 + $0x20c] ss:$16 sps:$4 sm:$0xff]  }
  0x44   :  { %632 = vmatprep.subr.bf16.mxu1 %v3769_v41  ;;  %5712 = vst [vmem:[#allocation32_spill] sm:$0xff] %v3885_v39 }
  0x45   :  { %2821 = vmatmul.mubr.msk.bf16.gmra.mrb[12].mxu0 %vm224_vm0, %v182_v43  ;;  %2825 = vmatmul.mubr.msk.bf16.gmra.mrb[12].mxu1 %vm224_vm0, %v182_v43  ;;  %v3887_v43 = vld [vmem:[#allocation3 + $0x200] ss:$16 sps:$4 sm:$0xff]  }
  0x46   :  { %592 = vmatpush1.bf16.msra.mxu0 %v3771_v42  ;;  %611 = vmatprep.mubr.bf16.mxu0 %v5348_v0  ;;  %5713 = vst [vmem:[#allocation33_spill] sm:$0xff] %v3887_v43 }
  0x47   :  { %633 = vmatpush1.bf16.msra.mxu1 %v3773_v44  ;;  %593 = vmatprep.subr.bf16.mxu0 %v3775_v45 }
  0x48   :  { %634 = vmatprep.subr.bf16.mxu1 %v3778_v46  ;;  %652 = vmatprep.mubr.bf16.mxu1 %v5348_v0 }
  0x4a   :  { %594 = vmatpush1.bf16.msra.mxu0 %v3783_v47 }
  0x4b   :  { %635 = vmatpush1.bf16.msra.mxu1 %v3787_v48  ;;  %1005 = vmatprep.subr.bf16.mxu0 %v3799_v49 }
  0x4c   :  { %1046 = vmatprep.subr.bf16.mxu1 %v3801_v50 }
  0x4d   :  { %612 = vmatmul.mubr.bf16.vlgmr.msra.gmra.mrb[16].mxu0 %v5348_v0 }
  0x4e   :  { %653 = vmatmul.mubr.bf16.vlgmr.msra.gmra.mrb[16].mxu1 %v5348_v0  ;;  %1006 = vmatpush1.bf16.msra.mxu0 %v3805_v51  ;;  %v3889_v0 = vld [vmem:[#allocation3 + $0x208] ss:$16 sps:$4 sm:$0xff]  }
  0x4f   :  { %1047 = vmatpush1.bf16.msra.mxu1 %v3807_v52  ;;  %1007 = vmatprep.subr.bf16.mxu0 %v3811_v53  ;;  %5714 = vst [vmem:[#allocation34_spill] sm:$0xff] %v3889_v0 }
  0x50   :  { %1048 = vmatprep.subr.bf16.mxu1 %v3813_v54 }
  0x52   :  { %1008 = vmatpush1.bf16.msra.mxu0 %v3815_v55 }
  0x53   :  { %1049 = vmatpush1.bf16.msra.mxu1 %v3817_v56  ;;  %1009 = vmatprep.subr.bf16.mxu0 %v3821_v57 }
  0x54   :  { %1050 = vmatprep.subr.bf16.mxu1 %v3823_v58 }
  0x56   :  { %1010 = vmatpush1.bf16.msra.mxu0 %v3829_v59 }
  0x57   :  { %1051 = vmatpush1.bf16.msra.mxu1 %v3831_v60  ;;  %1011 = vmatprep.subr.bf16.mxu0 %v3835_v61 }
  0x58   :  { %1052 = vmatprep.subr.bf16.mxu1 %v3837_v62 }
  0x5a   :  { %1012 = vmatpush1.bf16.msra.mxu0 %v3839_v63 }
  0x5b   :  { %1053 = vmatpush1.bf16.msra.mxu1 %v3841_v1  ;;  %1013 = vmatprep.subr.bf16.mxu0 %v3845_v2 }
  0x5c   :  { %1054 = vmatprep.subr.bf16.mxu1 %v3847_v3 }
  0x5e   :  { %1014 = vmatpush1.bf16.msra.mxu0 %v3853_v4 }
  0x5f   :  { %1055 = vmatpush1.bf16.msra.mxu1 %v3855_v5  ;;  %1015 = vmatprep.subr.bf16.mxu0 %v3859_v6 }
  0x60   :  { %1056 = vmatprep.subr.bf16.mxu1 %v3861_v7 }
  0x62   :  { %1016 = vmatpush1.bf16.msra.mxu0 %v3863_v16  ;;  %v3967_v16 = vld [vmem:[#allocation3 + $0x2ec] ss:$16 sps:$4 sm:$0xff]  }
  0x63   :  { %1057 = vmatpush1.bf16.msra.mxu1 %v3865_v17  ;;  %1017 = vmatprep.subr.bf16.mxu0 %v3869_v19  ;;  %v3901_v19 = vld [vmem:[#allocation3 + $0x228] ss:$16 sps:$4 sm:$0xff]   ;;  %v3951_v17 = vld [vmem:[#allocation3 + $0x2c4] ss:$16 sps:$4 sm:$0xff]   ;;  %5740 = vst [vmem:[#allocation60_spill] sm:$0xff] %v3967_v16 }
  0x64   :  { %1058 = vmatprep.subr.bf16.mxu1 %v3871_v26  ;;  %v3895_v26 = vld [vmem:[#allocation3 + $0x224] ss:$16 sps:$4 sm:$0xff]   ;;  %5718 = vst [vmem:[#allocation38_spill] sm:$0xff] %v3901_v19  ;;  %5735 = vst [vmem:[#allocation55_spill] sm:$0xff] %v3951_v17 }
  0x65   :  { %5715 = vst [vmem:[#allocation35_spill] sm:$0xff] %v3895_v26 }
  0x66   :  { %1018 = vmatpush1.bf16.msra.mxu0 %v3877_v27  ;;  %v3897_v27 = vld [vmem:[#allocation3 + $0x22c] ss:$16 sps:$4 sm:$0xff]  }
  0x67   :  { %1059 = vmatpush1.bf16.msra.mxu1 %v3879_v31  ;;  %1019 = vmatprep.subr.bf16.mxu0 %v3883_v38  ;;  %5716 = vst [vmem:[#allocation36_spill] sm:$0xff] %v3897_v27  ;;  %v3899_v31 = vld [vmem:[#allocation3 + $0x220] ss:$16 sps:$4 sm:$0xff]   ;;  %v3913_v38 = vld [vmem:[#allocation3 + $0x248] ss:$16 sps:$4 sm:$0xff]  }
  0x68   :  { %1060 = vmatprep.subr.bf16.mxu1 %v3885_v39  ;;  %5717 = vst [vmem:[#allocation37_spill] sm:$0xff] %v3899_v31  ;;  %v3907_v39 = vld [vmem:[#allocation3 + $0x244] ss:$16 sps:$4 sm:$0xff]   ;;  %5722 = vst [vmem:[#allocation42_spill] sm:$0xff] %v3913_v38 }
  0x69   :  { %5719 = vst [vmem:[#allocation39_spill] sm:$0xff] %v3907_v39 }
  0x6a   :  { %1020 = vmatpush1.bf16.msra.mxu0 %v3887_v43  ;;  %v3909_v43 = vld [vmem:[#allocation3 + $0x24c] ss:$16 sps:$4 sm:$0xff]  }
  0x6b   :  { %1061 = vmatpush1.bf16.msra.mxu1 %v3889_v0  ;;  %1021 = vmatprep.subr.bf16.mxu0 %v3895_v26  ;;  %5720 = vst [vmem:[#allocation40_spill] sm:$0xff] %v3909_v43  ;;  %v3911_v0 = vld [vmem:[#allocation3 + $0x240] ss:$16 sps:$4 sm:$0xff]   ;;  %v3925_v26 = vld [vmem:[#allocation3 + $0x268] ss:$16 sps:$4 sm:$0xff]  }
  0x6c   :  { %1062 = vmatprep.subr.bf16.mxu1 %v3897_v27  ;;  %5721 = vst [vmem:[#allocation41_spill] sm:$0xff] %v3911_v0  ;;  %v3919_v27 = vld [vmem:[#allocation3 + $0x264] ss:$16 sps:$4 sm:$0xff]   ;;  %5726 = vst [vmem:[#allocation46_spill] sm:$0xff] %v3925_v26 }
  0x6d   :  { %5723 = vst [vmem:[#allocation43_spill] sm:$0xff] %v3919_v27 }
  0x6e   :  { %1022 = vmatpush1.bf16.msra.mxu0 %v3899_v31  ;;  %v3921_v31 = vld [vmem:[#allocation3 + $0x26c] ss:$16 sps:$4 sm:$0xff]  }
  0x6f   :  { %1063 = vmatpush1.bf16.msra.mxu1 %v3901_v19  ;;  %1023 = vmatprep.subr.bf16.mxu0 %v3907_v39  ;;  %5724 = vst [vmem:[#allocation44_spill] sm:$0xff] %v3921_v31  ;;  %v3923_v19 = vld [vmem:[#allocation3 + $0x260] ss:$16 sps:$4 sm:$0xff]   ;;  %v3937_v39 = vld [vmem:[#allocation3 + $0x288] ss:$16 sps:$4 sm:$0xff]  }
  0x70   :  { %1064 = vmatprep.subr.bf16.mxu1 %v3909_v43  ;;  %5725 = vst [vmem:[#allocation45_spill] sm:$0xff] %v3923_v19  ;;  %v3931_v43 = vld [vmem:[#allocation3 + $0x284] ss:$16 sps:$4 sm:$0xff]   ;;  %5730 = vst [vmem:[#allocation50_spill] sm:$0xff] %v3937_v39 }
  0x71   :  { %5727 = vst [vmem:[#allocation47_spill] sm:$0xff] %v3931_v43 }
  0x72   :  { %1024 = vmatpush1.bf16.msra.mxu0 %v3911_v0  ;;  %v3933_v0 = vld [vmem:[#allocation3 + $0x28c] ss:$16 sps:$4 sm:$0xff]  }
  0x73   :  { %1065 = vmatpush1.bf16.msra.mxu1 %v3913_v38  ;;  %1025 = vmatprep.subr.bf16.mxu0 %v3919_v27  ;;  %5728 = vst [vmem:[#allocation48_spill] sm:$0xff] %v3933_v0  ;;  %v3935_v38 = vld [vmem:[#allocation3 + $0x280] ss:$16 sps:$4 sm:$0xff]   ;;  %v3949_v27 = vld [vmem:[#allocation3 + $0x2a8] ss:$16 sps:$4 sm:$0xff]  }
  0x74   :  { %1066 = vmatprep.subr.bf16.mxu1 %v3921_v31  ;;  %5729 = vst [vmem:[#allocation49_spill] sm:$0xff] %v3935_v38  ;;  %v3943_v31 = vld [vmem:[#allocation3 + $0x2a4] ss:$16 sps:$4 sm:$0xff]   ;;  %5734 = vst [vmem:[#allocation54_spill] sm:$0xff] %v3949_v27 }
  0x75   :  { %5731 = vst [vmem:[#allocation51_spill] sm:$0xff] %v3943_v31 }
  0x76   :  { %1026 = vmatpush1.bf16.msra.mxu0 %v3923_v19  ;;  %v3945_v19 = vld [vmem:[#allocation3 + $0x2ac] ss:$16 sps:$4 sm:$0xff]  }
  0x77   :  { %1067 = vmatpush1.bf16.msra.mxu1 %v3925_v26  ;;  %1027 = vmatprep.subr.bf16.mxu0 %v3931_v43  ;;  %5732 = vst [vmem:[#allocation52_spill] sm:$0xff] %v3945_v19  ;;  %v3947_v26 = vld [vmem:[#allocation3 + $0x2a0] ss:$16 sps:$4 sm:$0xff]   ;;  %v3955_v43 = vld [vmem:[#allocation3 + $0x2cc] ss:$16 sps:$4 sm:$0xff]  }
  0x78   :  { %1068 = vmatprep.subr.bf16.mxu1 %v3933_v0  ;;  %5733 = vst [vmem:[#allocation53_spill] sm:$0xff] %v3947_v26  ;;  %5736 = vst [vmem:[#allocation56_spill] sm:$0xff] %v3955_v43  ;;  %v3965_v0 = vld [vmem:[#allocation3 + $0x2e4] ss:$16 sps:$4 sm:$0xff]  }
  0x79   :  { %5739 = vst [vmem:[#allocation59_spill] sm:$0xff] %v3965_v0 }
  0x7a   :  { %1028 = vmatpush1.bf16.msra.mxu0 %v3935_v38  ;;  %v3961_v38 = vld [vmem:[#allocation3 + $0x2c8] ss:$16 sps:$4 sm:$0xff]  }
  0x7b   :  { %1069 = vmatpush1.bf16.msra.mxu1 %v3937_v39  ;;  %1029 = vmatprep.subr.bf16.mxu0 %v3943_v31  ;;  %v3959_v39 = vld [vmem:[#allocation3 + $0x2c0] ss:$16 sps:$4 sm:$0xff]   ;;  %5738 = vst [vmem:[#allocation58_spill] sm:$0xff] %v3961_v38  ;;  %v3606_v31 = vmov 0.0|0.0  }
  0x7c   :  { %1070 = vmatprep.subr.bf16.mxu1 %v3945_v19  ;;  %5737 = vst [vmem:[#allocation57_spill] sm:$0xff] %v3959_v39  ;;  %1037 = vmatprep.mubr.bf16.mxu0 %v3606_v31 }
  0x7d   :  { %1078 = vmatprep.mubr.bf16.mxu1 %v3606_v31  ;;  %v3983_v31 = vld [vmem:[#allocation3 + $0x300] ss:$16 sps:$4 sm:$0xff]  }
  0x7e   :  { %1030 = vmatpush1.bf16.msra.mxu0 %v3947_v26  ;;  %v3973_v26 = vld [vmem:[#allocation3 + $0x2e8] ss:$16 sps:$4 sm:$0xff]   ;;  %5745 = vst [vmem:[#allocation65_spill] sm:$0xff] %v3983_v31 }
  0x7f   :  { %1071 = vmatpush1.bf16.msra.mxu1 %v3949_v27  ;;  %1031 = vmatprep.subr.bf16.mxu0 %v3951_v17  ;;  %v3971_v27 = vld [vmem:[#allocation3 + $0x2e0] ss:$16 sps:$4 sm:$0xff]   ;;  %5742 = vst [vmem:[#allocation62_spill] sm:$0xff] %v3973_v26  ;;  %v3979_v17 = vld [vmem:[#allocation3 + $0x30c] ss:$16 sps:$4 sm:$0xff]  }
  0x80   :  { %1072 = vmatprep.subr.bf16.mxu1 %v3955_v43  ;;  %5741 = vst [vmem:[#allocation61_spill] sm:$0xff] %v3971_v27  ;;  %v3977_v43 = vld [vmem:[#allocation3 + $0x304] ss:$16 sps:$4 sm:$0xff]   ;;  %5744 = vst [vmem:[#allocation64_spill] sm:$0xff] %v3979_v17 }
  0x81   :  { %5743 = vst [vmem:[#allocation63_spill] sm:$0xff] %v3977_v43 }
  0x82   :  { %1032 = vmatpush1.bf16.msra.mxu0 %v3959_v39  ;;  %v3985_v39 = vld [vmem:[#allocation3 + $0x308] ss:$16 sps:$4 sm:$0xff]  }
  0x83   :  { %1073 = vmatpush1.bf16.msra.mxu1 %v3961_v38  ;;  %1033 = vmatprep.subr.bf16.mxu0 %v3965_v0  ;;  %5746 = vst [vmem:[#allocation66_spill] sm:$0xff] %v3985_v39 }
  0x84   :  { %1074 = vmatprep.subr.bf16.mxu1 %v3967_v16  ;;  %v151_v16 = vlaneseq }
  0x86   :  { %1034 = vmatpush1.bf16.msra.mxu0 %v3971_v27  ;;  %v3993_v27 = vshrl.u32 %v151_v16, 7 }
  0x87   :  { %1075 = vmatpush1.bf16.msra.mxu1 %v3973_v26  ;;  %1035 = vmatprep.subr.bf16.mxu0 %v3977_v43 }
  0x88   :  { %1076 = vmatprep.subr.bf16.mxu1 %v3979_v17  ;;  %5747 = vst [vmem:[#allocation67_spill] sm:$0xff] %v3993_v27  ;;  %v5442_v26 = vsub.s32 2, %v3993_v27  ;;  %v5451_v0 = vsub.s32 3, %v3993_v27  ;;  %v5452_v38 = vsub.s32 0, %v3993_v27 }
  0x89   :  { %v147_v17 = vld [vmem:[%s5346_s3] ss:$4 sm:$0xf] }
  0x8a   :  { %1036 = vmatpush1.bf16.msra.mxu0 %v3983_v31  ;;  %v5459_v31 = vsub.s32 1, %v3993_v27  ;;  %v187_v43 = vrot.slane %v147_v17, %v5452_v38 }
  0x8b   :  { %1077 = vmatpush1.bf16.msra.mxu1 %v3985_v39  ;;  %1109 = vmatprep.subr.bf16.mxu0 %v3667_v8  ;;  %v4004_v8 = vrot.slane %v147_v17, %v5442_v26  ;;  %v4012_v39 = vrot.slane %v147_v17, %v5451_v0 }
  0x8c   :  { %1150 = vmatprep.subr.bf16.mxu1 %v3669_v9  ;;  %v191_v6 = vrot.slane %v147_v17, %v5459_v31 }
 0x100   :  { %v4006_v9 = vpop.f32.mrb[0].mxu0  ;;  %v4008_v16 = vpop.f32.mrb[0].mxu1 }
 0x101   :  { %v273_v19 = vpop.f32.mrb[1].mxu0  ;;  %v346_v7 = vpop.f32.mrb[1].mxu1 }
 0x102   :  { %v275_v5 = vpop.f32.mrb[2].mxu0  ;;  %v348_v4 = vpop.f32.mrb[2].mxu1 }
 0x103   :  { %v4018_v26 = vadd.f32 %v275_v5, %v187_v43  ;;  %v277_v3 = vpop.f32.mrb[3].mxu0  ;;  %v4021_v2 = vadd.f32 %v348_v4, %v4004_v8  ;;  %v350_v1 = vpop.f32.mrb[3].mxu1 }
 0x104   :  { %v4023_v63 = vadd.f32 %v277_v3, %v191_v6  ;;  %v4026_v0 = vadd.f32 %v350_v1, %v4012_v39 }
 0x105   :  { %5748 = vst [vmem:[#allocation68_spill] sm:$0xff] %v4018_v26  ;;  %5749 = vst [vmem:[#allocation69_spill] sm:$0xff] %v4021_v2 }
 0x106   :  { %5750 = vst [vmem:[#allocation70_spill] sm:$0xff] %v4023_v63  ;;  %5751 = vst [vmem:[#allocation71_spill] sm:$0xff] %v4026_v0 }
 0x108   :  { %v281_v38 = vpop.f32.mrb[4].mxu0  ;;  %v354_v62 = vpop.f32.mrb[4].mxu1 }
 0x109   :  { %v4028_v61 = vadd.f32 %v281_v38, %v187_v43  ;;  %v283_v27 = vpop.f32.mrb[5].mxu0  ;;  %v4031_v17 = vadd.f32 %v354_v62, %v4004_v8  ;;  %v356_v5 = vpop.f32.mrb[5].mxu1 }
 0x10a   :  { %v4033_v31 = vadd.f32 %v283_v27, %v191_v6  ;;  %v285_v26 = vpop.f32.mrb[6].mxu0  ;;  %v4036_v4 = vadd.f32 %v356_v5, %v4012_v39  ;;  %v358_v3 = vpop.f32.mrb[6].mxu1 }
 0x10b   :  { %5752 = vst [vmem:[#allocation72_spill] sm:$0xff] %v4028_v61  ;;  %5753 = vst [vmem:[#allocation73_spill] sm:$0xff] %v4031_v17  ;;  %v4038_v63 = vadd.f32 %v285_v26, %v187_v43  ;;  %v287_v1 = vpop.f32.mrb[7].mxu0  ;;  %v4041_v0 = vadd.f32 %v358_v3, %v4004_v8  ;;  %v360_v38 = vpop.f32.mrb[7].mxu1 }
 0x10c   :  { %5754 = vst [vmem:[#allocation74_spill] sm:$0xff] %v4033_v31  ;;  %5755 = vst [vmem:[#allocation75_spill] sm:$0xff] %v4036_v4  ;;  %v4043_v61 = vadd.f32 %v287_v1, %v191_v6  ;;  %v4046_v62 = vadd.f32 %v360_v38, %v4012_v39 }
 0x10d   :  { %5756 = vst [vmem:[#allocation76_spill] sm:$0xff] %v4038_v63  ;;  %5757 = vst [vmem:[#allocation77_spill] sm:$0xff] %v4041_v0 }
 0x10e   :  { %5758 = vst [vmem:[#allocation78_spill] sm:$0xff] %v4043_v61  ;;  %5759 = vst [vmem:[#allocation79_spill] sm:$0xff] %v4046_v62 }
 0x110   :  { %v291_v17 = vpop.f32.mrb[8].mxu0  ;;  %v364_v27 = vpop.f32.mrb[8].mxu1 }
 0x111   :  { %v4048_v31 = vadd.f32 %v291_v17, %v187_v43  ;;  %v293_v2 = vpop.f32.mrb[9].mxu0  ;;  %v4051_v5 = vadd.f32 %v364_v27, %v4004_v8  ;;  %v366_v26 = vpop.f32.mrb[9].mxu1 }
 0x112   :  { %v4053_v63 = vadd.f32 %v293_v2, %v191_v6  ;;  %v295_v4 = vpop.f32.mrb[10].mxu0  ;;  %v4056_v3 = vadd.f32 %v366_v26, %v4012_v39  ;;  %v368_v1 = vpop.f32.mrb[10].mxu1 }
 0x113   :  { %5760 = vst [vmem:[#allocation80_spill] sm:$0xff] %v4048_v31  ;;  %5761 = vst [vmem:[#allocation81_spill] sm:$0xff] %v4051_v5  ;;  %v4058_v61 = vadd.f32 %v295_v4, %v187_v43  ;;  %v297_v38 = vpop.f32.mrb[11].mxu0  ;;  %v4061_v62 = vadd.f32 %v368_v1, %v4004_v8  ;;  %v370_v17 = vpop.f32.mrb[11].mxu1 }
 0x114   :  { %5762 = vst [vmem:[#allocation82_spill] sm:$0xff] %v4053_v63  ;;  %5763 = vst [vmem:[#allocation83_spill] sm:$0xff] %v4056_v3  ;;  %v4063_v31 = vadd.f32 %v297_v38, %v191_v6  ;;  %v4066_v27 = vadd.f32 %v370_v17, %v4012_v39 }
 0x115   :  { %5764 = vst [vmem:[#allocation84_spill] sm:$0xff] %v4058_v61  ;;  %5765 = vst [vmem:[#allocation85_spill] sm:$0xff] %v4061_v62 }
 0x116   :  { %5766 = vst [vmem:[#allocation86_spill] sm:$0xff] %v4063_v31  ;;  %5767 = vst [vmem:[#allocation87_spill] sm:$0xff] %v4066_v27 }
 0x118   :  { %v301_v5 = vpop.f32.mrb[12].mxu0  ;;  %v374_v2 = vpop.f32.mrb[12].mxu1 }
 0x119   :  { %v4068_v63 = vadd.f32 %v301_v5, %v187_v43  ;;  %v303_v0 = vpop.f32.mrb[13].mxu0  ;;  %v4071_v26 = vadd.f32 %v374_v2, %v4004_v8  ;;  %v376_v4 = vpop.f32.mrb[13].mxu1 }
 0x11a   :  { %v4073_v61 = vadd.f32 %v303_v0, %v191_v6  ;;  %v305_v3 = vpop.f32.mrb[14].mxu0  ;;  %v4076_v1 = vadd.f32 %v376_v4, %v4012_v39  ;;  %v378_v38 = vpop.f32.mrb[14].mxu1  ;;  %v272_v0 = vadd.f32 %v4006_v9, %v187_v43  ;;  %v345_v4 = vadd.f32 %v4008_v16, %v4004_v8 }
 0x11b   :  { %5768 = vst [vmem:[#allocation88_spill] sm:$0xff] %v4068_v63  ;;  %5769 = vst [vmem:[#allocation89_spill] sm:$0xff] %v4071_v26  ;;  %v4078_v31 = vadd.f32 %v305_v3, %v187_v43  ;;  %v307_v17 = vpop.f32.mrb[15].mxu0  ;;  %v4081_v27 = vadd.f32 %v378_v38, %v4004_v8  ;;  %v380_v5 = vpop.f32.mrb[15].mxu1  ;;  %v347_v3 = vadd.f32 %v346_v7, %v4012_v39 }
 0x11c   :  { %5770 = vst [vmem:[#allocation90_spill] sm:$0xff] %v4073_v61  ;;  %5771 = vst [vmem:[#allocation91_spill] sm:$0xff] %v4076_v1  ;;  %v4083_v63 = vadd.f32 %v307_v17, %v191_v6  ;;  %v4086_v2 = vadd.f32 %v380_v5, %v4012_v39  ;;  %v274_v61 = vadd.f32 %v273_v19, %v191_v6 }
 0x11d   :  { %5772 = vst [vmem:[#allocation92_spill] sm:$0xff] %v4078_v31  ;;  %5773 = vst [vmem:[#allocation93_spill] sm:$0xff] %v4081_v27 }
 0x11e   :  { %5774 = vst [vmem:[#allocation94_spill] sm:$0xff] %v4083_v63  ;;  %5775 = vst [vmem:[#allocation95_spill] sm:$0xff] %v4086_v2 }
 0x120   :  { %v613_v1 = vpop.f32.mrb[16].mxu0 }
 0x121   :  { %v661_v31 = vadd.f32 %v613_v1, %v272_v0  ;;  %v654_v26 = vpop.f32.mrb[16].mxu1  ;;  %v615_v62 = vpop.f32.mrb[17].mxu0  ;;  %v5807_v0 = vld [vmem:[#allocation42_spill] sm:$0xff] }
 0x122   :  { %v663_v38 = vadd.f32 %v654_v26, %v345_v4  ;;  %v662_v27 = vadd.f32 %v615_v62, %v274_v61  ;;  %v656_v60 = vpop.f32.mrb[17].mxu1  ;;  %v617_v17 = vpop.f32.mrb[18].mxu0  ;;  %v5808_v4 = vld [vmem:[#allocation43_spill] sm:$0xff] }
 0x123   :  { %v665_v63 = vmul.f32 0.5, %v661_v31  ;;  %v664_v59 = vadd.f32 %v656_v60, %v347_v3  ;;  %v618_v5 = vpop.f32.mrb[19].mxu0  ;;  %v658_v2 = vpop.f32.mrb[18].mxu1  ;;  %v5809_v3 = vld [vmem:[#allocation44_spill] sm:$0xff]  ;;  %v5811_v17 = vld [vmem:[#allocation46_spill] sm:$0xff] }
 0x124   :  { %v666_v58 = vmul.f32 0.5, %v662_v27  ;;  %v659_v43 = vpop.f32.mrb[19].mxu1  ;;  %v667_v6 = vmul.f32 0.5, %v663_v38  ;;  %v5776_v2 = vmov 0   ;;  %v5810_v38 = vld [vmem:[#allocation45_spill] sm:$0xff]  ;;  %v5812_v5 = vld [vmem:[#allocation47_spill] sm:$0xff] }
 0x125   :  { %3175 = vtanh.f32 %v665_v63  ;;  %v5813_v43 = vld [vmem:[#allocation48_spill] sm:$0xff] }
 0x126   :  { %3177 = vtanh.f32 %v666_v58 }
 0x127   :  { %3179 = vtanh.f32 %v664_v59 }
 0x128   :  { %3181 = vtanh.f32 %v667_v6  ;;  %v5814_v6 = vld [vmem:[#allocation49_spill] sm:$0xff] }
 0x12f   :  { %v3176_v19 = vpop.eup %3175 }
 0x130   :  { %v671_v8 = vmul.f32 0.5, %v3176_v19  ;;  %v3178_v7 = vpop.eup %3177  ;;  %v5815_v19 = vld [vmem:[#allocation50_spill] sm:$0xff] }
 0x131   :  { %v672_v9 = vmul.f32 0.5, %v3178_v7  ;;  %v3180_v16 = vpop.eup %3179  ;;  %v5817_v7 = vld [vmem:[#allocation52_spill] sm:$0xff] }
 0x132   :  { %v674_v39 = vadd.f32 0.5, %v671_v8  ;;  %v3182_v60 = vpop.eup %3181  ;;  %v5816_v8 = vld [vmem:[#allocation51_spill] sm:$0xff] }
 0x133   :  { %v675_v61 = vadd.f32 0.5, %v672_v9  ;;  %v673_v27 = vmul.f32 0.5, %v3182_v60  ;;  %v5819_v9 = vld [vmem:[#allocation54_spill] sm:$0xff]  ;;  %v5824_v60 = vld [vmem:[#allocation59_spill] sm:$0xff] }
 0x134   :  { %v679_v62 = vmul.f32 %v3180_v16, %v674_v39  ;;  %v5818_v39 = vld [vmem:[#allocation53_spill] sm:$0xff]  ;;  %v5820_v16 = vld [vmem:[#allocation55_spill] sm:$0xff] }
 0x135   :  { %v678_v26 = vmul.f32 0.0, %v675_v61  ;;  %v676_v63 = vadd.f32 0.5, %v673_v27  ;;  %v5821_v61 = vld [vmem:[#allocation56_spill] sm:$0xff] }
 0x136   :  { %v5825_v27 = vld [vmem:[#allocation60_spill] sm:$0xff] }
 0x137   :  { %v4092_v31 = vadd.f32 %v679_v62, %v678_v26  ;;  %v5822_v62 = vld [vmem:[#allocation57_spill] sm:$0xff]  ;;  %v5823_v26 = vld [vmem:[#allocation58_spill] sm:$0xff] }
 0x139   :  { %3183 = vtanh.f32 %v4092_v31 }
 0x143   :  { %v3184_v58 = vpop.eup %3183 }
 0x144   :  { %v682_v59 = vmul.f32 %v3184_v58, %v676_v63  ;;  %v5826_v63 = vld [vmem:[#allocation61_spill] sm:$0xff]  ;;  %v5827_v58 = vld [vmem:[#allocation62_spill] sm:$0xff] }
 0x146   :  { %v683_v1 = vpack.c.bf16 %v682_v59, %v682_v59  ;;  %v5828_v59 = vld [vmem:[#allocation63_spill] sm:$0xff] }
 0x148   :  { %1038 = vmatmul.mubr.bf16.vlgmr.msra.gmra.mrb[20].mxu0 %v683_v1  ;;  %1079 = vmatmul.mubr.bf16.vlgmr.msra.gmra.mrb[20].mxu1 %v683_v1 }
 0x149   :  { %1110 = vmatpush1.bf16.msra.mxu0 %v3671_v10  ;;  %1151 = vmatpush1.bf16.msra.mxu1 %v3673_v11  ;;  %v5777_v10 = vld [vmem:[#allocation12_spill] sm:$0xff]  ;;  %v5778_v11 = vld [vmem:[#allocation13_spill] sm:$0xff] }
 0x14a   :  { %1111 = vmatprep.subr.bf16.mxu0 %v3676_v12  ;;  %1152 = vmatprep.subr.bf16.mxu1 %v3680_v13  ;;  %v5779_v12 = vld [vmem:[#allocation14_spill] sm:$0xff]  ;;  %v5780_v13 = vld [vmem:[#allocation15_spill] sm:$0xff] }
 0x14b   :  { %1141 = vmatprep.mubr.bf16.mxu0 %v5776_v2  ;;  %1182 = vmatprep.mubr.bf16.mxu1 %v5776_v2 }
 0x14d   :  { %1112 = vmatpush1.bf16.msra.mxu0 %v3684_v14  ;;  %1153 = vmatpush1.bf16.msra.mxu1 %v3686_v15  ;;  %v5781_v14 = vld [vmem:[#allocation16_spill] sm:$0xff]  ;;  %v5782_v15 = vld [vmem:[#allocation17_spill] sm:$0xff] }
 0x14e   :  { %1113 = vmatprep.subr.bf16.mxu0 %v3698_v18  ;;  %1154 = vmatprep.subr.bf16.mxu1 %v3701_v20  ;;  %v5783_v18 = vld [vmem:[#allocation18_spill] sm:$0xff]  ;;  %v5784_v20 = vld [vmem:[#allocation19_spill] sm:$0xff] }
 0x151   :  { %1114 = vmatpush1.bf16.msra.mxu0 %v3703_v21  ;;  %1155 = vmatpush1.bf16.msra.mxu1 %v3706_v22  ;;  %v5785_v21 = vld [vmem:[#allocation20_spill] sm:$0xff]  ;;  %v5786_v22 = vld [vmem:[#allocation21_spill] sm:$0xff] }
 0x152   :  { %1115 = vmatprep.subr.bf16.mxu0 %v3710_v23  ;;  %1156 = vmatprep.subr.bf16.mxu1 %v3713_v24  ;;  %v5787_v23 = vld [vmem:[#allocation22_spill] sm:$0xff]  ;;  %v5788_v24 = vld [vmem:[#allocation23_spill] sm:$0xff] }
 0x155   :  { %1116 = vmatpush1.bf16.msra.mxu0 %v3715_v25  ;;  %1157 = vmatpush1.bf16.msra.mxu1 %v3729_v28  ;;  %v5789_v25 = vld [vmem:[#allocation24_spill] sm:$0xff]  ;;  %v5790_v28 = vld [vmem:[#allocation25_spill] sm:$0xff] }
 0x156   :  { %1117 = vmatprep.subr.bf16.mxu0 %v3731_v29  ;;  %1158 = vmatprep.subr.bf16.mxu1 %v3735_v30  ;;  %v5791_v29 = vld [vmem:[#allocation26_spill] sm:$0xff]  ;;  %v5792_v30 = vld [vmem:[#allocation27_spill] sm:$0xff] }
 0x159   :  { %1118 = vmatpush1.bf16.msra.mxu0 %v3738_v32  ;;  %1159 = vmatpush1.bf16.msra.mxu1 %v3740_v33  ;;  %v5793_v32 = vld [vmem:[#allocation28_spill] sm:$0xff]  ;;  %v5794_v33 = vld [vmem:[#allocation29_spill] sm:$0xff] }
 0x15a   :  { %1119 = vmatprep.subr.bf16.mxu0 %v3744_v34  ;;  %1160 = vmatprep.subr.bf16.mxu1 %v3747_v35  ;;  %v5795_v34 = vld [vmem:[#allocation30_spill] sm:$0xff]  ;;  %v5796_v35 = vld [vmem:[#allocation31_spill] sm:$0xff] }
 0x15d   :  { %1120 = vmatpush1.bf16.msra.mxu0 %v3751_v36  ;;  %1161 = vmatpush1.bf16.msra.mxu1 %v3753_v37  ;;  %v5797_v36 = vld [vmem:[#allocation32_spill] sm:$0xff]  ;;  %v5798_v37 = vld [vmem:[#allocation33_spill] sm:$0xff] }
 0x15e   :  { %1121 = vmatprep.subr.bf16.mxu0 %v3765_v40  ;;  %1162 = vmatprep.subr.bf16.mxu1 %v3769_v41  ;;  %v5799_v40 = vld [vmem:[#allocation34_spill] sm:$0xff]  ;;  %v5800_v41 = vld [vmem:[#allocation35_spill] sm:$0xff] }
 0x161   :  { %1122 = vmatpush1.bf16.msra.mxu0 %v3771_v42  ;;  %1163 = vmatpush1.bf16.msra.mxu1 %v3773_v44  ;;  %v5801_v42 = vld [vmem:[#allocation36_spill] sm:$0xff]  ;;  %v5802_v44 = vld [vmem:[#allocation37_spill] sm:$0xff] }
 0x162   :  { %1123 = vmatprep.subr.bf16.mxu0 %v3775_v45  ;;  %1164 = vmatprep.subr.bf16.mxu1 %v3778_v46  ;;  %v5803_v45 = vld [vmem:[#allocation38_spill] sm:$0xff]  ;;  %v5804_v46 = vld [vmem:[#allocation39_spill] sm:$0xff] }
 0x165   :  { %1124 = vmatpush1.bf16.msra.mxu0 %v3783_v47  ;;  %1165 = vmatpush1.bf16.msra.mxu1 %v3787_v48  ;;  %v5805_v47 = vld [vmem:[#allocation40_spill] sm:$0xff]  ;;  %v5806_v48 = vld [vmem:[#allocation41_spill] sm:$0xff] }
 0x166   :  { %1215 = vmatprep.subr.bf16.mxu0 %v3799_v49  ;;  %1256 = vmatprep.subr.bf16.mxu1 %v3801_v50 }
 0x168   :  { %1142 = vmatmul.mubr.bf16.vlgmr.msra.gmra.mrb[24].mxu0 %v683_v1  ;;  %1183 = vmatmul.mubr.bf16.vlgmr.msra.gmra.mrb[24].mxu1 %v683_v1  ;;  %v5829_v1 = vld [vmem:[#allocation64_spill] sm:$0xff] }
 0x169   :  { %1216 = vmatpush1.bf16.msra.mxu0 %v3805_v51  ;;  %1257 = vmatpush1.bf16.msra.mxu1 %v3807_v52 }
 0x16a   :  { %1217 = vmatprep.subr.bf16.mxu0 %v3811_v53  ;;  %1258 = vmatprep.subr.bf16.mxu1 %v3813_v54 }
 0x16d   :  { %1218 = vmatpush1.bf16.msra.mxu0 %v3815_v55  ;;  %1259 = vmatpush1.bf16.msra.mxu1 %v3817_v56 }
 0x16e   :  { %1219 = vmatprep.subr.bf16.mxu0 %v3821_v57  ;;  %1260 = vmatprep.subr.bf16.mxu1 %v5777_v10 }
 0x171   :  { %1220 = vmatpush1.bf16.msra.mxu0 %v5778_v11  ;;  %1261 = vmatpush1.bf16.msra.mxu1 %v5779_v12 }
 0x172   :  { %1221 = vmatprep.subr.bf16.mxu0 %v5780_v13  ;;  %1262 = vmatprep.subr.bf16.mxu1 %v5781_v14 }
 0x175   :  { %1222 = vmatpush1.bf16.msra.mxu0 %v5782_v15  ;;  %1263 = vmatpush1.bf16.msra.mxu1 %v5783_v18 }
 0x176   :  { %1223 = vmatprep.subr.bf16.mxu0 %v5784_v20  ;;  %1264 = vmatprep.subr.bf16.mxu1 %v5785_v21 }
 0x179   :  { %1224 = vmatpush1.bf16.msra.mxu0 %v5786_v22  ;;  %1265 = vmatpush1.bf16.msra.mxu1 %v5787_v23 }
 0x17a   :  { %1225 = vmatprep.subr.bf16.mxu0 %v5788_v24  ;;  %1266 = vmatprep.subr.bf16.mxu1 %v5789_v25 }
 0x17d   :  { %1226 = vmatpush1.bf16.msra.mxu0 %v5790_v28  ;;  %1267 = vmatpush1.bf16.msra.mxu1 %v5791_v29 }
 0x17e   :  { %1227 = vmatprep.subr.bf16.mxu0 %v5792_v30  ;;  %1268 = vmatprep.subr.bf16.mxu1 %v5793_v32 }
 0x181   :  { %1228 = vmatpush1.bf16.msra.mxu0 %v5794_v33  ;;  %1269 = vmatpush1.bf16.msra.mxu1 %v5795_v34 }
 0x182   :  { %1229 = vmatprep.subr.bf16.mxu0 %v5796_v35  ;;  %1270 = vmatprep.subr.bf16.mxu1 %v5797_v36 }
 0x185   :  { %1230 = vmatpush1.bf16.msra.mxu0 %v5798_v37  ;;  %1271 = vmatpush1.bf16.msra.mxu1 %v5799_v40 }
 0x186   :  { %1231 = vmatprep.subr.bf16.mxu0 %v5800_v41  ;;  %1272 = vmatprep.subr.bf16.mxu1 %v5801_v42 }
 0x189   :  { %1232 = vmatpush1.bf16.msra.mxu0 %v5802_v44  ;;  %1273 = vmatpush1.bf16.msra.mxu1 %v5803_v45 }
 0x18a   :  { %1233 = vmatprep.subr.bf16.mxu0 %v5804_v46  ;;  %1274 = vmatprep.subr.bf16.mxu1 %v5805_v47 }
 0x18d   :  { %1234 = vmatpush1.bf16.msra.mxu0 %v5806_v48  ;;  %1275 = vmatpush1.bf16.msra.mxu1 %v5807_v0 }
 0x18e   :  { %1235 = vmatprep.subr.bf16.mxu0 %v5808_v4  ;;  %1276 = vmatprep.subr.bf16.mxu1 %v5809_v3 }
 0x191   :  { %1236 = vmatpush1.bf16.msra.mxu0 %v5810_v38  ;;  %1277 = vmatpush1.bf16.msra.mxu1 %v5811_v17 }
 0x192   :  { %1237 = vmatprep.subr.bf16.mxu0 %v5812_v5  ;;  %1278 = vmatprep.subr.bf16.mxu1 %v5813_v43 }
 0x195   :  { %1238 = vmatpush1.bf16.msra.mxu0 %v5814_v6  ;;  %1279 = vmatpush1.bf16.msra.mxu1 %v5815_v19 }
 0x196   :  { %1239 = vmatprep.subr.bf16.mxu0 %v5816_v8  ;;  %1280 = vmatprep.subr.bf16.mxu1 %v5817_v7 }
 0x199   :  { %1240 = vmatpush1.bf16.msra.mxu0 %v5818_v39  ;;  %1281 = vmatpush1.bf16.msra.mxu1 %v5819_v9  ;;  %v5830_v9 = vld [vmem:[#allocation65_spill] sm:$0xff] }
 0x19a   :  { %1241 = vmatprep.subr.bf16.mxu0 %v5820_v16  ;;  %1282 = vmatprep.subr.bf16.mxu1 %v5821_v61  ;;  %v5831_v16 = vld [vmem:[#allocation66_spill] sm:$0xff]  ;;  %v4191_v61 = vld [vmem:[#allocation3 + $0x24] ss:$16 sps:$4 sm:$0xff]  }
 0x19b   :  { %5832 = vst [vmem:[#allocation12_spill] sm:$0xff] %v4191_v61 }
 0x19d   :  { %1242 = vmatpush1.bf16.msra.mxu0 %v5822_v62  ;;  %1283 = vmatpush1.bf16.msra.mxu1 %v5823_v26  ;;  %v4194_v26 = vld [vmem:[#allocation3 + $0x2c] ss:$16 sps:$4 sm:$0xff]  }
 0x19e   :  { %1243 = vmatprep.subr.bf16.mxu0 %v5824_v60  ;;  %1284 = vmatprep.subr.bf16.mxu1 %v5825_v27  ;;  %5833 = vst [vmem:[#allocation13_spill] sm:$0xff] %v4194_v26 }
 0x1a1   :  { %1244 = vmatpush1.bf16.msra.mxu0 %v5826_v63  ;;  %1285 = vmatpush1.bf16.msra.mxu1 %v5827_v58  ;;  %v2813_v58 = vld [vmem:[%s5346_s3 + $0x1] ss:$4 sm:$0xf]  ;;  %v5834_v63 = vld [vmem:[#allocation67_spill] sm:$0xff] }
 0x1a2   :  { %1245 = vmatprep.subr.bf16.mxu0 %v5828_v59  ;;  %1286 = vmatprep.subr.bf16.mxu1 %v5829_v1  ;;  %v5835_v59 = vsub.s32 0, %v5834_v63  ;;  %v5839_v39 = vsub.s32 3, %v5834_v63  ;;  %v5841_v38 = vsub.s32 2, %v5834_v63 }
 0x1a4   :  { %v4202_v27 = vrot.slane %v2813_v58, %v5835_v59 }
 0x1a5   :  { %1246 = vmatpush1.bf16.msra.mxu0 %v5830_v9  ;;  %1287 = vmatpush1.bf16.msra.mxu1 %v5831_v16  ;;  %v5837_v9 = vsub.s32 1, %v5834_v63 }
 0x1a6   :  { %1319 = vmatprep.subr.bf16.mxu0 %v4191_v61  ;;  %1360 = vmatprep.subr.bf16.mxu1 %v4194_v26  ;;  %5836 = vst [vmem:[#allocation14_spill] sm:$0xff] %v4202_v27  ;;  %v4211_v26 = vrot.slane %v2813_v58, %v5839_v39 }
 0x1a7   :  { %v4206_v1 = vrot.slane %v2813_v58, %v5837_v9 }
 0x1a8   :  { %5840 = vst [vmem:[#allocation16_spill] sm:$0xff] %v4211_v26 }
 0x1a9   :  { %5838 = vst [vmem:[#allocation15_spill] sm:$0xff] %v4206_v1 }
 0x21b   :  { %v1039_v16 = vpop.f32.mrb[20].mxu0  ;;  %v1080_v60 = vpop.f32.mrb[20].mxu1 }
 0x21c   :  { %v1040_v61 = vadd.f32 %v1039_v16, %v4202_v27  ;;  %v1041_v62 = vpop.f32.mrb[21].mxu0  ;;  %v1082_v7 = vpop.f32.mrb[21].mxu1  ;;  %v4217_v16 = vrot.slane %v2813_v58, %v5841_v38 }
 0x21d   :  { %v1042_v8 = vadd.f32 %v1041_v62, %v4206_v1  ;;  %v1043_v19 = vpop.f32.mrb[22].mxu0  ;;  %v1084_v6 = vpop.f32.mrb[22].mxu1  ;;  %v1083_v9 = vadd.f32 %v1082_v7, %v4211_v26  ;;  %v5847_v26 = vld [vmem:[#allocation71_spill] sm:$0xff] }
 0x21e   :  { %v1087_v59 = vmul.f32 0.5, %v1040_v61  ;;  %v1044_v43 = vpop.f32.mrb[23].mxu0  ;;  %v1085_v5 = vpop.f32.mrb[23].mxu1  ;;  %5842 = vst [vmem:[#allocation17_spill] sm:$0xff] %v4217_v16  ;;  %v1081_v39 = vadd.f32 %v1080_v60, %v4217_v16  ;;  %v5844_v60 = vld [vmem:[#allocation68_spill] sm:$0xff] }
 0x21f   :  { %v1088_v17 = vmul.f32 0.5, %v1042_v8 }
 0x220   :  { %3185 = vtanh.f32 %v1087_v59  ;;  %v1089_v27 = vmul.f32 0.5, %v1081_v39  ;;  %v5845_v39 = vld [vmem:[#allocation69_spill] sm:$0xff] }
 0x221   :  { %3187 = vtanh.f32 %v1088_v17 }
 0x222   :  { %3189 = vtanh.f32 %v1083_v9 }
 0x223   :  { %3191 = vtanh.f32 %v1089_v27  ;;  %v5846_v27 = vld [vmem:[#allocation70_spill] sm:$0xff] }
 0x22a   :  { %v3186_v3 = vpop.eup %3185 }
 0x22b   :  { %v1093_v62 = vmul.f32 0.5, %v3186_v3  ;;  %v3188_v19 = vpop.eup %3187 }
 0x22c   :  { %v1094_v43 = vmul.f32 0.5, %v3188_v19  ;;  %v3190_v5 = vpop.eup %3189 }
 0x22d   :  { %v1096_v6 = vadd.f32 0.5, %v1093_v62  ;;  %v3192_v38 = vpop.eup %3191 }
 0x22e   :  { %v1097_v8 = vadd.f32 0.5, %v1094_v43  ;;  %v1095_v17 = vmul.f32 0.5, %v3192_v38 }
 0x22f   :  { %v1101_v61 = vmul.f32 %v3190_v5, %v1096_v6 }
 0x230   :  { %v1100_v59 = vmul.f32 0.0, %v1097_v8  ;;  %v1098_v8 = vadd.f32 0.5, %v1095_v17 }
 0x232   :  { %v4220_v7 = vadd.f32 %v1101_v61, %v1100_v59 }
 0x234   :  { %5843 = vst [vmem:[#allocation18_spill] sm:$0xff] %v4220_v7  ;;  %3193 = vtanh.f32 %v4220_v7 }
 0x23b   :  { %v1143_v63 = vpop.f32.mrb[24].mxu0  ;;  %v1184_v58 = vpop.f32.mrb[24].mxu1 }
 0x23c   :  { %v1191_v9 = vadd.f32 %v1143_v63, %v5844_v60  ;;  %v1193_v3 = vadd.f32 %v1184_v58, %v5845_v39  ;;  %v1145_v16 = vpop.f32.mrb[25].mxu0  ;;  %v1186_v62 = vpop.f32.mrb[25].mxu1 }
 0x23d   :  { %v1192_v19 = vadd.f32 %v1145_v16, %v5846_v27  ;;  %v1194_v43 = vadd.f32 %v1186_v62, %v5847_v26  ;;  %v1147_v6 = vpop.f32.mrb[26].mxu0  ;;  %v1188_v5 = vpop.f32.mrb[26].mxu1 }
 0x23e   :  { %v1195_v61 = vmul.f32 0.5, %v1191_v9  ;;  %v1148_v59 = vpop.f32.mrb[27].mxu0  ;;  %v1189_v7 = vpop.f32.mrb[27].mxu1  ;;  %v1197_v58 = vmul.f32 0.5, %v1193_v3 }
 0x23f   :  { %v3194_v1 = vpop.eup %3193  ;;  %v1196_v38 = vmul.f32 0.5, %v1192_v19  ;;  %v4244_v59 = vld [vmem:[#allocation3 + $0x4c] ss:$16 sps:$4 sm:$0xff]  }
 0x240   :  { %3195 = vtanh.f32 %v1195_v61  ;;  %v1104_v4 = vmul.f32 %v3194_v1, %v1098_v8  ;;  %v4235_v8 = vld [vmem:[#allocation3 + $0x20] ss:$16 sps:$4 sm:$0xff]   ;;  %v4241_v61 = vld [vmem:[#allocation3 + $0x44] ss:$16 sps:$4 sm:$0xff]  }
 0x241   :  { %3197 = vtanh.f32 %v1196_v38  ;;  %v4249_v38 = vld [vmem:[#allocation3 + $0x40] ss:$16 sps:$4 sm:$0xff]  }
 0x242   :  { %v1214_v63 = vpack.c.bf16 %v1104_v4, %v1104_v4  ;;  %3199 = vtanh.f32 %v1194_v43 }
 0x243   :  { %3201 = vtanh.f32 %v1197_v58  ;;  %v4255_v58 = vld [vmem:[#allocation3 + $0x64] ss:$16 sps:$4 sm:$0xff]  }
 0x244   :  { %1247 = vmatprep.mubr.bf16.mxu0 %v1214_v63  ;;  %1288 = vmatprep.mubr.bf16.mxu1 %v1214_v63  ;;  %v4252_v63 = vld [vmem:[#allocation3 + $0x48] ss:$16 sps:$4 sm:$0xff]  }
 0x24a   :  { %v3196_v60 = vpop.eup %3195 }
 0x24b   :  { %v1201_v16 = vmul.f32 0.5, %v3196_v60  ;;  %v3198_v39 = vpop.eup %3197  ;;  %v4258_v60 = vld [vmem:[#allocation3 + $0x6c] ss:$16 sps:$4 sm:$0xff]  }
 0x24c   :  { %v1202_v62 = vmul.f32 0.5, %v3198_v39  ;;  %v3200_v17 = vpop.eup %3199  ;;  %v4264_v39 = vld [vmem:[#allocation3 + $0x68] ss:$16 sps:$4 sm:$0xff]  }
 0x24d   :  { %v1204_v26 = vadd.f32 0.5, %v1201_v16  ;;  %v3202_v4 = vpop.eup %3201  ;;  %v4261_v16 = vld [vmem:[#allocation3 + $0x60] ss:$16 sps:$4 sm:$0xff]  }
 0x24e   :  { %v1205_v9 = vadd.f32 0.5, %v1202_v62  ;;  %v1203_v1 = vmul.f32 0.5, %v3202_v4  ;;  %v4270_v62 = vld [vmem:[#allocation3 + $0x8c] ss:$16 sps:$4 sm:$0xff]   ;;  %v4285_v4 = vld [vmem:[#allocation3 + $0xa0] ss:$16 sps:$4 sm:$0xff]  }
 0x24f   :  { %v1209_v27 = vmul.f32 %v3200_v17, %v1204_v26  ;;  %v4267_v26 = vld [vmem:[#allocation3 + $0x84] ss:$16 sps:$4 sm:$0xff]   ;;  %v4273_v17 = vld [vmem:[#allocation3 + $0x80] ss:$16 sps:$4 sm:$0xff]   ;;  %5849 = vst [vmem:[#allocation20_spill] sm:$0xff] %v4285_v4 }
 0x250   :  { %v1208_v7 = vmul.f32 %v1205_v9, %v4092_v31  ;;  %v1206_v43 = vadd.f32 0.5, %v1203_v1  ;;  %v4238_v31 = vld [vmem:[#allocation3 + $0x28] ss:$16 sps:$4 sm:$0xff]  }
 0x251   :  { %v4276_v9 = vld [vmem:[#allocation3 + $0x88] ss:$16 sps:$4 sm:$0xff]  }
 0x252   :  { %v4228_v19 = vadd.f32 %v1209_v27, %v1208_v7  ;;  %v4279_v27 = vld [vmem:[#allocation3 + $0xa4] ss:$16 sps:$4 sm:$0xff]   ;;  %v4282_v7 = vld [vmem:[#allocation3 + $0xac] ss:$16 sps:$4 sm:$0xff]   ;;  %v4288_v1 = vld [vmem:[#allocation3 + $0xa8] ss:$16 sps:$4 sm:$0xff]  }
 0x253   :  { %5848 = vst [vmem:[#allocation19_spill] sm:$0xff] %v4282_v7  ;;  %5850 = vst [vmem:[#allocation21_spill] sm:$0xff] %v4288_v1 }
 0x254   :  { %3203 = vtanh.f32 %v4228_v19 }
 0x25e   :  { %v3204_v6 = vpop.eup %3203 }
 0x25f   :  { %v1212_v3 = vmul.f32 %v3204_v6, %v1206_v43  ;;  %v4291_v43 = vld [vmem:[#allocation3 + $0xc4] ss:$16 sps:$4 sm:$0xff]   ;;  %v4294_v6 = vld [vmem:[#allocation3 + $0xcc] ss:$16 sps:$4 sm:$0xff]  }
 0x260   :  { %5851 = vst [vmem:[#allocation22_spill] sm:$0xff] %v4291_v43  ;;  %5852 = vst [vmem:[#allocation23_spill] sm:$0xff] %v4294_v6 }
 0x261   :  { %v4231_v5 = vpack.c.bf16 %v1212_v3, %v1212_v3  ;;  %v4297_v3 = vld [vmem:[#allocation3 + $0xc0] ss:$16 sps:$4 sm:$0xff]  }
 0x262   :  { %5853 = vst [vmem:[#allocation24_spill] sm:$0xff] %v4297_v3 }
 0x263   :  { %1248 = vmatmul.mubr.bf16.vlgmr.msra.gmra.mrb[28].mxu0 %v4231_v5  ;;  %1289 = vmatmul.mubr.bf16.vlgmr.msra.gmra.mrb[28].mxu1 %v4231_v5 }
 0x264   :  { %1320 = vmatpush1.bf16.msra.mxu0 %v4235_v8  ;;  %1361 = vmatpush1.bf16.msra.mxu1 %v4238_v31 }
 0x265   :  { %1321 = vmatprep.subr.bf16.mxu0 %v4241_v61  ;;  %1362 = vmatprep.subr.bf16.mxu1 %v4244_v59 }
 0x266   :  { %1351 = vmatprep.mubr.bf16.mxu0 %v5776_v2  ;;  %1392 = vmatprep.mubr.bf16.mxu1 %v5776_v2 }
 0x268   :  { %1322 = vmatpush1.bf16.msra.mxu0 %v4249_v38  ;;  %1363 = vmatpush1.bf16.msra.mxu1 %v4252_v63 }
 0x269   :  { %1323 = vmatprep.subr.bf16.mxu0 %v4255_v58  ;;  %1364 = vmatprep.subr.bf16.mxu1 %v4258_v60 }
 0x26c   :  { %1324 = vmatpush1.bf16.msra.mxu0 %v4261_v16  ;;  %1365 = vmatpush1.bf16.msra.mxu1 %v4264_v39 }
 0x26d   :  { %1325 = vmatprep.subr.bf16.mxu0 %v4267_v26  ;;  %1366 = vmatprep.subr.bf16.mxu1 %v4270_v62 }
 0x270   :  { %1326 = vmatpush1.bf16.msra.mxu0 %v4273_v17  ;;  %1367 = vmatpush1.bf16.msra.mxu1 %v4276_v9 }
 0x271   :  { %1327 = vmatprep.subr.bf16.mxu0 %v4279_v27  ;;  %1368 = vmatprep.subr.bf16.mxu1 %v4282_v7  ;;  %v4300_v7 = vld [vmem:[#allocation3 + $0xc8] ss:$16 sps:$4 sm:$0xff]  }
 0x272   :  { %5854 = vst [vmem:[#allocation25_spill] sm:$0xff] %v4300_v7 }
 0x274   :  { %1328 = vmatpush1.bf16.msra.mxu0 %v4285_v4  ;;  %1369 = vmatpush1.bf16.msra.mxu1 %v4288_v1  ;;  %v4303_v4 = vld [vmem:[#allocation3 + $0xe4] ss:$16 sps:$4 sm:$0xff]   ;;  %v4306_v1 = vld [vmem:[#allocation3 + $0xec] ss:$16 sps:$4 sm:$0xff]  }
 0x275   :  { %1329 = vmatprep.subr.bf16.mxu0 %v4291_v43  ;;  %1370 = vmatprep.subr.bf16.mxu1 %v4294_v6  ;;  %5855 = vst [vmem:[#allocation26_spill] sm:$0xff] %v4303_v4  ;;  %5856 = vst [vmem:[#allocation27_spill] sm:$0xff] %v4306_v1  ;;  %v4309_v43 = vld [vmem:[#allocation3 + $0xe0] ss:$16 sps:$4 sm:$0xff]   ;;  %v4312_v6 = vld [vmem:[#allocation3 + $0xe8] ss:$16 sps:$4 sm:$0xff]  }
 0x278   :  { %1330 = vmatpush1.bf16.msra.mxu0 %v4297_v3  ;;  %1371 = vmatpush1.bf16.msra.mxu1 %v4300_v7  ;;  %v4315_v3 = vld [vmem:[#allocation3 + $0x104] ss:$16 sps:$4 sm:$0xff]   ;;  %v4318_v7 = vld [vmem:[#allocation3 + $0x10c] ss:$16 sps:$4 sm:$0xff]  }
 0x279   :  { %1331 = vmatprep.subr.bf16.mxu0 %v4303_v4  ;;  %1372 = vmatprep.subr.bf16.mxu1 %v4306_v1  ;;  %v4321_v4 = vld [vmem:[#allocation3 + $0x100] ss:$16 sps:$4 sm:$0xff]   ;;  %v4324_v1 = vld [vmem:[#allocation3 + $0x108] ss:$16 sps:$4 sm:$0xff]  }
 0x27c   :  { %1332 = vmatpush1.bf16.msra.mxu0 %v4309_v43  ;;  %1373 = vmatpush1.bf16.msra.mxu1 %v4312_v6 }
 0x27d   :  { %1333 = vmatprep.subr.bf16.mxu0 %v4315_v3  ;;  %1374 = vmatprep.subr.bf16.mxu1 %v4318_v7 }
 0x280   :  { %1334 = vmatpush1.bf16.msra.mxu0 %v4321_v4  ;;  %1375 = vmatpush1.bf16.msra.mxu1 %v4324_v1 }
 0x281   :  { %1425 = vmatprep.subr.bf16.mxu0 %v3799_v49  ;;  %1466 = vmatprep.subr.bf16.mxu1 %v3801_v50  ;;  %v5857_v49 = vld [vmem:[#allocation43_spill] sm:$0xff]  ;;  %v5858_v50 = vld [vmem:[#allocation44_spill] sm:$0xff] }
 0x283   :  { %1352 = vmatmul.mubr.bf16.vlgmr.msra.gmra.mrb[32].mxu0 %v4231_v5  ;;  %1393 = vmatmul.mubr.bf16.vlgmr.msra.gmra.mrb[32].mxu1 %v4231_v5  ;;  %v5885_v5 = vld [vmem:[#allocation16_spill] sm:$0xff] }
 0x284   :  { %1426 = vmatpush1.bf16.msra.mxu0 %v3805_v51  ;;  %1467 = vmatpush1.bf16.msra.mxu1 %v3807_v52  ;;  %v5859_v51 = vld [vmem:[#allocation45_spill] sm:$0xff]  ;;  %v5860_v52 = vld [vmem:[#allocation46_spill] sm:$0xff] }
 0x285   :  { %1427 = vmatprep.subr.bf16.mxu0 %v3811_v53  ;;  %1468 = vmatprep.subr.bf16.mxu1 %v3813_v54  ;;  %v5861_v53 = vld [vmem:[#allocation47_spill] sm:$0xff]  ;;  %v5862_v54 = vld [vmem:[#allocation48_spill] sm:$0xff] }
 0x288   :  { %1428 = vmatpush1.bf16.msra.mxu0 %v3815_v55  ;;  %1469 = vmatpush1.bf16.msra.mxu1 %v3817_v56  ;;  %v5863_v55 = vld [vmem:[#allocation49_spill] sm:$0xff]  ;;  %v5864_v56 = vld [vmem:[#allocation50_spill] sm:$0xff] }
 0x289   :  { %1429 = vmatprep.subr.bf16.mxu0 %v3821_v57  ;;  %1470 = vmatprep.subr.bf16.mxu1 %v5777_v10  ;;  %v5865_v57 = vld [vmem:[#allocation51_spill] sm:$0xff]  ;;  %v5866_v10 = vld [vmem:[#allocation52_spill] sm:$0xff] }
 0x28c   :  { %1430 = vmatpush1.bf16.msra.mxu0 %v5778_v11  ;;  %1471 = vmatpush1.bf16.msra.mxu1 %v5779_v12  ;;  %v5867_v11 = vld [vmem:[#allocation53_spill] sm:$0xff]  ;;  %v5868_v12 = vld [vmem:[#allocation54_spill] sm:$0xff] }
 0x28d   :  { %1431 = vmatprep.subr.bf16.mxu0 %v5780_v13  ;;  %1472 = vmatprep.subr.bf16.mxu1 %v5781_v14  ;;  %v5869_v13 = vld [vmem:[#allocation55_spill] sm:$0xff]  ;;  %v5870_v14 = vld [vmem:[#allocation56_spill] sm:$0xff] }
 0x290   :  { %1432 = vmatpush1.bf16.msra.mxu0 %v5782_v15  ;;  %1473 = vmatpush1.bf16.msra.mxu1 %v5783_v18  ;;  %v5871_v15 = vld [vmem:[#allocation57_spill] sm:$0xff]  ;;  %v5872_v18 = vld [vmem:[#allocation58_spill] sm:$0xff] }
 0x291   :  { %1433 = vmatprep.subr.bf16.mxu0 %v5784_v20  ;;  %1474 = vmatprep.subr.bf16.mxu1 %v5785_v21  ;;  %v5873_v20 = vld [vmem:[#allocation59_spill] sm:$0xff]  ;;  %v5874_v21 = vld [vmem:[#allocation60_spill] sm:$0xff] }
 0x294   :  { %1434 = vmatpush1.bf16.msra.mxu0 %v5786_v22  ;;  %1475 = vmatpush1.bf16.msra.mxu1 %v5787_v23  ;;  %v5875_v22 = vld [vmem:[#allocation61_spill] sm:$0xff]  ;;  %v5876_v23 = vld [vmem:[#allocation62_spill] sm:$0xff] }
 0x295   :  { %1435 = vmatprep.subr.bf16.mxu0 %v5788_v24  ;;  %1476 = vmatprep.subr.bf16.mxu1 %v5789_v25  ;;  %v5877_v24 = vld [vmem:[#allocation63_spill] sm:$0xff]  ;;  %v5878_v25 = vld [vmem:[#allocation64_spill] sm:$0xff] }
 0x298   :  { %1436 = vmatpush1.bf16.msra.mxu0 %v5790_v28  ;;  %1477 = vmatpush1.bf16.msra.mxu1 %v5791_v29  ;;  %v5879_v28 = vld [vmem:[#allocation65_spill] sm:$0xff]  ;;  %v5880_v29 = vld [vmem:[#allocation66_spill] sm:$0xff] }
 0x299   :  { %1437 = vmatprep.subr.bf16.mxu0 %v5792_v30  ;;  %1478 = vmatprep.subr.bf16.mxu1 %v5793_v32  ;;  %v5881_v30 = vld [vmem:[#allocation12_spill] sm:$0xff]  ;;  %v5882_v32 = vld [vmem:[#allocation13_spill] sm:$0xff] }
 0x29c   :  { %1438 = vmatpush1.bf16.msra.mxu0 %v5794_v33  ;;  %1479 = vmatpush1.bf16.msra.mxu1 %v5795_v34 }
 0x29d   :  { %1439 = vmatprep.subr.bf16.mxu0 %v5796_v35  ;;  %1480 = vmatprep.subr.bf16.mxu1 %v5797_v36  ;;  %v5883_v35 = vld [vmem:[#allocation14_spill] sm:$0xff] }
 0x2a0   :  { %1440 = vmatpush1.bf16.msra.mxu0 %v5798_v37  ;;  %1481 = vmatpush1.bf16.msra.mxu1 %v5799_v40 }
 0x2a1   :  { %1441 = vmatprep.subr.bf16.mxu0 %v5800_v41  ;;  %1482 = vmatprep.subr.bf16.mxu1 %v5801_v42  ;;  %v5884_v41 = vld [vmem:[#allocation15_spill] sm:$0xff] }
 0x2a4   :  { %1442 = vmatpush1.bf16.msra.mxu0 %v5802_v44  ;;  %1483 = vmatpush1.bf16.msra.mxu1 %v5803_v45 }
 0x2a5   :  { %1443 = vmatprep.subr.bf16.mxu0 %v5804_v46  ;;  %1484 = vmatprep.subr.bf16.mxu1 %v5805_v47 }
 0x2a8   :  { %1444 = vmatpush1.bf16.msra.mxu0 %v5806_v48  ;;  %1485 = vmatpush1.bf16.msra.mxu1 %v5807_v0 }
 0x2a9   :  { %1445 = vmatprep.subr.bf16.mxu0 %v5857_v49  ;;  %1486 = vmatprep.subr.bf16.mxu1 %v5858_v50  ;;  %v5886_v50 = vld [vmem:[#allocation17_spill] sm:$0xff] }
 0x2ac   :  { %1446 = vmatpush1.bf16.msra.mxu0 %v5859_v51  ;;  %1487 = vmatpush1.bf16.msra.mxu1 %v5860_v52 }
 0x2ad   :  { %1447 = vmatprep.subr.bf16.mxu0 %v5861_v53  ;;  %1488 = vmatprep.subr.bf16.mxu1 %v5862_v54 }
 0x2b0   :  { %1448 = vmatpush1.bf16.msra.mxu0 %v5863_v55  ;;  %1489 = vmatpush1.bf16.msra.mxu1 %v5864_v56 }
 0x2b1   :  { %1449 = vmatprep.subr.bf16.mxu0 %v5865_v57  ;;  %1490 = vmatprep.subr.bf16.mxu1 %v5866_v10 }
 0x2b4   :  { %1450 = vmatpush1.bf16.msra.mxu0 %v5867_v11  ;;  %1491 = vmatpush1.bf16.msra.mxu1 %v5868_v12 }
 0x2b5   :  { %1451 = vmatprep.subr.bf16.mxu0 %v5869_v13  ;;  %1492 = vmatprep.subr.bf16.mxu1 %v5870_v14  ;;  %v5887_v13 = vld [vmem:[#allocation18_spill] sm:$0xff] }
 0x2b8   :  { %1452 = vmatpush1.bf16.msra.mxu0 %v5871_v15  ;;  %1493 = vmatpush1.bf16.msra.mxu1 %v5872_v18 }
 0x2b9   :  { %1453 = vmatprep.subr.bf16.mxu0 %v5873_v20  ;;  %1494 = vmatprep.subr.bf16.mxu1 %v5874_v21 }
 0x2bc   :  { %1454 = vmatpush1.bf16.msra.mxu0 %v5875_v22  ;;  %1495 = vmatpush1.bf16.msra.mxu1 %v5876_v23  ;;  %v5888_v23 = vld [vmem:[#allocation72_spill] sm:$0xff] }
 0x2bd   :  { %1455 = vmatprep.subr.bf16.mxu0 %v5877_v24  ;;  %1496 = vmatprep.subr.bf16.mxu1 %v5878_v25  ;;  %v5889_v25 = vld [vmem:[#allocation73_spill] sm:$0xff] }
 0x2c0   :  { %1456 = vmatpush1.bf16.msra.mxu0 %v5879_v28  ;;  %1497 = vmatpush1.bf16.msra.mxu1 %v5880_v29 }
 0x2c1   :  { %1529 = vmatprep.subr.bf16.mxu0 %v5881_v30  ;;  %1570 = vmatprep.subr.bf16.mxu1 %v5882_v32 }
 0x336   :  { %v1249_v33 = vpop.f32.mrb[28].mxu0  ;;  %v1290_v34 = vpop.f32.mrb[28].mxu1 }
 0x337   :  { %v1250_v36 = vadd.f32 %v1249_v33, %v5883_v35  ;;  %v1251_v37 = vpop.f32.mrb[29].mxu0  ;;  %v1292_v40 = vpop.f32.mrb[29].mxu1  ;;  %v1291_v51 = vadd.f32 %v1290_v34, %v5886_v50  ;;  %v5890_v34 = vld [vmem:[#allocation74_spill] sm:$0xff] }
 0x338   :  { %v1252_v42 = vadd.f32 %v1251_v37, %v5884_v41  ;;  %v1253_v44 = vpop.f32.mrb[30].mxu0  ;;  %v1294_v45 = vpop.f32.mrb[30].mxu1  ;;  %v1293_v49 = vadd.f32 %v1292_v40, %v5885_v5  ;;  %v5891_v37 = vld [vmem:[#allocation75_spill] sm:$0xff] }
 0x339   :  { %v1297_v46 = vmul.f32 0.5, %v1250_v36  ;;  %v1254_v47 = vpop.f32.mrb[31].mxu0  ;;  %v1295_v48 = vpop.f32.mrb[31].mxu1  ;;  %v1299_v52 = vmul.f32 0.5, %v1291_v51 }
 0x33a   :  { %v1298_v0 = vmul.f32 0.5, %v1252_v42 }
 0x33b   :  { %3205 = vtanh.f32 %v1297_v46 }
 0x33c   :  { %3207 = vtanh.f32 %v1298_v0 }
 0x33d   :  { %3209 = vtanh.f32 %v1293_v49 }
 0x33e   :  { %3211 = vtanh.f32 %v1299_v52 }
 0x345   :  { %v3206_v53 = vpop.eup %3205 }
 0x346   :  { %v1303_v54 = vmul.f32 0.5, %v3206_v53  ;;  %v3208_v55 = vpop.eup %3207 }
 0x347   :  { %v1304_v57 = vmul.f32 0.5, %v3208_v55  ;;  %v3210_v10 = vpop.eup %3209 }
 0x348   :  { %v1306_v56 = vadd.f32 0.5, %v1303_v54  ;;  %v3212_v18 = vpop.eup %3211 }
 0x349   :  { %v1307_v11 = vadd.f32 0.5, %v1304_v57  ;;  %v1305_v20 = vmul.f32 0.5, %v3212_v18 }
 0x34a   :  { %v1311_v12 = vmul.f32 %v3210_v10, %v1306_v56 }
 0x34b   :  { %v1310_v14 = vmul.f32 %v1307_v11, %v5887_v13  ;;  %v1308_v45 = vadd.f32 0.5, %v1305_v20 }
 0x34d   :  { %v4400_v15 = vadd.f32 %v1311_v12, %v1310_v14 }
 0x34f   :  { %3213 = vtanh.f32 %v4400_v15 }
 0x356   :  { %v1353_v21 = vpop.f32.mrb[32].mxu0  ;;  %v1394_v22 = vpop.f32.mrb[32].mxu1 }
 0x357   :  { %v1401_v24 = vadd.f32 %v1353_v21, %v5888_v23  ;;  %v1403_v28 = vadd.f32 %v1394_v22, %v5889_v25  ;;  %v1355_v29 = vpop.f32.mrb[33].mxu0  ;;  %v1396_v33 = vpop.f32.mrb[33].mxu1 }
 0x358   :  { %v1402_v36 = vadd.f32 %v1355_v29, %v5890_v34  ;;  %v1404_v40 = vadd.f32 %v1396_v33, %v5891_v37  ;;  %v1357_v42 = vpop.f32.mrb[34].mxu0  ;;  %v1398_v44 = vpop.f32.mrb[34].mxu1  ;;  %v5894_v29 = vld [vmem:[#allocation21_spill] sm:$0xff]  ;;  %v5895_v33 = vld [vmem:[#allocation22_spill] sm:$0xff]  ;;  %v5896_v34 = vld [vmem:[#allocation23_spill] sm:$0xff] }
 0x359   :  { %v1405_v46 = vmul.f32 0.5, %v1401_v24  ;;  %v1358_v47 = vpop.f32.mrb[35].mxu0  ;;  %v1399_v48 = vpop.f32.mrb[35].mxu1  ;;  %v1407_v53 = vmul.f32 0.5, %v1403_v28  ;;  %v5893_v28 = vld [vmem:[#allocation20_spill] sm:$0xff]  ;;  %v5898_v37 = vld [vmem:[#allocation25_spill] sm:$0xff] }
 0x35a   :  { %v3214_v0 = vpop.eup %3213  ;;  %v1406_v49 = vmul.f32 0.5, %v1402_v36  ;;  %v5897_v36 = vld [vmem:[#allocation24_spill] sm:$0xff]  ;;  %v5900_v42 = vld [vmem:[#allocation27_spill] sm:$0xff] }
 0x35b   :  { %3215 = vtanh.f32 %v1405_v46  ;;  %v1314_v51 = vmul.f32 %v3214_v0, %v1308_v45  ;;  %v4443_v44 = vld [vmem:[#allocation3 + $0x124] ss:$16 sps:$4 sm:$0xff]   ;;  %v4446_v45 = vld [vmem:[#allocation3 + $0x12c] ss:$16 sps:$4 sm:$0xff]   ;;  %v4449_v46 = vld [vmem:[#allocation3 + $0x120] ss:$16 sps:$4 sm:$0xff]  }
 0x35c   :  { %3217 = vtanh.f32 %v1406_v49  ;;  %v4452_v47 = vld [vmem:[#allocation3 + $0x128] ss:$16 sps:$4 sm:$0xff]   ;;  %v4455_v48 = vld [vmem:[#allocation3 + $0x144] ss:$16 sps:$4 sm:$0xff]   ;;  %v4458_v0 = vld [vmem:[#allocation3 + $0x14c] ss:$16 sps:$4 sm:$0xff]  }
 0x35d   :  { %v1424_v52 = vpack.c.bf16 %v1314_v51, %v1314_v51  ;;  %3219 = vtanh.f32 %v1404_v40  ;;  %v5899_v40 = vld [vmem:[#allocation26_spill] sm:$0xff]  ;;  %v4461_v49 = vld [vmem:[#allocation3 + $0x140] ss:$16 sps:$4 sm:$0xff]  }
 0x35e   :  { %3221 = vtanh.f32 %v1407_v53  ;;  %v4464_v51 = vld [vmem:[#allocation3 + $0x148] ss:$16 sps:$4 sm:$0xff]   ;;  %v4470_v53 = vld [vmem:[#allocation3 + $0x16c] ss:$16 sps:$4 sm:$0xff]  }
 0x35f   :  { %1457 = vmatprep.mubr.bf16.mxu0 %v1424_v52  ;;  %1498 = vmatprep.mubr.bf16.mxu1 %v1424_v52  ;;  %v4467_v52 = vld [vmem:[#allocation3 + $0x164] ss:$16 sps:$4 sm:$0xff]  }
 0x365   :  { %v3216_v54 = vpop.eup %3215 }
 0x366   :  { %v1411_v55 = vmul.f32 0.5, %v3216_v54  ;;  %v3218_v56 = vpop.eup %3217  ;;  %v4473_v54 = vld [vmem:[#allocation3 + $0x160] ss:$16 sps:$4 sm:$0xff]  }
 0x367   :  { %v1412_v10 = vmul.f32 0.5, %v3218_v56  ;;  %v3220_v11 = vpop.eup %3219  ;;  %5901 = vst [vmem:[#allocation28_spill] sm:$0xff] %v4473_v54  ;;  %v4479_v56 = vld [vmem:[#allocation3 + $0x184] ss:$16 sps:$4 sm:$0xff]  }
 0x368   :  { %v1414_v57 = vadd.f32 0.5, %v1411_v55  ;;  %v3222_v20 = vpop.eup %3221  ;;  %v4476_v55 = vld [vmem:[#allocation3 + $0x168] ss:$16 sps:$4 sm:$0xff]   ;;  %5903 = vst [vmem:[#allocation30_spill] sm:$0xff] %v4479_v56 }
 0x369   :  { %v1415_v12 = vadd.f32 0.5, %v1412_v10  ;;  %v1413_v21 = vmul.f32 0.5, %v3222_v20  ;;  %5902 = vst [vmem:[#allocation29_spill] sm:$0xff] %v4476_v55  ;;  %v4485_v10 = vld [vmem:[#allocation3 + $0x180] ss:$16 sps:$4 sm:$0xff]  }
 0x36a   :  { %v1419_v13 = vmul.f32 %v3220_v11, %v1414_v57  ;;  %v4482_v57 = vld [vmem:[#allocation3 + $0x18c] ss:$16 sps:$4 sm:$0xff]   ;;  %5905 = vst [vmem:[#allocation32_spill] sm:$0xff] %v4485_v10  ;;  %v4488_v11 = vld [vmem:[#allocation3 + $0x188] ss:$16 sps:$4 sm:$0xff]  }
 0x36b   :  { %v1418_v14 = vmul.f32 %v1415_v12, %v4228_v19  ;;  %v1416_v22 = vadd.f32 0.5, %v1413_v21  ;;  %v5892_v19 = vld [vmem:[#allocation19_spill] sm:$0xff]  ;;  %5904 = vst [vmem:[#allocation31_spill] sm:$0xff] %v4482_v57  ;;  %5906 = vst [vmem:[#allocation33_spill] sm:$0xff] %v4488_v11  ;;  %v4500_v20 = vld [vmem:[#allocation3 + $0x1a8] ss:$16 sps:$4 sm:$0xff]  }
 0x36c   :  { %v4491_v12 = vld [vmem:[#allocation3 + $0x1a4] ss:$16 sps:$4 sm:$0xff]   ;;  %5910 = vst [vmem:[#allocation37_spill] sm:$0xff] %v4500_v20 }
 0x36d   :  { %v4408_v18 = vadd.f32 %v1419_v13, %v1418_v14  ;;  %5907 = vst [vmem:[#allocation34_spill] sm:$0xff] %v4491_v12  ;;  %v4494_v13 = vld [vmem:[#allocation3 + $0x1ac] ss:$16 sps:$4 sm:$0xff]   ;;  %v4497_v14 = vld [vmem:[#allocation3 + $0x1a0] ss:$16 sps:$4 sm:$0xff]  }
 0x36e   :  { %5908 = vst [vmem:[#allocation35_spill] sm:$0xff] %v4494_v13  ;;  %5909 = vst [vmem:[#allocation36_spill] sm:$0xff] %v4497_v14  ;;  %v4503_v21 = vld [vmem:[#allocation3 + $0x1c4] ss:$16 sps:$4 sm:$0xff]  }
 0x36f   :  { %3223 = vtanh.f32 %v4408_v18  ;;  %5911 = vst [vmem:[#allocation38_spill] sm:$0xff] %v4503_v21 }
 0x379   :  { %v3224_v23 = vpop.eup %3223 }
 0x37a   :  { %v1422_v24 = vmul.f32 %v3224_v23, %v1416_v22  ;;  %v4506_v22 = vld [vmem:[#allocation3 + $0x1cc] ss:$16 sps:$4 sm:$0xff]   ;;  %v4509_v23 = vld [vmem:[#allocation3 + $0x1c0] ss:$16 sps:$4 sm:$0xff]  }
 0x37b   :  { %5912 = vst [vmem:[#allocation39_spill] sm:$0xff] %v4506_v22  ;;  %5913 = vst [vmem:[#allocation40_spill] sm:$0xff] %v4509_v23 }
 0x37c   :  { %v1423_v25 = vpack.c.bf16 %v1422_v24, %v1422_v24  ;;  %v4512_v24 = vld [vmem:[#allocation3 + $0x1c8] ss:$16 sps:$4 sm:$0xff]  }
 0x37d   :  { %5914 = vst [vmem:[#allocation41_spill] sm:$0xff] %v4512_v24 }
 0x37e   :  { %1458 = vmatmul.mubr.bf16.vlgmr.msra.gmra.mrb[36].mxu0 %v1423_v25  ;;  %1499 = vmatmul.mubr.bf16.vlgmr.msra.gmra.mrb[36].mxu1 %v1423_v25 }
 0x37f   :  { %1530 = vmatpush1.bf16.msra.mxu0 %v4235_v8  ;;  %1571 = vmatpush1.bf16.msra.mxu1 %v4238_v31 }
 0x380   :  { %1531 = vmatprep.subr.bf16.mxu0 %v4241_v61  ;;  %1572 = vmatprep.subr.bf16.mxu1 %v4244_v59 }
 0x381   :  { %1561 = vmatprep.mubr.bf16.mxu0 %v5776_v2  ;;  %1602 = vmatprep.mubr.bf16.mxu1 %v5776_v2 }
 0x383   :  { %1532 = vmatpush1.bf16.msra.mxu0 %v4249_v38  ;;  %1573 = vmatpush1.bf16.msra.mxu1 %v4252_v63 }
 0x384   :  { %1533 = vmatprep.subr.bf16.mxu0 %v4255_v58  ;;  %1574 = vmatprep.subr.bf16.mxu1 %v4258_v60 }
 0x387   :  { %1534 = vmatpush1.bf16.msra.mxu0 %v4261_v16  ;;  %1575 = vmatpush1.bf16.msra.mxu1 %v4264_v39 }
 0x388   :  { %1535 = vmatprep.subr.bf16.mxu0 %v4267_v26  ;;  %1576 = vmatprep.subr.bf16.mxu1 %v4270_v62 }
 0x38b   :  { %1536 = vmatpush1.bf16.msra.mxu0 %v4273_v17  ;;  %1577 = vmatpush1.bf16.msra.mxu1 %v4276_v9 }
 0x38c   :  { %1537 = vmatprep.subr.bf16.mxu0 %v4279_v27  ;;  %1578 = vmatprep.subr.bf16.mxu1 %v5892_v19 }
 0x38f   :  { %1538 = vmatpush1.bf16.msra.mxu0 %v5893_v28  ;;  %1579 = vmatpush1.bf16.msra.mxu1 %v5894_v29 }
 0x390   :  { %1539 = vmatprep.subr.bf16.mxu0 %v5895_v33  ;;  %1580 = vmatprep.subr.bf16.mxu1 %v5896_v34 }
 0x393   :  { %1540 = vmatpush1.bf16.msra.mxu0 %v5897_v36  ;;  %1581 = vmatpush1.bf16.msra.mxu1 %v5898_v37 }
 0x394   :  { %1541 = vmatprep.subr.bf16.mxu0 %v5899_v40  ;;  %1582 = vmatprep.subr.bf16.mxu1 %v5900_v42 }
 0x397   :  { %1542 = vmatpush1.bf16.msra.mxu0 %v4309_v43  ;;  %1583 = vmatpush1.bf16.msra.mxu1 %v4312_v6 }
 0x398   :  { %1543 = vmatprep.subr.bf16.mxu0 %v4315_v3  ;;  %1584 = vmatprep.subr.bf16.mxu1 %v4318_v7 }
 0x39b   :  { %1544 = vmatpush1.bf16.msra.mxu0 %v4321_v4  ;;  %1585 = vmatpush1.bf16.msra.mxu1 %v4324_v1 }
 0x39c   :  { %1635 = vmatprep.subr.bf16.mxu0 %v4443_v44  ;;  %1676 = vmatprep.subr.bf16.mxu1 %v4446_v45 }
 0x39e   :  { %1562 = vmatmul.mubr.bf16.vlgmr.msra.gmra.mrb[40].mxu0 %v1423_v25  ;;  %1603 = vmatmul.mubr.bf16.vlgmr.msra.gmra.mrb[40].mxu1 %v1423_v25  ;;  %v4515_v25 = vld [vmem:[#allocation3 + $0x1e4] ss:$16 sps:$4 sm:$0xff]  }
 0x39f   :  { %1636 = vmatpush1.bf16.msra.mxu0 %v4449_v46  ;;  %1677 = vmatpush1.bf16.msra.mxu1 %v4452_v47  ;;  %5915 = vst [vmem:[#allocation42_spill] sm:$0xff] %v4515_v25 }
 0x3a0   :  { %1637 = vmatprep.subr.bf16.mxu0 %v4455_v48  ;;  %1678 = vmatprep.subr.bf16.mxu1 %v4458_v0 }
 0x3a3   :  { %1638 = vmatpush1.bf16.msra.mxu0 %v4461_v49  ;;  %1679 = vmatpush1.bf16.msra.mxu1 %v4464_v51 }
 0x3a4   :  { %1639 = vmatprep.subr.bf16.mxu0 %v4467_v52  ;;  %1680 = vmatprep.subr.bf16.mxu1 %v4470_v53 }
 0x3a7   :  { %1640 = vmatpush1.bf16.msra.mxu0 %v4473_v54  ;;  %1681 = vmatpush1.bf16.msra.mxu1 %v4476_v55 }
 0x3a8   :  { %1641 = vmatprep.subr.bf16.mxu0 %v4479_v56  ;;  %1682 = vmatprep.subr.bf16.mxu1 %v4482_v57 }
 0x3ab   :  { %1642 = vmatpush1.bf16.msra.mxu0 %v4485_v10  ;;  %1683 = vmatpush1.bf16.msra.mxu1 %v4488_v11 }
 0x3ac   :  { %1643 = vmatprep.subr.bf16.mxu0 %v4491_v12  ;;  %1684 = vmatprep.subr.bf16.mxu1 %v4494_v13 }
 0x3af   :  { %1644 = vmatpush1.bf16.msra.mxu0 %v4497_v14  ;;  %1685 = vmatpush1.bf16.msra.mxu1 %v4500_v20  ;;  %v4518_v20 = vld [vmem:[#allocation3 + $0x1ec] ss:$16 sps:$4 sm:$0xff]  }
 0x3b0   :  { %1645 = vmatprep.subr.bf16.mxu0 %v4503_v21  ;;  %1686 = vmatprep.subr.bf16.mxu1 %v4506_v22  ;;  %5916 = vst [vmem:[#allocation67_spill] sm:$0xff] %v4518_v20  ;;  %v4521_v21 = vld [vmem:[#allocation3 + $0x1e0] ss:$16 sps:$4 sm:$0xff]   ;;  %v4524_v22 = vld [vmem:[#allocation3 + $0x1e8] ss:$16 sps:$4 sm:$0xff]  }
 0x3b1   :  { %5917 = vst [vmem:[#allocation68_spill] sm:$0xff] %v4521_v21  ;;  %5918 = vst [vmem:[#allocation69_spill] sm:$0xff] %v4524_v22 }
 0x3b3   :  { %1646 = vmatpush1.bf16.msra.mxu0 %v4509_v23  ;;  %1687 = vmatpush1.bf16.msra.mxu1 %v4512_v24  ;;  %v4527_v23 = vld [vmem:[#allocation3 + $0x204] ss:$16 sps:$4 sm:$0xff]   ;;  %v4530_v24 = vld [vmem:[#allocation3 + $0x20c] ss:$16 sps:$4 sm:$0xff]  }
 0x3b4   :  { %1647 = vmatprep.subr.bf16.mxu0 %v4515_v25  ;;  %1688 = vmatprep.subr.bf16.mxu1 %v4518_v20  ;;  %5919 = vst [vmem:[#allocation70_spill] sm:$0xff] %v4527_v23  ;;  %5920 = vst [vmem:[#allocation71_spill] sm:$0xff] %v4530_v24  ;;  %v4533_v25 = vld [vmem:[#allocation3 + $0x200] ss:$16 sps:$4 sm:$0xff]   ;;  %v4536_v20 = vld [vmem:[#allocation3 + $0x208] ss:$16 sps:$4 sm:$0xff]  }
 0x3b5   :  { %5921 = vst [vmem:[#allocation43_spill] sm:$0xff] %v4533_v25  ;;  %5922 = vst [vmem:[#allocation44_spill] sm:$0xff] %v4536_v20 }
 0x3b7   :  { %1648 = vmatpush1.bf16.msra.mxu0 %v4521_v21  ;;  %1689 = vmatpush1.bf16.msra.mxu1 %v4524_v22  ;;  %v4539_v21 = vld [vmem:[#allocation3 + $0x224] ss:$16 sps:$4 sm:$0xff]   ;;  %v4542_v22 = vld [vmem:[#allocation3 + $0x22c] ss:$16 sps:$4 sm:$0xff]  }
 0x3b8   :  { %1649 = vmatprep.subr.bf16.mxu0 %v4527_v23  ;;  %1690 = vmatprep.subr.bf16.mxu1 %v4530_v24  ;;  %5923 = vst [vmem:[#allocation45_spill] sm:$0xff] %v4539_v21  ;;  %5924 = vst [vmem:[#allocation46_spill] sm:$0xff] %v4542_v22  ;;  %v4545_v23 = vld [vmem:[#allocation3 + $0x220] ss:$16 sps:$4 sm:$0xff]   ;;  %v4548_v24 = vld [vmem:[#allocation3 + $0x228] ss:$16 sps:$4 sm:$0xff]  }
 0x3b9   :  { %5925 = vst [vmem:[#allocation47_spill] sm:$0xff] %v4545_v23  ;;  %5926 = vst [vmem:[#allocation48_spill] sm:$0xff] %v4548_v24 }
 0x3bb   :  { %1650 = vmatpush1.bf16.msra.mxu0 %v4533_v25  ;;  %1691 = vmatpush1.bf16.msra.mxu1 %v4536_v20  ;;  %v4551_v25 = vld [vmem:[#allocation3 + $0x244] ss:$16 sps:$4 sm:$0xff]   ;;  %v4554_v20 = vld [vmem:[#allocation3 + $0x24c] ss:$16 sps:$4 sm:$0xff]  }
 0x3bc   :  { %1651 = vmatprep.subr.bf16.mxu0 %v4539_v21  ;;  %1692 = vmatprep.subr.bf16.mxu1 %v4542_v22  ;;  %5927 = vst [vmem:[#allocation49_spill] sm:$0xff] %v4551_v25  ;;  %5928 = vst [vmem:[#allocation50_spill] sm:$0xff] %v4554_v20  ;;  %v4557_v21 = vld [vmem:[#allocation3 + $0x240] ss:$16 sps:$4 sm:$0xff]   ;;  %v4560_v22 = vld [vmem:[#allocation3 + $0x248] ss:$16 sps:$4 sm:$0xff]  }
 0x3bd   :  { %5929 = vst [vmem:[#allocation51_spill] sm:$0xff] %v4557_v21  ;;  %5930 = vst [vmem:[#allocation52_spill] sm:$0xff] %v4560_v22 }
 0x3bf   :  { %1652 = vmatpush1.bf16.msra.mxu0 %v4545_v23  ;;  %1693 = vmatpush1.bf16.msra.mxu1 %v4548_v24  ;;  %v4563_v23 = vld [vmem:[#allocation3 + $0x264] ss:$16 sps:$4 sm:$0xff]   ;;  %v4566_v24 = vld [vmem:[#allocation3 + $0x26c] ss:$16 sps:$4 sm:$0xff]  }
 0x3c0   :  { %1653 = vmatprep.subr.bf16.mxu0 %v4551_v25  ;;  %1694 = vmatprep.subr.bf16.mxu1 %v4554_v20  ;;  %5931 = vst [vmem:[#allocation53_spill] sm:$0xff] %v4563_v23  ;;  %5932 = vst [vmem:[#allocation54_spill] sm:$0xff] %v4566_v24  ;;  %v4569_v25 = vld [vmem:[#allocation3 + $0x260] ss:$16 sps:$4 sm:$0xff]   ;;  %v4572_v20 = vld [vmem:[#allocation3 + $0x268] ss:$16 sps:$4 sm:$0xff]  }
 0x3c1   :  { %5933 = vst [vmem:[#allocation55_spill] sm:$0xff] %v4569_v25  ;;  %5934 = vst [vmem:[#allocation56_spill] sm:$0xff] %v4572_v20 }
 0x3c3   :  { %1654 = vmatpush1.bf16.msra.mxu0 %v4557_v21  ;;  %1695 = vmatpush1.bf16.msra.mxu1 %v4560_v22  ;;  %v4575_v21 = vld [vmem:[#allocation3 + $0x284] ss:$16 sps:$4 sm:$0xff]   ;;  %v4578_v22 = vld [vmem:[#allocation3 + $0x28c] ss:$16 sps:$4 sm:$0xff]  }
 0x3c4   :  { %1655 = vmatprep.subr.bf16.mxu0 %v4563_v23  ;;  %1696 = vmatprep.subr.bf16.mxu1 %v4566_v24  ;;  %5935 = vst [vmem:[#allocation57_spill] sm:$0xff] %v4575_v21  ;;  %5936 = vst [vmem:[#allocation58_spill] sm:$0xff] %v4578_v22  ;;  %v4581_v23 = vld [vmem:[#allocation3 + $0x280] ss:$16 sps:$4 sm:$0xff]   ;;  %v4584_v24 = vld [vmem:[#allocation3 + $0x288] ss:$16 sps:$4 sm:$0xff]  }
 0x3c5   :  { %5937 = vst [vmem:[#allocation59_spill] sm:$0xff] %v4581_v23  ;;  %5938 = vst [vmem:[#allocation60_spill] sm:$0xff] %v4584_v24 }
 0x3c7   :  { %1656 = vmatpush1.bf16.msra.mxu0 %v4569_v25  ;;  %1697 = vmatpush1.bf16.msra.mxu1 %v4572_v20  ;;  %v4587_v25 = vld [vmem:[#allocation3 + $0x2a4] ss:$16 sps:$4 sm:$0xff]   ;;  %v4590_v20 = vld [vmem:[#allocation3 + $0x2ac] ss:$16 sps:$4 sm:$0xff]  }
 0x3c8   :  { %1657 = vmatprep.subr.bf16.mxu0 %v4575_v21  ;;  %1698 = vmatprep.subr.bf16.mxu1 %v4578_v22  ;;  %5939 = vst [vmem:[#allocation61_spill] sm:$0xff] %v4587_v25  ;;  %5940 = vst [vmem:[#allocation62_spill] sm:$0xff] %v4590_v20  ;;  %v4593_v21 = vld [vmem:[#allocation3 + $0x2a0] ss:$16 sps:$4 sm:$0xff]   ;;  %v4596_v22 = vld [vmem:[#allocation3 + $0x2a8] ss:$16 sps:$4 sm:$0xff]  }
 0x3c9   :  { %5941 = vst [vmem:[#allocation63_spill] sm:$0xff] %v4593_v21  ;;  %5942 = vst [vmem:[#allocation64_spill] sm:$0xff] %v4596_v22 }
 0x3cb   :  { %1658 = vmatpush1.bf16.msra.mxu0 %v4581_v23  ;;  %1699 = vmatpush1.bf16.msra.mxu1 %v4584_v24  ;;  %v4599_v23 = vld [vmem:[#allocation3 + $0x2c4] ss:$16 sps:$4 sm:$0xff]   ;;  %v4602_v24 = vld [vmem:[#allocation3 + $0x2cc] ss:$16 sps:$4 sm:$0xff]  }
 0x3cc   :  { %1659 = vmatprep.subr.bf16.mxu0 %v4587_v25  ;;  %1700 = vmatprep.subr.bf16.mxu1 %v4590_v20  ;;  %5943 = vst [vmem:[#allocation65_spill] sm:$0xff] %v4599_v23  ;;  %5944 = vst [vmem:[#allocation66_spill] sm:$0xff] %v4602_v24  ;;  %v4605_v25 = vld [vmem:[#allocation3 + $0x2c0] ss:$16 sps:$4 sm:$0xff]   ;;  %v4608_v20 = vld [vmem:[#allocation3 + $0x2c8] ss:$16 sps:$4 sm:$0xff]  }
 0x3cd   :  { %5945 = vst [vmem:[#allocation12_spill] sm:$0xff] %v4605_v25  ;;  %5946 = vst [vmem:[#allocation13_spill] sm:$0xff] %v4608_v20 }
 0x3cf   :  { %1660 = vmatpush1.bf16.msra.mxu0 %v4593_v21  ;;  %1701 = vmatpush1.bf16.msra.mxu1 %v4596_v22  ;;  %v4611_v21 = vld [vmem:[#allocation3 + $0x2e4] ss:$16 sps:$4 sm:$0xff]   ;;  %v4614_v22 = vld [vmem:[#allocation3 + $0x2ec] ss:$16 sps:$4 sm:$0xff]  }
 0x3d0   :  { %1661 = vmatprep.subr.bf16.mxu0 %v4599_v23  ;;  %1702 = vmatprep.subr.bf16.mxu1 %v4602_v24  ;;  %5947 = vst [vmem:[#allocation18_spill] sm:$0xff] %v4611_v21  ;;  %5948 = vst [vmem:[#allocation72_spill] sm:$0xff] %v4614_v22  ;;  %v4617_v23 = vld [vmem:[#allocation3 + $0x2e0] ss:$16 sps:$4 sm:$0xff]   ;;  %v4620_v24 = vld [vmem:[#allocation3 + $0x2e8] ss:$16 sps:$4 sm:$0xff]  }
 0x3d1   :  { %5949 = vst [vmem:[#allocation73_spill] sm:$0xff] %v4617_v23  ;;  %5950 = vst [vmem:[#allocation74_spill] sm:$0xff] %v4620_v24 }
 0x3d3   :  { %1662 = vmatpush1.bf16.msra.mxu0 %v4605_v25  ;;  %1703 = vmatpush1.bf16.msra.mxu1 %v4608_v20  ;;  %v4623_v25 = vld [vmem:[#allocation3 + $0x304] ss:$16 sps:$4 sm:$0xff]   ;;  %v4626_v20 = vld [vmem:[#allocation3 + $0x30c] ss:$16 sps:$4 sm:$0xff]  }
 0x3d4   :  { %1663 = vmatprep.subr.bf16.mxu0 %v4611_v21  ;;  %1704 = vmatprep.subr.bf16.mxu1 %v4614_v22  ;;  %5951 = vst [vmem:[#allocation75_spill] sm:$0xff] %v4623_v25  ;;  %5952 = vst [vmem:[#allocation19_spill] sm:$0xff] %v4626_v20  ;;  %v4629_v21 = vld [vmem:[#allocation3 + $0x300] ss:$16 sps:$4 sm:$0xff]   ;;  %v4632_v22 = vld [vmem:[#allocation3 + $0x308] ss:$16 sps:$4 sm:$0xff]  }
 0x3d5   :  { %5953 = vst [vmem:[#allocation20_spill] sm:$0xff] %v4629_v21  ;;  %5954 = vst [vmem:[#allocation21_spill] sm:$0xff] %v4632_v22 }
 0x3d7   :  { %1664 = vmatpush1.bf16.msra.mxu0 %v4617_v23  ;;  %1705 = vmatpush1.bf16.msra.mxu1 %v4620_v24 }
 0x3d8   :  { %1665 = vmatprep.subr.bf16.mxu0 %v4623_v25  ;;  %1706 = vmatprep.subr.bf16.mxu1 %v4626_v20 }
 0x3db   :  { %1666 = vmatpush1.bf16.msra.mxu0 %v4629_v21  ;;  %1707 = vmatpush1.bf16.msra.mxu1 %v4632_v22 }
 0x3dc   :  { %1739 = vmatprep.subr.bf16.mxu0 %v5881_v30  ;;  %1780 = vmatprep.subr.bf16.mxu1 %v5882_v32 }
 0x451   :  { %v1459_v24 = vpop.f32.mrb[36].mxu0  ;;  %v1500_v23 = vpop.f32.mrb[36].mxu1 }
 0x452   :  { %v1460_v25 = vadd.f32 %v1459_v24, %v5883_v35  ;;  %v1461_v14 = vpop.f32.mrb[37].mxu0  ;;  %v1502_v13 = vpop.f32.mrb[37].mxu1  ;;  %v1501_v30 = vadd.f32 %v1500_v23, %v5886_v50 }
 0x453   :  { %v1462_v20 = vadd.f32 %v1461_v14, %v5884_v41  ;;  %v1463_v12 = vpop.f32.mrb[38].mxu0  ;;  %v1504_v11 = vpop.f32.mrb[38].mxu1  ;;  %v1503_v22 = vadd.f32 %v1502_v13, %v5885_v5 }
 0x454   :  { %v1507_v10 = vmul.f32 0.5, %v1460_v25  ;;  %v1464_v21 = vpop.f32.mrb[39].mxu0  ;;  %v1505_v57 = vpop.f32.mrb[39].mxu1  ;;  %v1509_v32 = vmul.f32 0.5, %v1501_v30 }
 0x455   :  { %v1508_v56 = vmul.f32 0.5, %v1462_v20 }
 0x456   :  { %3225 = vtanh.f32 %v1507_v10 }
 0x457   :  { %3227 = vtanh.f32 %v1508_v56 }
 0x458   :  { %3229 = vtanh.f32 %v1503_v22  ;;  %v5956_v22 = vld [vmem:[#allocation76_spill] sm:$0xff] }
 0x459   :  { %3231 = vtanh.f32 %v1509_v32 }
 0x460   :  { %v3226_v55 = vpop.eup %3225 }
 0x461   :  { %v1513_v24 = vmul.f32 0.5, %v3226_v55  ;;  %v3228_v35 = vpop.eup %3227  ;;  %v5957_v55 = vld [vmem:[#allocation77_spill] sm:$0xff] }
 0x462   :  { %v1514_v14 = vmul.f32 0.5, %v3228_v35  ;;  %v3230_v12 = vpop.eup %3229  ;;  %v5958_v35 = vld [vmem:[#allocation78_spill] sm:$0xff] }
 0x463   :  { %v1516_v54 = vadd.f32 0.5, %v1513_v24  ;;  %v3232_v56 = vpop.eup %3231 }
 0x464   :  { %v1517_v11 = vadd.f32 0.5, %v1514_v14  ;;  %v1515_v10 = vmul.f32 0.5, %v3232_v56  ;;  %v5959_v14 = vld [vmem:[#allocation79_spill] sm:$0xff] }
 0x465   :  { %v1521_v25 = vmul.f32 %v3230_v12, %v1516_v54 }
 0x466   :  { %v1520_v57 = vmul.f32 %v1517_v11, %v4400_v15  ;;  %v1518_v11 = vadd.f32 0.5, %v1515_v10 }
 0x468   :  { %v4642_v20 = vadd.f32 %v1521_v25, %v1520_v57 }
 0x46a   :  { %5955 = vst [vmem:[#allocation22_spill] sm:$0xff] %v4642_v20  ;;  %3233 = vtanh.f32 %v4642_v20 }
 0x471   :  { %v1563_v13 = vpop.f32.mrb[40].mxu0  ;;  %v1604_v21 = vpop.f32.mrb[40].mxu1 }
 0x472   :  { %v1611_v23 = vadd.f32 %v1563_v13, %v5956_v22  ;;  %v1613_v30 = vadd.f32 %v1604_v21, %v5957_v55  ;;  %v1565_v24 = vpop.f32.mrb[41].mxu0  ;;  %v1606_v32 = vpop.f32.mrb[41].mxu1 }
 0x473   :  { %v1612_v50 = vadd.f32 %v1565_v24, %v5958_v35  ;;  %v1614_v54 = vadd.f32 %v1606_v32, %v5959_v14  ;;  %v1567_v12 = vpop.f32.mrb[42].mxu0  ;;  %v1608_v15 = vpop.f32.mrb[42].mxu1 }
 0x474   :  { %v1615_v25 = vmul.f32 0.5, %v1611_v23  ;;  %v1568_v57 = vpop.f32.mrb[43].mxu0  ;;  %v1609_v20 = vpop.f32.mrb[43].mxu1  ;;  %v1617_v21 = vmul.f32 0.5, %v1613_v30 }
 0x475   :  { %v3234_v5 = vpop.eup %3233  ;;  %v1616_v56 = vmul.f32 0.5, %v1612_v50  ;;  %v5993_v57 = vld [vmem:[#allocation56_spill] sm:$0xff] }
 0x476   :  { %3235 = vtanh.f32 %v1615_v25  ;;  %v1524_v41 = vmul.f32 %v3234_v5, %v1518_v11  ;;  %v5991_v11 = vld [vmem:[#allocation54_spill] sm:$0xff]  ;;  %v5992_v25 = vld [vmem:[#allocation55_spill] sm:$0xff] }
 0x477   :  { %3237 = vtanh.f32 %v1616_v56  ;;  %v5994_v56 = vld [vmem:[#allocation57_spill] sm:$0xff] }
 0x478   :  { %v1634_v13 = vpack.c.bf16 %v1524_v41, %v1524_v41  ;;  %3239 = vtanh.f32 %v1614_v54 }
 0x479   :  { %3241 = vtanh.f32 %v1617_v21  ;;  %v5996_v21 = vld [vmem:[#allocation59_spill] sm:$0xff] }
 0x47a   :  { %1667 = vmatprep.mubr.bf16.mxu0 %v1634_v13  ;;  %1708 = vmatprep.mubr.bf16.mxu1 %v1634_v13  ;;  %v5995_v13 = vld [vmem:[#allocation58_spill] sm:$0xff] }
 0x480   :  { %v3236_v22 = vpop.eup %3235 }
 0x481   :  { %v1621_v55 = vmul.f32 0.5, %v3236_v22  ;;  %v3238_v24 = vpop.eup %3237  ;;  %v5997_v22 = vld [vmem:[#allocation60_spill] sm:$0xff] }
 0x482   :  { %v1622_v35 = vmul.f32 0.5, %v3238_v24  ;;  %v3240_v10 = vpop.eup %3239  ;;  %v5999_v24 = vld [vmem:[#allocation62_spill] sm:$0xff] }
 0x483   :  { %v1624_v32 = vadd.f32 0.5, %v1621_v55  ;;  %v3242_v41 = vpop.eup %3241  ;;  %v5998_v55 = vld [vmem:[#allocation61_spill] sm:$0xff] }
 0x484   :  { %v1625_v23 = vadd.f32 0.5, %v1622_v35  ;;  %v1623_v5 = vmul.f32 0.5, %v3242_v41  ;;  %v6001_v35 = vld [vmem:[#allocation64_spill] sm:$0xff]  ;;  %v6006_v41 = vld [vmem:[#allocation18_spill] sm:$0xff] }
 0x485   :  { %v1629_v14 = vmul.f32 %v3240_v10, %v1624_v32  ;;  %v6000_v32 = vld [vmem:[#allocation63_spill] sm:$0xff]  ;;  %v6002_v10 = vld [vmem:[#allocation65_spill] sm:$0xff] }
 0x486   :  { %v1628_v20 = vmul.f32 %v1625_v23, %v4408_v18  ;;  %v1626_v54 = vadd.f32 0.5, %v1623_v5  ;;  %v5981_v18 = vld [vmem:[#allocation44_spill] sm:$0xff]  ;;  %v6003_v23 = vld [vmem:[#allocation66_spill] sm:$0xff] }
 0x487   :  { %v6007_v5 = vld [vmem:[#allocation72_spill] sm:$0xff] }
 0x488   :  { %v4650_v50 = vadd.f32 %v1629_v14, %v1628_v20  ;;  %v6004_v14 = vld [vmem:[#allocation12_spill] sm:$0xff]  ;;  %v6005_v20 = vld [vmem:[#allocation13_spill] sm:$0xff] }
 0x48a   :  { %3243 = vtanh.f32 %v4650_v50 }
 0x494   :  { %v3244_v12 = vpop.eup %3243 }
 0x495   :  { %v1632_v30 = vmul.f32 %v3244_v12, %v1626_v54  ;;  %v6008_v54 = vld [vmem:[#allocation73_spill] sm:$0xff]  ;;  %v6009_v12 = vld [vmem:[#allocation74_spill] sm:$0xff] }
 0x497   :  { %v1633_v15 = vpack.c.bf16 %v1632_v30, %v1632_v30  ;;  %v6010_v30 = vld [vmem:[#allocation75_spill] sm:$0xff] }
 0x499   :  { %1668 = vmatmul.mubr.bf16.vlgmr.msra.gmra.mrb[44].mxu0 %v1633_v15  ;;  %1709 = vmatmul.mubr.bf16.vlgmr.msra.gmra.mrb[44].mxu1 %v1633_v15 }
 0x49a   :  { %1740 = vmatpush1.bf16.msra.mxu0 %v4235_v8  ;;  %1781 = vmatpush1.bf16.msra.mxu1 %v4238_v31  ;;  %v5960_v8 = vld [vmem:[#allocation28_spill] sm:$0xff]  ;;  %v5961_v31 = vld [vmem:[#allocation29_spill] sm:$0xff] }
 0x49b   :  { %1741 = vmatprep.subr.bf16.mxu0 %v4241_v61  ;;  %1782 = vmatprep.subr.bf16.mxu1 %v4244_v59  ;;  %v5962_v61 = vld [vmem:[#allocation30_spill] sm:$0xff]  ;;  %v5963_v59 = vld [vmem:[#allocation31_spill] sm:$0xff] }
 0x49c   :  { %1771 = vmatprep.mubr.bf16.mxu0 %v5776_v2  ;;  %1812 = vmatprep.mubr.bf16.mxu1 %v5776_v2 }
 0x49e   :  { %1742 = vmatpush1.bf16.msra.mxu0 %v4249_v38  ;;  %1783 = vmatpush1.bf16.msra.mxu1 %v4252_v63  ;;  %v5964_v38 = vld [vmem:[#allocation32_spill] sm:$0xff]  ;;  %v5965_v63 = vld [vmem:[#allocation33_spill] sm:$0xff] }
 0x49f   :  { %1743 = vmatprep.subr.bf16.mxu0 %v4255_v58  ;;  %1784 = vmatprep.subr.bf16.mxu1 %v4258_v60  ;;  %v5966_v58 = vld [vmem:[#allocation34_spill] sm:$0xff]  ;;  %v5967_v60 = vld [vmem:[#allocation35_spill] sm:$0xff] }
 0x4a2   :  { %1744 = vmatpush1.bf16.msra.mxu0 %v4261_v16  ;;  %1785 = vmatpush1.bf16.msra.mxu1 %v4264_v39  ;;  %v5968_v16 = vld [vmem:[#allocation36_spill] sm:$0xff]  ;;  %v5969_v39 = vld [vmem:[#allocation37_spill] sm:$0xff] }
 0x4a3   :  { %1745 = vmatprep.subr.bf16.mxu0 %v4267_v26  ;;  %1786 = vmatprep.subr.bf16.mxu1 %v4270_v62  ;;  %v5970_v26 = vld [vmem:[#allocation38_spill] sm:$0xff]  ;;  %v5971_v62 = vld [vmem:[#allocation39_spill] sm:$0xff] }
 0x4a6   :  { %1746 = vmatpush1.bf16.msra.mxu0 %v4273_v17  ;;  %1787 = vmatpush1.bf16.msra.mxu1 %v4276_v9  ;;  %v5972_v17 = vld [vmem:[#allocation40_spill] sm:$0xff]  ;;  %v5973_v9 = vld [vmem:[#allocation41_spill] sm:$0xff] }
 0x4a7   :  { %1747 = vmatprep.subr.bf16.mxu0 %v4279_v27  ;;  %1788 = vmatprep.subr.bf16.mxu1 %v5892_v19  ;;  %v5974_v27 = vld [vmem:[#allocation42_spill] sm:$0xff]  ;;  %v5982_v19 = vld [vmem:[#allocation45_spill] sm:$0xff] }
 0x4aa   :  { %1748 = vmatpush1.bf16.msra.mxu0 %v5893_v28  ;;  %1789 = vmatpush1.bf16.msra.mxu1 %v5894_v29  ;;  %v5983_v28 = vld [vmem:[#allocation46_spill] sm:$0xff]  ;;  %v5984_v29 = vld [vmem:[#allocation47_spill] sm:$0xff] }
 0x4ab   :  { %1749 = vmatprep.subr.bf16.mxu0 %v5895_v33  ;;  %1790 = vmatprep.subr.bf16.mxu1 %v5896_v34  ;;  %v5985_v33 = vld [vmem:[#allocation48_spill] sm:$0xff]  ;;  %v5986_v34 = vld [vmem:[#allocation49_spill] sm:$0xff] }
 0x4ae   :  { %1750 = vmatpush1.bf16.msra.mxu0 %v5897_v36  ;;  %1791 = vmatpush1.bf16.msra.mxu1 %v5898_v37  ;;  %v5987_v36 = vld [vmem:[#allocation50_spill] sm:$0xff]  ;;  %v5988_v37 = vld [vmem:[#allocation51_spill] sm:$0xff] }
 0x4af   :  { %1751 = vmatprep.subr.bf16.mxu0 %v5899_v40  ;;  %1792 = vmatprep.subr.bf16.mxu1 %v5900_v42  ;;  %v5989_v40 = vld [vmem:[#allocation52_spill] sm:$0xff]  ;;  %v5990_v42 = vld [vmem:[#allocation53_spill] sm:$0xff] }
 0x4b2   :  { %1752 = vmatpush1.bf16.msra.mxu0 %v4309_v43  ;;  %1793 = vmatpush1.bf16.msra.mxu1 %v4312_v6  ;;  %v5978_v43 = vld [vmem:[#allocation70_spill] sm:$0xff]  ;;  %v5979_v6 = vld [vmem:[#allocation71_spill] sm:$0xff] }
 0x4b3   :  { %1753 = vmatprep.subr.bf16.mxu0 %v4315_v3  ;;  %1794 = vmatprep.subr.bf16.mxu1 %v4318_v7  ;;  %v5975_v7 = vld [vmem:[#allocation67_spill] sm:$0xff] }
 0x4b4   :  { %v5980_v3 = vld [vmem:[#allocation43_spill] sm:$0xff] }
 0x4b6   :  { %1754 = vmatpush1.bf16.msra.mxu0 %v4321_v4  ;;  %1795 = vmatpush1.bf16.msra.mxu1 %v4324_v1  ;;  %v5976_v4 = vld [vmem:[#allocation68_spill] sm:$0xff]  ;;  %v5977_v1 = vld [vmem:[#allocation69_spill] sm:$0xff] }
 0x4b7   :  { %1845 = vmatprep.subr.bf16.mxu0 %v4443_v44  ;;  %1886 = vmatprep.subr.bf16.mxu1 %v4446_v45 }
 0x4b9   :  { %1772 = vmatmul.mubr.bf16.vlgmr.msra.gmra.mrb[48].mxu0 %v1633_v15  ;;  %1813 = vmatmul.mubr.bf16.vlgmr.msra.gmra.mrb[48].mxu1 %v1633_v15  ;;  %v6011_v15 = vld [vmem:[#allocation19_spill] sm:$0xff] }
 0x4ba   :  { %1846 = vmatpush1.bf16.msra.mxu0 %v4449_v46  ;;  %1887 = vmatpush1.bf16.msra.mxu1 %v4452_v47 }
 0x4bb   :  { %1847 = vmatprep.subr.bf16.mxu0 %v4455_v48  ;;  %1888 = vmatprep.subr.bf16.mxu1 %v4458_v0 }
 0x4be   :  { %1848 = vmatpush1.bf16.msra.mxu0 %v4461_v49  ;;  %1889 = vmatpush1.bf16.msra.mxu1 %v4464_v51 }
 0x4bf   :  { %1849 = vmatprep.subr.bf16.mxu0 %v4467_v52  ;;  %1890 = vmatprep.subr.bf16.mxu1 %v4470_v53 }
 0x4c2   :  { %1850 = vmatpush1.bf16.msra.mxu0 %v5960_v8  ;;  %1891 = vmatpush1.bf16.msra.mxu1 %v5961_v31 }
 0x4c3   :  { %1851 = vmatprep.subr.bf16.mxu0 %v5962_v61  ;;  %1892 = vmatprep.subr.bf16.mxu1 %v5963_v59 }
 0x4c6   :  { %1852 = vmatpush1.bf16.msra.mxu0 %v5964_v38  ;;  %1893 = vmatpush1.bf16.msra.mxu1 %v5965_v63 }
 0x4c7   :  { %1853 = vmatprep.subr.bf16.mxu0 %v5966_v58  ;;  %1894 = vmatprep.subr.bf16.mxu1 %v5967_v60 }
 0x4ca   :  { %1854 = vmatpush1.bf16.msra.mxu0 %v5968_v16  ;;  %1895 = vmatpush1.bf16.msra.mxu1 %v5969_v39 }
 0x4cb   :  { %1855 = vmatprep.subr.bf16.mxu0 %v5970_v26  ;;  %1896 = vmatprep.subr.bf16.mxu1 %v5971_v62 }
 0x4ce   :  { %1856 = vmatpush1.bf16.msra.mxu0 %v5972_v17  ;;  %1897 = vmatpush1.bf16.msra.mxu1 %v5973_v9 }
 0x4cf   :  { %1857 = vmatprep.subr.bf16.mxu0 %v5974_v27  ;;  %1898 = vmatprep.subr.bf16.mxu1 %v5975_v7 }
 0x4d2   :  { %1858 = vmatpush1.bf16.msra.mxu0 %v5976_v4  ;;  %1899 = vmatpush1.bf16.msra.mxu1 %v5977_v1 }
 0x4d3   :  { %1859 = vmatprep.subr.bf16.mxu0 %v5978_v43  ;;  %1900 = vmatprep.subr.bf16.mxu1 %v5979_v6 }
 0x4d6   :  { %1860 = vmatpush1.bf16.msra.mxu0 %v5980_v3  ;;  %1901 = vmatpush1.bf16.msra.mxu1 %v5981_v18 }
 0x4d7   :  { %1861 = vmatprep.subr.bf16.mxu0 %v5982_v19  ;;  %1902 = vmatprep.subr.bf16.mxu1 %v5983_v28 }
 0x4da   :  { %1862 = vmatpush1.bf16.msra.mxu0 %v5984_v29  ;;  %1903 = vmatpush1.bf16.msra.mxu1 %v5985_v33 }
 0x4db   :  { %1863 = vmatprep.subr.bf16.mxu0 %v5986_v34  ;;  %1904 = vmatprep.subr.bf16.mxu1 %v5987_v36 }
 0x4de   :  { %1864 = vmatpush1.bf16.msra.mxu0 %v5988_v37  ;;  %1905 = vmatpush1.bf16.msra.mxu1 %v5989_v40 }
 0x4df   :  { %1865 = vmatprep.subr.bf16.mxu0 %v5990_v42  ;;  %1906 = vmatprep.subr.bf16.mxu1 %v5991_v11 }
 0x4e2   :  { %1866 = vmatpush1.bf16.msra.mxu0 %v5992_v25  ;;  %1907 = vmatpush1.bf16.msra.mxu1 %v5993_v57 }
 0x4e3   :  { %1867 = vmatprep.subr.bf16.mxu0 %v5994_v56  ;;  %1908 = vmatprep.subr.bf16.mxu1 %v5995_v13 }
 0x4e6   :  { %1868 = vmatpush1.bf16.msra.mxu0 %v5996_v21  ;;  %1909 = vmatpush1.bf16.msra.mxu1 %v5997_v22 }
 0x4e7   :  { %1869 = vmatprep.subr.bf16.mxu0 %v5998_v55  ;;  %1910 = vmatprep.subr.bf16.mxu1 %v5999_v24 }
 0x4ea   :  { %1870 = vmatpush1.bf16.msra.mxu0 %v6000_v32  ;;  %1911 = vmatpush1.bf16.msra.mxu1 %v6001_v35  ;;  %v6012_v35 = vld [vmem:[#allocation20_spill] sm:$0xff]  ;;  %v6017_v32 = vld [vmem:[#allocation15_spill] sm:$0xff] }
 0x4eb   :  { %1871 = vmatprep.subr.bf16.mxu0 %v6002_v10  ;;  %1912 = vmatprep.subr.bf16.mxu1 %v6003_v23  ;;  %v6013_v10 = vld [vmem:[#allocation21_spill] sm:$0xff] }
 0x4ec   :  { %v4749_v23 = vld [vmem:[#allocation3 + $0x24] ss:$16 sps:$4 sm:$0xff]  }
 0x4ed   :  { %6014 = vst [vmem:[#allocation23_spill] sm:$0xff] %v4749_v23 }
 0x4ee   :  { %1872 = vmatpush1.bf16.msra.mxu0 %v6004_v14  ;;  %1913 = vmatpush1.bf16.msra.mxu1 %v6005_v20  ;;  %v4752_v20 = vld [vmem:[#allocation3 + $0x2c] ss:$16 sps:$4 sm:$0xff]  }
 0x4ef   :  { %1873 = vmatprep.subr.bf16.mxu0 %v6006_v41  ;;  %1914 = vmatprep.subr.bf16.mxu1 %v6007_v5  ;;  %6015 = vst [vmem:[#allocation24_spill] sm:$0xff] %v4752_v20  ;;  %v6016_v41 = vld [vmem:[#allocation14_spill] sm:$0xff] }
 0x4f2   :  { %1874 = vmatpush1.bf16.msra.mxu0 %v6008_v54  ;;  %1915 = vmatpush1.bf16.msra.mxu1 %v6009_v12 }
 0x4f3   :  { %1875 = vmatprep.subr.bf16.mxu0 %v6010_v30  ;;  %1916 = vmatprep.subr.bf16.mxu1 %v6011_v15 }
 0x4f6   :  { %1876 = vmatpush1.bf16.msra.mxu0 %v6012_v35  ;;  %1917 = vmatpush1.bf16.msra.mxu1 %v6013_v10 }
 0x4f7   :  { %1949 = vmatprep.subr.bf16.mxu0 %v4749_v23  ;;  %1990 = vmatprep.subr.bf16.mxu1 %v4752_v20  ;;  %v6018_v23 = vld [vmem:[#allocation16_spill] sm:$0xff]  ;;  %v6019_v20 = vld [vmem:[#allocation17_spill] sm:$0xff] }
 0x56c   :  { %v1669_v5 = vpop.f32.mrb[44].mxu0  ;;  %v1710_v54 = vpop.f32.mrb[44].mxu1 }
 0x56d   :  { %v1670_v12 = vadd.f32 %v1669_v5, %v6016_v41  ;;  %v1671_v14 = vpop.f32.mrb[45].mxu0  ;;  %v1712_v30 = vpop.f32.mrb[45].mxu1  ;;  %v1711_v56 = vadd.f32 %v1710_v54, %v6019_v20 }
 0x56e   :  { %v1672_v15 = vadd.f32 %v1671_v14, %v6017_v32  ;;  %v1673_v24 = vpop.f32.mrb[46].mxu0  ;;  %v1714_v35 = vpop.f32.mrb[46].mxu1  ;;  %v1713_v13 = vadd.f32 %v1712_v30, %v6018_v23 }
 0x56f   :  { %v1717_v55 = vmul.f32 0.5, %v1670_v12  ;;  %v1674_v10 = vpop.f32.mrb[47].mxu0  ;;  %v1715_v22 = vpop.f32.mrb[47].mxu1  ;;  %v1719_v57 = vmul.f32 0.5, %v1711_v56  ;;  %v6022_v56 = vld [vmem:[#allocation80_spill] sm:$0xff] }
 0x570   :  { %v1718_v21 = vmul.f32 0.5, %v1672_v15  ;;  %v6020_v10 = vld [vmem:[#allocation22_spill] sm:$0xff] }
 0x571   :  { %3245 = vtanh.f32 %v1717_v55 }
 0x572   :  { %3247 = vtanh.f32 %v1718_v21 }
 0x573   :  { %3249 = vtanh.f32 %v1713_v13 }
 0x574   :  { %3251 = vtanh.f32 %v1719_v57 }
 0x57b   :  { %v3246_v25 = vpop.eup %3245 }
 0x57c   :  { %v1723_v5 = vmul.f32 0.5, %v3246_v25  ;;  %v3248_v41 = vpop.eup %3247  ;;  %v6023_v25 = vld [vmem:[#allocation81_spill] sm:$0xff] }
 0x57d   :  { %v1724_v14 = vmul.f32 0.5, %v3248_v41  ;;  %v3250_v24 = vpop.eup %3249  ;;  %v6024_v41 = vld [vmem:[#allocation82_spill] sm:$0xff] }
 0x57e   :  { %v1726_v11 = vadd.f32 0.5, %v1723_v5  ;;  %v3252_v21 = vpop.eup %3251 }
 0x57f   :  { %v1727_v35 = vadd.f32 0.5, %v1724_v14  ;;  %v1725_v13 = vmul.f32 0.5, %v3252_v21  ;;  %v6025_v14 = vld [vmem:[#allocation83_spill] sm:$0xff] }
 0x580   :  { %v1731_v12 = vmul.f32 %v3250_v24, %v1726_v11 }
 0x581   :  { %v1730_v22 = vmul.f32 %v1727_v35, %v6020_v10 }
 0x583   :  { %v4760_v15 = vadd.f32 %v1731_v12, %v1730_v22  ;;  %v1728_v12 = vadd.f32 0.5, %v1725_v13 }
 0x585   :  { %6021 = vst [vmem:[#allocation25_spill] sm:$0xff] %v4760_v15  ;;  %3253 = vtanh.f32 %v4760_v15 }
 0x58c   :  { %v1773_v55 = vpop.f32.mrb[48].mxu0  ;;  %v1814_v54 = vpop.f32.mrb[48].mxu1 }
 0x58d   :  { %v1821_v30 = vadd.f32 %v1773_v55, %v6022_v56  ;;  %v1823_v20 = vadd.f32 %v1814_v54, %v6023_v25  ;;  %v1775_v5 = vpop.f32.mrb[49].mxu0  ;;  %v1816_v57 = vpop.f32.mrb[49].mxu1 }
 0x58e   :  { %v1822_v23 = vadd.f32 %v1775_v5, %v6024_v41  ;;  %v1824_v11 = vadd.f32 %v1816_v57, %v6025_v14  ;;  %v1777_v24 = vpop.f32.mrb[50].mxu0  ;;  %v1818_v35 = vpop.f32.mrb[50].mxu1 }
 0x58f   :  { %v1825_v10 = vmul.f32 0.5, %v1821_v30  ;;  %v1778_v22 = vpop.f32.mrb[51].mxu0  ;;  %v1819_v15 = vpop.f32.mrb[51].mxu1  ;;  %v1827_v54 = vmul.f32 0.5, %v1823_v20 }
 0x590   :  { %v3254_v32 = vpop.eup %3253  ;;  %v1826_v21 = vmul.f32 0.5, %v1822_v23  ;;  %v4784_v22 = vld [vmem:[#allocation3 + $0x4c] ss:$16 sps:$4 sm:$0xff]  }
 0x591   :  { %3255 = vtanh.f32 %v1825_v10  ;;  %v1734_v42 = vmul.f32 %v3254_v32, %v1728_v12  ;;  %v4775_v12 = vld [vmem:[#allocation3 + $0x20] ss:$16 sps:$4 sm:$0xff]   ;;  %v4781_v10 = vld [vmem:[#allocation3 + $0x44] ss:$16 sps:$4 sm:$0xff]  }
 0x592   :  { %3257 = vtanh.f32 %v1826_v21  ;;  %v4789_v21 = vld [vmem:[#allocation3 + $0x40] ss:$16 sps:$4 sm:$0xff]  }
 0x593   :  { %v1844_v55 = vpack.c.bf16 %v1734_v42, %v1734_v42  ;;  %3259 = vtanh.f32 %v1824_v11 }
 0x594   :  { %3261 = vtanh.f32 %v1827_v54  ;;  %v4795_v54 = vld [vmem:[#allocation3 + $0x64] ss:$16 sps:$4 sm:$0xff]  }
 0x595   :  { %1877 = vmatprep.mubr.bf16.mxu0 %v1844_v55  ;;  %1918 = vmatprep.mubr.bf16.mxu1 %v1844_v55  ;;  %v4792_v55 = vld [vmem:[#allocation3 + $0x48] ss:$16 sps:$4 sm:$0xff]  }
 0x59b   :  { %v3256_v56 = vpop.eup %3255 }
 0x59c   :  { %v1831_v25 = vmul.f32 0.5, %v3256_v56  ;;  %v3258_v5 = vpop.eup %3257  ;;  %v4798_v56 = vld [vmem:[#allocation3 + $0x6c] ss:$16 sps:$4 sm:$0xff]  }
 0x59d   :  { %v1832_v41 = vmul.f32 0.5, %v3258_v5  ;;  %v3260_v13 = vpop.eup %3259  ;;  %v4804_v5 = vld [vmem:[#allocation3 + $0x68] ss:$16 sps:$4 sm:$0xff]  }
 0x59e   :  { %v1834_v57 = vadd.f32 0.5, %v1831_v25  ;;  %v3262_v42 = vpop.eup %3261  ;;  %v4801_v25 = vld [vmem:[#allocation3 + $0x60] ss:$16 sps:$4 sm:$0xff]  }
 0x59f   :  { %v1835_v30 = vadd.f32 0.5, %v1832_v41  ;;  %v1833_v32 = vmul.f32 0.5, %v3262_v42  ;;  %v4810_v41 = vld [vmem:[#allocation3 + $0x8c] ss:$16 sps:$4 sm:$0xff]   ;;  %v4825_v42 = vld [vmem:[#allocation3 + $0xa0] ss:$16 sps:$4 sm:$0xff]  }
 0x5a0   :  { %v1839_v14 = vmul.f32 %v3260_v13, %v1834_v57  ;;  %v4807_v57 = vld [vmem:[#allocation3 + $0x84] ss:$16 sps:$4 sm:$0xff]   ;;  %v4813_v13 = vld [vmem:[#allocation3 + $0x80] ss:$16 sps:$4 sm:$0xff]   ;;  %6027 = vst [vmem:[#allocation27_spill] sm:$0xff] %v4825_v42 }
 0x5a1   :  { %v1838_v15 = vmul.f32 %v1835_v30, %v4650_v50  ;;  %v1836_v11 = vadd.f32 0.5, %v1833_v32  ;;  %v4778_v50 = vld [vmem:[#allocation3 + $0x28] ss:$16 sps:$4 sm:$0xff]  }
 0x5a2   :  { %v4816_v30 = vld [vmem:[#allocation3 + $0x88] ss:$16 sps:$4 sm:$0xff]  }
 0x5a3   :  { %v4768_v23 = vadd.f32 %v1839_v14, %v1838_v15  ;;  %v4819_v14 = vld [vmem:[#allocation3 + $0xa4] ss:$16 sps:$4 sm:$0xff]   ;;  %v4822_v15 = vld [vmem:[#allocation3 + $0xac] ss:$16 sps:$4 sm:$0xff]   ;;  %v4828_v32 = vld [vmem:[#allocation3 + $0xa8] ss:$16 sps:$4 sm:$0xff]  }
 0x5a4   :  { %6026 = vst [vmem:[#allocation26_spill] sm:$0xff] %v4822_v15  ;;  %6028 = vst [vmem:[#allocation76_spill] sm:$0xff] %v4828_v32 }
 0x5a5   :  { %3263 = vtanh.f32 %v4768_v23 }
 0x5af   :  { %v3264_v24 = vpop.eup %3263 }
 0x5b0   :  { %v1842_v20 = vmul.f32 %v3264_v24, %v1836_v11  ;;  %v4831_v11 = vld [vmem:[#allocation3 + $0xc4] ss:$16 sps:$4 sm:$0xff]   ;;  %v4834_v24 = vld [vmem:[#allocation3 + $0xcc] ss:$16 sps:$4 sm:$0xff]  }
 0x5b1   :  { %6029 = vst [vmem:[#allocation77_spill] sm:$0xff] %v4831_v11  ;;  %6030 = vst [vmem:[#allocation78_spill] sm:$0xff] %v4834_v24 }
 0x5b2   :  { %v4771_v35 = vpack.c.bf16 %v1842_v20, %v1842_v20  ;;  %v4837_v20 = vld [vmem:[#allocation3 + $0xc0] ss:$16 sps:$4 sm:$0xff]  }
 0x5b3   :  { %6031 = vst [vmem:[#allocation79_spill] sm:$0xff] %v4837_v20 }
 0x5b4   :  { %1878 = vmatmul.mubr.bf16.vlgmr.msra.gmra.mrb[52].mxu0 %v4771_v35  ;;  %1919 = vmatmul.mubr.bf16.vlgmr.msra.gmra.mrb[52].mxu1 %v4771_v35 }
 0x5b5   :  { %1950 = vmatpush1.bf16.msra.mxu0 %v4775_v12  ;;  %1991 = vmatpush1.bf16.msra.mxu1 %v4778_v50 }
 0x5b6   :  { %1951 = vmatprep.subr.bf16.mxu0 %v4781_v10  ;;  %1992 = vmatprep.subr.bf16.mxu1 %v4784_v22 }
 0x5b7   :  { %1981 = vmatprep.mubr.bf16.mxu0 %v5776_v2  ;;  %2022 = vmatprep.mubr.bf16.mxu1 %v5776_v2 }
 0x5b9   :  { %1952 = vmatpush1.bf16.msra.mxu0 %v4789_v21  ;;  %1993 = vmatpush1.bf16.msra.mxu1 %v4792_v55 }
 0x5ba   :  { %1953 = vmatprep.subr.bf16.mxu0 %v4795_v54  ;;  %1994 = vmatprep.subr.bf16.mxu1 %v4798_v56 }
 0x5bd   :  { %1954 = vmatpush1.bf16.msra.mxu0 %v4801_v25  ;;  %1995 = vmatpush1.bf16.msra.mxu1 %v4804_v5 }
 0x5be   :  { %1955 = vmatprep.subr.bf16.mxu0 %v4807_v57  ;;  %1996 = vmatprep.subr.bf16.mxu1 %v4810_v41 }
 0x5c1   :  { %1956 = vmatpush1.bf16.msra.mxu0 %v4813_v13  ;;  %1997 = vmatpush1.bf16.msra.mxu1 %v4816_v30 }
 0x5c2   :  { %1957 = vmatprep.subr.bf16.mxu0 %v4819_v14  ;;  %1998 = vmatprep.subr.bf16.mxu1 %v4822_v15  ;;  %v4840_v15 = vld [vmem:[#allocation3 + $0xc8] ss:$16 sps:$4 sm:$0xff]  }
 0x5c3   :  { %6032 = vst [vmem:[#allocation28_spill] sm:$0xff] %v4840_v15 }
 0x5c5   :  { %1958 = vmatpush1.bf16.msra.mxu0 %v4825_v42  ;;  %1999 = vmatpush1.bf16.msra.mxu1 %v4828_v32  ;;  %v4843_v42 = vld [vmem:[#allocation3 + $0xe4] ss:$16 sps:$4 sm:$0xff]   ;;  %v4846_v32 = vld [vmem:[#allocation3 + $0xec] ss:$16 sps:$4 sm:$0xff]  }
 0x5c6   :  { %1959 = vmatprep.subr.bf16.mxu0 %v4831_v11  ;;  %2000 = vmatprep.subr.bf16.mxu1 %v4834_v24  ;;  %6033 = vst [vmem:[#allocation29_spill] sm:$0xff] %v4843_v42  ;;  %6034 = vst [vmem:[#allocation30_spill] sm:$0xff] %v4846_v32  ;;  %v4849_v11 = vld [vmem:[#allocation3 + $0xe0] ss:$16 sps:$4 sm:$0xff]   ;;  %v4852_v24 = vld [vmem:[#allocation3 + $0xe8] ss:$16 sps:$4 sm:$0xff]  }
 0x5c9   :  { %1960 = vmatpush1.bf16.msra.mxu0 %v4837_v20  ;;  %2001 = vmatpush1.bf16.msra.mxu1 %v4840_v15  ;;  %v4855_v20 = vld [vmem:[#allocation3 + $0x104] ss:$16 sps:$4 sm:$0xff]   ;;  %v4858_v15 = vld [vmem:[#allocation3 + $0x10c] ss:$16 sps:$4 sm:$0xff]  }
 0x5ca   :  { %1961 = vmatprep.subr.bf16.mxu0 %v4843_v42  ;;  %2002 = vmatprep.subr.bf16.mxu1 %v4846_v32  ;;  %v4861_v42 = vld [vmem:[#allocation3 + $0x100] ss:$16 sps:$4 sm:$0xff]   ;;  %v4864_v32 = vld [vmem:[#allocation3 + $0x108] ss:$16 sps:$4 sm:$0xff]  }
 0x5cd   :  { %1962 = vmatpush1.bf16.msra.mxu0 %v4849_v11  ;;  %2003 = vmatpush1.bf16.msra.mxu1 %v4852_v24 }
 0x5ce   :  { %1963 = vmatprep.subr.bf16.mxu0 %v4855_v20  ;;  %2004 = vmatprep.subr.bf16.mxu1 %v4858_v15 }
 0x5d1   :  { %1964 = vmatpush1.bf16.msra.mxu0 %v4861_v42  ;;  %2005 = vmatpush1.bf16.msra.mxu1 %v4864_v32 }
 0x5d2   :  { %2055 = vmatprep.subr.bf16.mxu0 %v4443_v44  ;;  %2096 = vmatprep.subr.bf16.mxu1 %v4446_v45  ;;  %v6035_v44 = vld [vmem:[#allocation53_spill] sm:$0xff]  ;;  %v6036_v45 = vld [vmem:[#allocation54_spill] sm:$0xff] }
 0x5d4   :  { %1982 = vmatmul.mubr.bf16.vlgmr.msra.gmra.mrb[56].mxu0 %v4771_v35  ;;  %2023 = vmatmul.mubr.bf16.vlgmr.msra.gmra.mrb[56].mxu1 %v4771_v35  ;;  %v6063_v35 = vld [vmem:[#allocation16_spill] sm:$0xff] }
 0x5d5   :  { %2056 = vmatpush1.bf16.msra.mxu0 %v4449_v46  ;;  %2097 = vmatpush1.bf16.msra.mxu1 %v4452_v47  ;;  %v6037_v46 = vld [vmem:[#allocation55_spill] sm:$0xff]  ;;  %v6038_v47 = vld [vmem:[#allocation56_spill] sm:$0xff] }
 0x5d6   :  { %2057 = vmatprep.subr.bf16.mxu0 %v4455_v48  ;;  %2098 = vmatprep.subr.bf16.mxu1 %v4458_v0  ;;  %v6039_v48 = vld [vmem:[#allocation57_spill] sm:$0xff]  ;;  %v6040_v0 = vld [vmem:[#allocation58_spill] sm:$0xff] }
 0x5d9   :  { %2058 = vmatpush1.bf16.msra.mxu0 %v4461_v49  ;;  %2099 = vmatpush1.bf16.msra.mxu1 %v4464_v51  ;;  %v6041_v49 = vld [vmem:[#allocation59_spill] sm:$0xff]  ;;  %v6042_v51 = vld [vmem:[#allocation60_spill] sm:$0xff] }
 0x5da   :  { %2059 = vmatprep.subr.bf16.mxu0 %v4467_v52  ;;  %2100 = vmatprep.subr.bf16.mxu1 %v4470_v53  ;;  %v6043_v52 = vld [vmem:[#allocation61_spill] sm:$0xff]  ;;  %v6044_v53 = vld [vmem:[#allocation62_spill] sm:$0xff] }
 0x5dd   :  { %2060 = vmatpush1.bf16.msra.mxu0 %v5960_v8  ;;  %2101 = vmatpush1.bf16.msra.mxu1 %v5961_v31  ;;  %v6045_v8 = vld [vmem:[#allocation63_spill] sm:$0xff]  ;;  %v6046_v31 = vld [vmem:[#allocation64_spill] sm:$0xff] }
 0x5de   :  { %2061 = vmatprep.subr.bf16.mxu0 %v5962_v61  ;;  %2102 = vmatprep.subr.bf16.mxu1 %v5963_v59  ;;  %v6047_v61 = vld [vmem:[#allocation65_spill] sm:$0xff]  ;;  %v6048_v59 = vld [vmem:[#allocation66_spill] sm:$0xff] }
 0x5e1   :  { %2062 = vmatpush1.bf16.msra.mxu0 %v5964_v38  ;;  %2103 = vmatpush1.bf16.msra.mxu1 %v5965_v63  ;;  %v6049_v38 = vld [vmem:[#allocation12_spill] sm:$0xff]  ;;  %v6050_v63 = vld [vmem:[#allocation13_spill] sm:$0xff] }
 0x5e2   :  { %2063 = vmatprep.subr.bf16.mxu0 %v5966_v58  ;;  %2104 = vmatprep.subr.bf16.mxu1 %v5967_v60  ;;  %v6051_v58 = vld [vmem:[#allocation18_spill] sm:$0xff]  ;;  %v6052_v60 = vld [vmem:[#allocation72_spill] sm:$0xff] }
 0x5e5   :  { %2064 = vmatpush1.bf16.msra.mxu0 %v5968_v16  ;;  %2105 = vmatpush1.bf16.msra.mxu1 %v5969_v39  ;;  %v6053_v16 = vld [vmem:[#allocation73_spill] sm:$0xff]  ;;  %v6054_v39 = vld [vmem:[#allocation74_spill] sm:$0xff] }
 0x5e6   :  { %2065 = vmatprep.subr.bf16.mxu0 %v5970_v26  ;;  %2106 = vmatprep.subr.bf16.mxu1 %v5971_v62  ;;  %v6055_v26 = vld [vmem:[#allocation75_spill] sm:$0xff] }
 0x5e7   :  { %v6056_v62 = vld [vmem:[#allocation19_spill] sm:$0xff] }
 0x5e9   :  { %2066 = vmatpush1.bf16.msra.mxu0 %v5972_v17  ;;  %2107 = vmatpush1.bf16.msra.mxu1 %v5973_v9  ;;  %v6057_v17 = vld [vmem:[#allocation20_spill] sm:$0xff]  ;;  %v6058_v9 = vld [vmem:[#allocation21_spill] sm:$0xff] }
 0x5ea   :  { %2067 = vmatprep.subr.bf16.mxu0 %v5974_v27  ;;  %2108 = vmatprep.subr.bf16.mxu1 %v5975_v7  ;;  %v6059_v27 = vld [vmem:[#allocation23_spill] sm:$0xff]  ;;  %v6060_v7 = vld [vmem:[#allocation24_spill] sm:$0xff] }
 0x5ed   :  { %2068 = vmatpush1.bf16.msra.mxu0 %v5976_v4  ;;  %2109 = vmatpush1.bf16.msra.mxu1 %v5977_v1 }
 0x5ee   :  { %2069 = vmatprep.subr.bf16.mxu0 %v5978_v43  ;;  %2110 = vmatprep.subr.bf16.mxu1 %v5979_v6  ;;  %v6061_v43 = vld [vmem:[#allocation14_spill] sm:$0xff] }
 0x5f1   :  { %2070 = vmatpush1.bf16.msra.mxu0 %v5980_v3  ;;  %2111 = vmatpush1.bf16.msra.mxu1 %v5981_v18 }
 0x5f2   :  { %2071 = vmatprep.subr.bf16.mxu0 %v5982_v19  ;;  %2112 = vmatprep.subr.bf16.mxu1 %v5983_v28  ;;  %v6062_v19 = vld [vmem:[#allocation15_spill] sm:$0xff] }
 0x5f5   :  { %2072 = vmatpush1.bf16.msra.mxu0 %v5984_v29  ;;  %2113 = vmatpush1.bf16.msra.mxu1 %v5985_v33 }
 0x5f6   :  { %2073 = vmatprep.subr.bf16.mxu0 %v5986_v34  ;;  %2114 = vmatprep.subr.bf16.mxu1 %v5987_v36 }
 0x5f9   :  { %2074 = vmatpush1.bf16.msra.mxu0 %v5988_v37  ;;  %2115 = vmatpush1.bf16.msra.mxu1 %v5989_v40 }
 0x5fa   :  { %2075 = vmatprep.subr.bf16.mxu0 %v6035_v44  ;;  %2116 = vmatprep.subr.bf16.mxu1 %v6036_v45  ;;  %v6064_v45 = vld [vmem:[#allocation17_spill] sm:$0xff] }
 0x5fd   :  { %2076 = vmatpush1.bf16.msra.mxu0 %v6037_v46  ;;  %2117 = vmatpush1.bf16.msra.mxu1 %v6038_v47 }
 0x5fe   :  { %2077 = vmatprep.subr.bf16.mxu0 %v6039_v48  ;;  %2118 = vmatprep.subr.bf16.mxu1 %v6040_v0 }
 0x601   :  { %2078 = vmatpush1.bf16.msra.mxu0 %v6041_v49  ;;  %2119 = vmatpush1.bf16.msra.mxu1 %v6042_v51 }
 0x602   :  { %2079 = vmatprep.subr.bf16.mxu0 %v6043_v52  ;;  %2120 = vmatprep.subr.bf16.mxu1 %v6044_v53 }
 0x605   :  { %2080 = vmatpush1.bf16.msra.mxu0 %v6045_v8  ;;  %2121 = vmatpush1.bf16.msra.mxu1 %v6046_v31 }
 0x606   :  { %2081 = vmatprep.subr.bf16.mxu0 %v6047_v61  ;;  %2122 = vmatprep.subr.bf16.mxu1 %v6048_v59  ;;  %v6065_v61 = vld [vmem:[#allocation25_spill] sm:$0xff] }
 0x609   :  { %2082 = vmatpush1.bf16.msra.mxu0 %v6049_v38  ;;  %2123 = vmatpush1.bf16.msra.mxu1 %v6050_v63 }
 0x60a   :  { %2083 = vmatprep.subr.bf16.mxu0 %v6051_v58  ;;  %2124 = vmatprep.subr.bf16.mxu1 %v6052_v60 }
 0x60d   :  { %2084 = vmatpush1.bf16.msra.mxu0 %v6053_v16  ;;  %2125 = vmatpush1.bf16.msra.mxu1 %v6054_v39  ;;  %v6066_v39 = vld [vmem:[#allocation84_spill] sm:$0xff] }
 0x60e   :  { %2085 = vmatprep.subr.bf16.mxu0 %v6055_v26  ;;  %2126 = vmatprep.subr.bf16.mxu1 %v6056_v62  ;;  %v6067_v62 = vld [vmem:[#allocation85_spill] sm:$0xff] }
 0x611   :  { %2086 = vmatpush1.bf16.msra.mxu0 %v6057_v17  ;;  %2127 = vmatpush1.bf16.msra.mxu1 %v6058_v9 }
 0x612   :  { %2159 = vmatprep.subr.bf16.mxu0 %v6059_v27  ;;  %2200 = vmatprep.subr.bf16.mxu1 %v6060_v7 }
 0x687   :  { %v1879_v4 = vpop.f32.mrb[52].mxu0  ;;  %v1920_v1 = vpop.f32.mrb[52].mxu1 }
 0x688   :  { %v1880_v6 = vadd.f32 %v1879_v4, %v6061_v43  ;;  %v1881_v3 = vpop.f32.mrb[53].mxu0  ;;  %v1922_v18 = vpop.f32.mrb[53].mxu1  ;;  %v1921_v46 = vadd.f32 %v1920_v1, %v6064_v45  ;;  %v6068_v1 = vld [vmem:[#allocation86_spill] sm:$0xff] }
 0x689   :  { %v1882_v28 = vadd.f32 %v1881_v3, %v6062_v19  ;;  %v1883_v29 = vpop.f32.mrb[54].mxu0  ;;  %v1924_v33 = vpop.f32.mrb[54].mxu1  ;;  %v1923_v44 = vadd.f32 %v1922_v18, %v6063_v35  ;;  %v6069_v3 = vld [vmem:[#allocation87_spill] sm:$0xff] }
 0x68a   :  { %v1927_v34 = vmul.f32 0.5, %v1880_v6  ;;  %v1884_v36 = vpop.f32.mrb[55].mxu0  ;;  %v1925_v37 = vpop.f32.mrb[55].mxu1  ;;  %v1929_v47 = vmul.f32 0.5, %v1921_v46 }
 0x68b   :  { %v1928_v40 = vmul.f32 0.5, %v1882_v28 }
 0x68c   :  { %3265 = vtanh.f32 %v1927_v34 }
 0x68d   :  { %3267 = vtanh.f32 %v1928_v40 }
 0x68e   :  { %3269 = vtanh.f32 %v1923_v44 }
 0x68f   :  { %3271 = vtanh.f32 %v1929_v47 }
 0x696   :  { %v3266_v48 = vpop.eup %3265 }
 0x697   :  { %v1933_v0 = vmul.f32 0.5, %v3266_v48  ;;  %v3268_v49 = vpop.eup %3267 }
 0x698   :  { %v1934_v52 = vmul.f32 0.5, %v3268_v49  ;;  %v3270_v53 = vpop.eup %3269 }
 0x699   :  { %v1936_v51 = vadd.f32 0.5, %v1933_v0  ;;  %v3272_v63 = vpop.eup %3271 }
 0x69a   :  { %v1937_v8 = vadd.f32 0.5, %v1934_v52  ;;  %v1935_v58 = vmul.f32 0.5, %v3272_v63 }
 0x69b   :  { %v1941_v31 = vmul.f32 %v3270_v53, %v1936_v51 }
 0x69c   :  { %v1940_v59 = vmul.f32 %v1937_v8, %v6065_v61  ;;  %v1938_v33 = vadd.f32 0.5, %v1935_v58 }
 0x69e   :  { %v4940_v38 = vadd.f32 %v1941_v31, %v1940_v59 }
 0x6a0   :  { %3273 = vtanh.f32 %v4940_v38 }
 0x6a7   :  { %v1983_v60 = vpop.f32.mrb[56].mxu0  ;;  %v2024_v16 = vpop.f32.mrb[56].mxu1 }
 0x6a8   :  { %v2031_v26 = vadd.f32 %v1983_v60, %v6066_v39  ;;  %v2033_v17 = vadd.f32 %v2024_v16, %v6067_v62  ;;  %v1985_v9 = vpop.f32.mrb[57].mxu0  ;;  %v2026_v4 = vpop.f32.mrb[57].mxu1 }
 0x6a9   :  { %v2032_v6 = vadd.f32 %v1985_v9, %v6068_v1  ;;  %v2034_v18 = vadd.f32 %v2026_v4, %v6069_v3  ;;  %v1987_v28 = vpop.f32.mrb[58].mxu0  ;;  %v2028_v29 = vpop.f32.mrb[58].mxu1  ;;  %v6072_v9 = vld [vmem:[#allocation76_spill] sm:$0xff]  ;;  %v6073_v4 = vld [vmem:[#allocation77_spill] sm:$0xff]  ;;  %v6074_v1 = vld [vmem:[#allocation78_spill] sm:$0xff] }
 0x6aa   :  { %v2035_v34 = vmul.f32 0.5, %v2031_v26  ;;  %v1988_v36 = vpop.f32.mrb[59].mxu0  ;;  %v2029_v37 = vpop.f32.mrb[59].mxu1  ;;  %v2037_v48 = vmul.f32 0.5, %v2033_v17  ;;  %v6071_v17 = vld [vmem:[#allocation27_spill] sm:$0xff]  ;;  %v6076_v3 = vld [vmem:[#allocation28_spill] sm:$0xff] }
 0x6ab   :  { %v3274_v40 = vpop.eup %3273  ;;  %v2036_v44 = vmul.f32 0.5, %v2032_v6  ;;  %v6075_v6 = vld [vmem:[#allocation79_spill] sm:$0xff]  ;;  %v6078_v28 = vld [vmem:[#allocation30_spill] sm:$0xff] }
 0x6ac   :  { %3275 = vtanh.f32 %v2035_v34  ;;  %v1944_v46 = vmul.f32 %v3274_v40, %v1938_v33  ;;  %v4983_v29 = vld [vmem:[#allocation3 + $0x124] ss:$16 sps:$4 sm:$0xff]   ;;  %v4986_v33 = vld [vmem:[#allocation3 + $0x12c] ss:$16 sps:$4 sm:$0xff]   ;;  %v4989_v34 = vld [vmem:[#allocation3 + $0x120] ss:$16 sps:$4 sm:$0xff]  }
 0x6ad   :  { %3277 = vtanh.f32 %v2036_v44  ;;  %v4992_v36 = vld [vmem:[#allocation3 + $0x128] ss:$16 sps:$4 sm:$0xff]   ;;  %v4995_v37 = vld [vmem:[#allocation3 + $0x144] ss:$16 sps:$4 sm:$0xff]   ;;  %v4998_v40 = vld [vmem:[#allocation3 + $0x14c] ss:$16 sps:$4 sm:$0xff]  }
 0x6ae   :  { %v2054_v47 = vpack.c.bf16 %v1944_v46, %v1944_v46  ;;  %3279 = vtanh.f32 %v2034_v18  ;;  %v6077_v18 = vld [vmem:[#allocation29_spill] sm:$0xff]  ;;  %v5004_v46 = vld [vmem:[#allocation3 + $0x148] ss:$16 sps:$4 sm:$0xff]  }
 0x6af   :  { %3281 = vtanh.f32 %v2037_v48  ;;  %v5001_v44 = vld [vmem:[#allocation3 + $0x140] ss:$16 sps:$4 sm:$0xff]   ;;  %v5010_v48 = vld [vmem:[#allocation3 + $0x16c] ss:$16 sps:$4 sm:$0xff]  }
 0x6b0   :  { %2087 = vmatprep.mubr.bf16.mxu0 %v2054_v47  ;;  %2128 = vmatprep.mubr.bf16.mxu1 %v2054_v47  ;;  %v5007_v47 = vld [vmem:[#allocation3 + $0x164] ss:$16 sps:$4 sm:$0xff]  }
 0x6b6   :  { %v3276_v0 = vpop.eup %3275 }
 0x6b7   :  { %v2041_v49 = vmul.f32 0.5, %v3276_v0  ;;  %v3278_v51 = vpop.eup %3277  ;;  %v5013_v0 = vld [vmem:[#allocation3 + $0x160] ss:$16 sps:$4 sm:$0xff]  }
 0x6b8   :  { %v2042_v53 = vmul.f32 0.5, %v3278_v51  ;;  %v3280_v8 = vpop.eup %3279  ;;  %6079 = vst [vmem:[#allocation31_spill] sm:$0xff] %v5013_v0  ;;  %v5019_v51 = vld [vmem:[#allocation3 + $0x184] ss:$16 sps:$4 sm:$0xff]  }
 0x6b9   :  { %v2044_v52 = vadd.f32 0.5, %v2041_v49  ;;  %v3282_v58 = vpop.eup %3281  ;;  %v5016_v49 = vld [vmem:[#allocation3 + $0x168] ss:$16 sps:$4 sm:$0xff]   ;;  %6081 = vst [vmem:[#allocation33_spill] sm:$0xff] %v5019_v51 }
 0x6ba   :  { %v2045_v31 = vadd.f32 0.5, %v2042_v53  ;;  %v2043_v60 = vmul.f32 0.5, %v3282_v58  ;;  %6080 = vst [vmem:[#allocation32_spill] sm:$0xff] %v5016_v49  ;;  %v5025_v53 = vld [vmem:[#allocation3 + $0x180] ss:$16 sps:$4 sm:$0xff]  }
 0x6bb   :  { %v2049_v61 = vmul.f32 %v3280_v8, %v2044_v52  ;;  %v5022_v52 = vld [vmem:[#allocation3 + $0x18c] ss:$16 sps:$4 sm:$0xff]   ;;  %6083 = vst [vmem:[#allocation35_spill] sm:$0xff] %v5025_v53  ;;  %v5028_v8 = vld [vmem:[#allocation3 + $0x188] ss:$16 sps:$4 sm:$0xff]  }
 0x6bc   :  { %v2048_v59 = vmul.f32 %v2045_v31, %v4768_v23  ;;  %v2046_v16 = vadd.f32 0.5, %v2043_v60  ;;  %v6070_v23 = vld [vmem:[#allocation26_spill] sm:$0xff]  ;;  %6082 = vst [vmem:[#allocation34_spill] sm:$0xff] %v5022_v52  ;;  %6084 = vst [vmem:[#allocation36_spill] sm:$0xff] %v5028_v8  ;;  %v5031_v31 = vld [vmem:[#allocation3 + $0x1a4] ss:$16 sps:$4 sm:$0xff]  }
 0x6bd   :  { %6085 = vst [vmem:[#allocation37_spill] sm:$0xff] %v5031_v31  ;;  %v5040_v58 = vld [vmem:[#allocation3 + $0x1a8] ss:$16 sps:$4 sm:$0xff]   ;;  %v5043_v60 = vld [vmem:[#allocation3 + $0x1c4] ss:$16 sps:$4 sm:$0xff]  }
 0x6be   :  { %v4948_v63 = vadd.f32 %v2049_v61, %v2048_v59  ;;  %v5034_v61 = vld [vmem:[#allocation3 + $0x1ac] ss:$16 sps:$4 sm:$0xff]   ;;  %v5037_v59 = vld [vmem:[#allocation3 + $0x1a0] ss:$16 sps:$4 sm:$0xff]   ;;  %6088 = vst [vmem:[#allocation40_spill] sm:$0xff] %v5040_v58  ;;  %6089 = vst [vmem:[#allocation41_spill] sm:$0xff] %v5043_v60 }
 0x6bf   :  { %6086 = vst [vmem:[#allocation38_spill] sm:$0xff] %v5034_v61  ;;  %6087 = vst [vmem:[#allocation39_spill] sm:$0xff] %v5037_v59 }
 0x6c0   :  { %3283 = vtanh.f32 %v4948_v63 }
 0x6ca   :  { %v3284_v39 = vpop.eup %3283 }
 0x6cb   :  { %v2052_v26 = vmul.f32 %v3284_v39, %v2046_v16  ;;  %v5046_v16 = vld [vmem:[#allocation3 + $0x1cc] ss:$16 sps:$4 sm:$0xff]   ;;  %v5049_v39 = vld [vmem:[#allocation3 + $0x1c0] ss:$16 sps:$4 sm:$0xff]  }
 0x6cc   :  { %6090 = vst [vmem:[#allocation42_spill] sm:$0xff] %v5046_v16  ;;  %6091 = vst [vmem:[#allocation67_spill] sm:$0xff] %v5049_v39 }
 0x6cd   :  { %v2053_v62 = vpack.c.bf16 %v2052_v26, %v2052_v26  ;;  %v5052_v26 = vld [vmem:[#allocation3 + $0x1c8] ss:$16 sps:$4 sm:$0xff]  }
 0x6ce   :  { %6092 = vst [vmem:[#allocation68_spill] sm:$0xff] %v5052_v26 }
 0x6cf   :  { %2088 = vmatmul.mubr.bf16.vlgmr.msra.gmra.mrb[60].mxu0 %v2053_v62  ;;  %2129 = vmatmul.mubr.bf16.vlgmr.msra.gmra.mrb[60].mxu1 %v2053_v62 }
 0x6d0   :  { %2160 = vmatpush1.bf16.msra.mxu0 %v4775_v12  ;;  %2201 = vmatpush1.bf16.msra.mxu1 %v4778_v50 }
 0x6d1   :  { %2161 = vmatprep.subr.bf16.mxu0 %v4781_v10  ;;  %2202 = vmatprep.subr.bf16.mxu1 %v4784_v22 }
 0x6d2   :  { %2191 = vmatprep.mubr.bf16.mxu0 %v5776_v2  ;;  %2232 = vmatprep.mubr.bf16.mxu1 %v5776_v2 }
 0x6d4   :  { %2162 = vmatpush1.bf16.msra.mxu0 %v4789_v21  ;;  %2203 = vmatpush1.bf16.msra.mxu1 %v4792_v55 }
 0x6d5   :  { %2163 = vmatprep.subr.bf16.mxu0 %v4795_v54  ;;  %2204 = vmatprep.subr.bf16.mxu1 %v4798_v56 }
 0x6d8   :  { %2164 = vmatpush1.bf16.msra.mxu0 %v4801_v25  ;;  %2205 = vmatpush1.bf16.msra.mxu1 %v4804_v5 }
 0x6d9   :  { %2165 = vmatprep.subr.bf16.mxu0 %v4807_v57  ;;  %2206 = vmatprep.subr.bf16.mxu1 %v4810_v41 }
 0x6dc   :  { %2166 = vmatpush1.bf16.msra.mxu0 %v4813_v13  ;;  %2207 = vmatpush1.bf16.msra.mxu1 %v4816_v30 }
 0x6dd   :  { %2167 = vmatprep.subr.bf16.mxu0 %v4819_v14  ;;  %2208 = vmatprep.subr.bf16.mxu1 %v6070_v23 }
 0x6e0   :  { %2168 = vmatpush1.bf16.msra.mxu0 %v6071_v17  ;;  %2209 = vmatpush1.bf16.msra.mxu1 %v6072_v9 }
 0x6e1   :  { %2169 = vmatprep.subr.bf16.mxu0 %v6073_v4  ;;  %2210 = vmatprep.subr.bf16.mxu1 %v6074_v1 }
 0x6e4   :  { %2170 = vmatpush1.bf16.msra.mxu0 %v6075_v6  ;;  %2211 = vmatpush1.bf16.msra.mxu1 %v6076_v3 }
 0x6e5   :  { %2171 = vmatprep.subr.bf16.mxu0 %v6077_v18  ;;  %2212 = vmatprep.subr.bf16.mxu1 %v6078_v28 }
 0x6e8   :  { %2172 = vmatpush1.bf16.msra.mxu0 %v4849_v11  ;;  %2213 = vmatpush1.bf16.msra.mxu1 %v4852_v24 }
 0x6e9   :  { %2173 = vmatprep.subr.bf16.mxu0 %v4855_v20  ;;  %2214 = vmatprep.subr.bf16.mxu1 %v4858_v15 }
 0x6ec   :  { %2174 = vmatpush1.bf16.msra.mxu0 %v4861_v42  ;;  %2215 = vmatpush1.bf16.msra.mxu1 %v4864_v32 }
 0x6ed   :  { %2265 = vmatprep.subr.bf16.mxu0 %v4983_v29  ;;  %2306 = vmatprep.subr.bf16.mxu1 %v4986_v33 }
 0x6ef   :  { %2192 = vmatmul.mubr.bf16.vlgmr.msra.gmra.mrb[64].mxu0 %v2053_v62  ;;  %2233 = vmatmul.mubr.bf16.vlgmr.msra.gmra.mrb[64].mxu1 %v2053_v62  ;;  %v5055_v62 = vld [vmem:[#allocation3 + $0x1e4] ss:$16 sps:$4 sm:$0xff]  }
 0x6f0   :  { %2266 = vmatpush1.bf16.msra.mxu0 %v4989_v34  ;;  %2307 = vmatpush1.bf16.msra.mxu1 %v4992_v36  ;;  %6093 = vst [vmem:[#allocation69_spill] sm:$0xff] %v5055_v62 }
 0x6f1   :  { %2267 = vmatprep.subr.bf16.mxu0 %v4995_v37  ;;  %2308 = vmatprep.subr.bf16.mxu1 %v4998_v40 }
 0x6f4   :  { %2268 = vmatpush1.bf16.msra.mxu0 %v5001_v44  ;;  %2309 = vmatpush1.bf16.msra.mxu1 %v5004_v46 }
 0x6f5   :  { %2269 = vmatprep.subr.bf16.mxu0 %v5007_v47  ;;  %2310 = vmatprep.subr.bf16.mxu1 %v5010_v48 }
 0x6f8   :  { %2270 = vmatpush1.bf16.msra.mxu0 %v5013_v0  ;;  %2311 = vmatpush1.bf16.msra.mxu1 %v5016_v49 }
 0x6f9   :  { %2271 = vmatprep.subr.bf16.mxu0 %v5019_v51  ;;  %2312 = vmatprep.subr.bf16.mxu1 %v5022_v52 }
 0x6fc   :  { %2272 = vmatpush1.bf16.msra.mxu0 %v5025_v53  ;;  %2313 = vmatpush1.bf16.msra.mxu1 %v5028_v8 }
 0x6fd   :  { %2273 = vmatprep.subr.bf16.mxu0 %v5031_v31  ;;  %2314 = vmatprep.subr.bf16.mxu1 %v5034_v61 }
 0x700   :  { %2274 = vmatpush1.bf16.msra.mxu0 %v5037_v59  ;;  %2315 = vmatpush1.bf16.msra.mxu1 %v5040_v58  ;;  %v5058_v58 = vld [vmem:[#allocation3 + $0x1ec] ss:$16 sps:$4 sm:$0xff]  }
 0x701   :  { %2275 = vmatprep.subr.bf16.mxu0 %v5043_v60  ;;  %2316 = vmatprep.subr.bf16.mxu1 %v5046_v16  ;;  %6094 = vst [vmem:[#allocation70_spill] sm:$0xff] %v5058_v58  ;;  %v5061_v60 = vld [vmem:[#allocation3 + $0x1e0] ss:$16 sps:$4 sm:$0xff]   ;;  %v5064_v16 = vld [vmem:[#allocation3 + $0x1e8] ss:$16 sps:$4 sm:$0xff]  }
 0x702   :  { %6095 = vst [vmem:[#allocation71_spill] sm:$0xff] %v5061_v60  ;;  %6096 = vst [vmem:[#allocation43_spill] sm:$0xff] %v5064_v16 }
 0x704   :  { %2276 = vmatpush1.bf16.msra.mxu0 %v5049_v39  ;;  %2317 = vmatpush1.bf16.msra.mxu1 %v5052_v26  ;;  %v5067_v39 = vld [vmem:[#allocation3 + $0x204] ss:$16 sps:$4 sm:$0xff]   ;;  %v5070_v26 = vld [vmem:[#allocation3 + $0x20c] ss:$16 sps:$4 sm:$0xff]  }
 0x705   :  { %2277 = vmatprep.subr.bf16.mxu0 %v5055_v62  ;;  %2318 = vmatprep.subr.bf16.mxu1 %v5058_v58  ;;  %6097 = vst [vmem:[#allocation44_spill] sm:$0xff] %v5067_v39  ;;  %6098 = vst [vmem:[#allocation45_spill] sm:$0xff] %v5070_v26  ;;  %v5073_v62 = vld [vmem:[#allocation3 + $0x200] ss:$16 sps:$4 sm:$0xff]   ;;  %v5076_v58 = vld [vmem:[#allocation3 + $0x208] ss:$16 sps:$4 sm:$0xff]  }
 0x706   :  { %6099 = vst [vmem:[#allocation46_spill] sm:$0xff] %v5073_v62  ;;  %6100 = vst [vmem:[#allocation47_spill] sm:$0xff] %v5076_v58 }
 0x708   :  { %2278 = vmatpush1.bf16.msra.mxu0 %v5061_v60  ;;  %2319 = vmatpush1.bf16.msra.mxu1 %v5064_v16  ;;  %v5079_v60 = vld [vmem:[#allocation3 + $0x224] ss:$16 sps:$4 sm:$0xff]   ;;  %v5082_v16 = vld [vmem:[#allocation3 + $0x22c] ss:$16 sps:$4 sm:$0xff]  }
 0x709   :  { %2279 = vmatprep.subr.bf16.mxu0 %v5067_v39  ;;  %2320 = vmatprep.subr.bf16.mxu1 %v5070_v26  ;;  %6101 = vst [vmem:[#allocation48_spill] sm:$0xff] %v5079_v60  ;;  %6102 = vst [vmem:[#allocation49_spill] sm:$0xff] %v5082_v16  ;;  %v5085_v39 = vld [vmem:[#allocation3 + $0x220] ss:$16 sps:$4 sm:$0xff]   ;;  %v5088_v26 = vld [vmem:[#allocation3 + $0x228] ss:$16 sps:$4 sm:$0xff]  }
 0x70a   :  { %6103 = vst [vmem:[#allocation50_spill] sm:$0xff] %v5085_v39  ;;  %6104 = vst [vmem:[#allocation51_spill] sm:$0xff] %v5088_v26 }
 0x70c   :  { %2280 = vmatpush1.bf16.msra.mxu0 %v5073_v62  ;;  %2321 = vmatpush1.bf16.msra.mxu1 %v5076_v58  ;;  %v5091_v62 = vld [vmem:[#allocation3 + $0x244] ss:$16 sps:$4 sm:$0xff]   ;;  %v5094_v58 = vld [vmem:[#allocation3 + $0x24c] ss:$16 sps:$4 sm:$0xff]  }
 0x70d   :  { %2281 = vmatprep.subr.bf16.mxu0 %v5079_v60  ;;  %2322 = vmatprep.subr.bf16.mxu1 %v5082_v16  ;;  %6105 = vst [vmem:[#allocation52_spill] sm:$0xff] %v5091_v62  ;;  %6106 = vst [vmem:[#allocation22_spill] sm:$0xff] %v5094_v58  ;;  %v5097_v60 = vld [vmem:[#allocation3 + $0x240] ss:$16 sps:$4 sm:$0xff]   ;;  %v5100_v16 = vld [vmem:[#allocation3 + $0x248] ss:$16 sps:$4 sm:$0xff]  }
 0x70e   :  { %6107 = vst [vmem:[#allocation80_spill] sm:$0xff] %v5097_v60  ;;  %6108 = vst [vmem:[#allocation81_spill] sm:$0xff] %v5100_v16 }
 0x710   :  { %2282 = vmatpush1.bf16.msra.mxu0 %v5085_v39  ;;  %2323 = vmatpush1.bf16.msra.mxu1 %v5088_v26  ;;  %v5103_v39 = vld [vmem:[#allocation3 + $0x264] ss:$16 sps:$4 sm:$0xff]   ;;  %v5106_v26 = vld [vmem:[#allocation3 + $0x26c] ss:$16 sps:$4 sm:$0xff]  }
 0x711   :  { %2283 = vmatprep.subr.bf16.mxu0 %v5091_v62  ;;  %2324 = vmatprep.subr.bf16.mxu1 %v5094_v58  ;;  %6109 = vst [vmem:[#allocation82_spill] sm:$0xff] %v5103_v39  ;;  %6110 = vst [vmem:[#allocation83_spill] sm:$0xff] %v5106_v26  ;;  %v5109_v62 = vld [vmem:[#allocation3 + $0x260] ss:$16 sps:$4 sm:$0xff]   ;;  %v5112_v58 = vld [vmem:[#allocation3 + $0x268] ss:$16 sps:$4 sm:$0xff]  }
 0x712   :  { %6111 = vst [vmem:[#allocation53_spill] sm:$0xff] %v5109_v62  ;;  %6112 = vst [vmem:[#allocation54_spill] sm:$0xff] %v5112_v58 }
 0x714   :  { %2284 = vmatpush1.bf16.msra.mxu0 %v5097_v60  ;;  %2325 = vmatpush1.bf16.msra.mxu1 %v5100_v16  ;;  %v5115_v60 = vld [vmem:[#allocation3 + $0x284] ss:$16 sps:$4 sm:$0xff]   ;;  %v5118_v16 = vld [vmem:[#allocation3 + $0x28c] ss:$16 sps:$4 sm:$0xff]  }
 0x715   :  { %2285 = vmatprep.subr.bf16.mxu0 %v5103_v39  ;;  %2326 = vmatprep.subr.bf16.mxu1 %v5106_v26  ;;  %6113 = vst [vmem:[#allocation55_spill] sm:$0xff] %v5115_v60  ;;  %6114 = vst [vmem:[#allocation56_spill] sm:$0xff] %v5118_v16  ;;  %v5121_v39 = vld [vmem:[#allocation3 + $0x280] ss:$16 sps:$4 sm:$0xff]   ;;  %v5124_v26 = vld [vmem:[#allocation3 + $0x288] ss:$16 sps:$4 sm:$0xff]  }
 0x716   :  { %6115 = vst [vmem:[#allocation57_spill] sm:$0xff] %v5121_v39  ;;  %6116 = vst [vmem:[#allocation58_spill] sm:$0xff] %v5124_v26 }
 0x718   :  { %2286 = vmatpush1.bf16.msra.mxu0 %v5109_v62  ;;  %2327 = vmatpush1.bf16.msra.mxu1 %v5112_v58  ;;  %v5127_v62 = vld [vmem:[#allocation3 + $0x2a4] ss:$16 sps:$4 sm:$0xff]   ;;  %v5130_v58 = vld [vmem:[#allocation3 + $0x2ac] ss:$16 sps:$4 sm:$0xff]  }
 0x719   :  { %2287 = vmatprep.subr.bf16.mxu0 %v5115_v60  ;;  %2328 = vmatprep.subr.bf16.mxu1 %v5118_v16  ;;  %6117 = vst [vmem:[#allocation59_spill] sm:$0xff] %v5127_v62  ;;  %6118 = vst [vmem:[#allocation60_spill] sm:$0xff] %v5130_v58  ;;  %v5133_v60 = vld [vmem:[#allocation3 + $0x2a0] ss:$16 sps:$4 sm:$0xff]   ;;  %v5136_v16 = vld [vmem:[#allocation3 + $0x2a8] ss:$16 sps:$4 sm:$0xff]  }
 0x71a   :  { %6119 = vst [vmem:[#allocation61_spill] sm:$0xff] %v5133_v60  ;;  %6120 = vst [vmem:[#allocation62_spill] sm:$0xff] %v5136_v16 }
 0x71c   :  { %2288 = vmatpush1.bf16.msra.mxu0 %v5121_v39  ;;  %2329 = vmatpush1.bf16.msra.mxu1 %v5124_v26  ;;  %v5139_v39 = vld [vmem:[#allocation3 + $0x2c4] ss:$16 sps:$4 sm:$0xff]   ;;  %v5142_v26 = vld [vmem:[#allocation3 + $0x2cc] ss:$16 sps:$4 sm:$0xff]  }
 0x71d   :  { %2289 = vmatprep.subr.bf16.mxu0 %v5127_v62  ;;  %2330 = vmatprep.subr.bf16.mxu1 %v5130_v58  ;;  %6121 = vst [vmem:[#allocation63_spill] sm:$0xff] %v5139_v39  ;;  %6122 = vst [vmem:[#allocation64_spill] sm:$0xff] %v5142_v26  ;;  %v5145_v62 = vld [vmem:[#allocation3 + $0x2c0] ss:$16 sps:$4 sm:$0xff]   ;;  %v5148_v58 = vld [vmem:[#allocation3 + $0x2c8] ss:$16 sps:$4 sm:$0xff]  }
 0x71e   :  { %6123 = vst [vmem:[#allocation65_spill] sm:$0xff] %v5145_v62  ;;  %6124 = vst [vmem:[#allocation66_spill] sm:$0xff] %v5148_v58 }
 0x720   :  { %2290 = vmatpush1.bf16.msra.mxu0 %v5133_v60  ;;  %2331 = vmatpush1.bf16.msra.mxu1 %v5136_v16  ;;  %v5151_v60 = vld [vmem:[#allocation3 + $0x2e4] ss:$16 sps:$4 sm:$0xff]   ;;  %v5154_v16 = vld [vmem:[#allocation3 + $0x2ec] ss:$16 sps:$4 sm:$0xff]  }
 0x721   :  { %2291 = vmatprep.subr.bf16.mxu0 %v5139_v39  ;;  %2332 = vmatprep.subr.bf16.mxu1 %v5142_v26  ;;  %6125 = vst [vmem:[#allocation12_spill] sm:$0xff] %v5151_v60  ;;  %6126 = vst [vmem:[#allocation13_spill] sm:$0xff] %v5154_v16  ;;  %v5157_v39 = vld [vmem:[#allocation3 + $0x2e0] ss:$16 sps:$4 sm:$0xff]   ;;  %v5160_v26 = vld [vmem:[#allocation3 + $0x2e8] ss:$16 sps:$4 sm:$0xff]  }
 0x722   :  { %6127 = vst [vmem:[#allocation18_spill] sm:$0xff] %v5157_v39  ;;  %6128 = vst [vmem:[#allocation72_spill] sm:$0xff] %v5160_v26 }
 0x724   :  { %2292 = vmatpush1.bf16.msra.mxu0 %v5145_v62  ;;  %2333 = vmatpush1.bf16.msra.mxu1 %v5148_v58  ;;  %v5163_v62 = vld [vmem:[#allocation3 + $0x304] ss:$16 sps:$4 sm:$0xff]   ;;  %v5166_v58 = vld [vmem:[#allocation3 + $0x30c] ss:$16 sps:$4 sm:$0xff]  }
 0x725   :  { %2293 = vmatprep.subr.bf16.mxu0 %v5151_v60  ;;  %2334 = vmatprep.subr.bf16.mxu1 %v5154_v16  ;;  %6129 = vst [vmem:[#allocation73_spill] sm:$0xff] %v5163_v62  ;;  %6130 = vst [vmem:[#allocation74_spill] sm:$0xff] %v5166_v58  ;;  %v5169_v60 = vld [vmem:[#allocation3 + $0x300] ss:$16 sps:$4 sm:$0xff]   ;;  %v5172_v16 = vld [vmem:[#allocation3 + $0x308] ss:$16 sps:$4 sm:$0xff]  }
 0x726   :  { %6131 = vst [vmem:[#allocation75_spill] sm:$0xff] %v5169_v60  ;;  %6132 = vst [vmem:[#allocation19_spill] sm:$0xff] %v5172_v16 }
 0x728   :  { %2294 = vmatpush1.bf16.msra.mxu0 %v5157_v39  ;;  %2335 = vmatpush1.bf16.msra.mxu1 %v5160_v26 }
 0x729   :  { %2295 = vmatprep.subr.bf16.mxu0 %v5163_v62  ;;  %2336 = vmatprep.subr.bf16.mxu1 %v5166_v58 }
 0x72c   :  { %2296 = vmatpush1.bf16.msra.mxu0 %v5169_v60  ;;  %2337 = vmatpush1.bf16.msra.mxu1 %v5172_v16 }
 0x72d   :  { %2369 = vmatprep.subr.bf16.mxu0 %v6059_v27  ;;  %2410 = vmatprep.subr.bf16.mxu1 %v6060_v7 }
 0x7a2   :  { %v2089_v26 = vpop.f32.mrb[60].mxu0  ;;  %v2130_v39 = vpop.f32.mrb[60].mxu1 }
 0x7a3   :  { %v2090_v62 = vadd.f32 %v2089_v26, %v6061_v43  ;;  %v2091_v59 = vpop.f32.mrb[61].mxu0  ;;  %v2132_v61 = vpop.f32.mrb[61].mxu1  ;;  %v2131_v27 = vadd.f32 %v2130_v39, %v6064_v45 }
 0x7a4   :  { %v2092_v58 = vadd.f32 %v2091_v59, %v6062_v19  ;;  %v2093_v31 = vpop.f32.mrb[62].mxu0  ;;  %v2134_v8 = vpop.f32.mrb[62].mxu1  ;;  %v2133_v16 = vadd.f32 %v2132_v61, %v6063_v35 }
 0x7a5   :  { %v2137_v53 = vmul.f32 0.5, %v2090_v62  ;;  %v2094_v60 = vpop.f32.mrb[63].mxu0  ;;  %v2135_v52 = vpop.f32.mrb[63].mxu1  ;;  %v2139_v7 = vmul.f32 0.5, %v2131_v27 }
 0x7a6   :  { %v2138_v51 = vmul.f32 0.5, %v2092_v58 }
 0x7a7   :  { %3285 = vtanh.f32 %v2137_v53 }
 0x7a8   :  { %3287 = vtanh.f32 %v2138_v51 }
 0x7a9   :  { %3289 = vtanh.f32 %v2133_v16  ;;  %v6134_v16 = vld [vmem:[#allocation88_spill] sm:$0xff] }
 0x7aa   :  { %3291 = vtanh.f32 %v2139_v7 }
 0x7b1   :  { %v3286_v49 = vpop.eup %3285 }
 0x7b2   :  { %v2143_v26 = vmul.f32 0.5, %v3286_v49  ;;  %v3288_v43 = vpop.eup %3287  ;;  %v6135_v49 = vld [vmem:[#allocation89_spill] sm:$0xff] }
 0x7b3   :  { %v2144_v59 = vmul.f32 0.5, %v3288_v43  ;;  %v3290_v31 = vpop.eup %3289  ;;  %v6136_v43 = vld [vmem:[#allocation90_spill] sm:$0xff] }
 0x7b4   :  { %v2146_v0 = vadd.f32 0.5, %v2143_v26  ;;  %v3292_v51 = vpop.eup %3291 }
 0x7b5   :  { %v2147_v8 = vadd.f32 0.5, %v2144_v59  ;;  %v2145_v53 = vmul.f32 0.5, %v3292_v51  ;;  %v6137_v59 = vld [vmem:[#allocation91_spill] sm:$0xff] }
 0x7b6   :  { %v2151_v62 = vmul.f32 %v3290_v31, %v2146_v0 }
 0x7b7   :  { %v2150_v52 = vmul.f32 %v2147_v8, %v4940_v38  ;;  %v2148_v8 = vadd.f32 0.5, %v2145_v53 }
 0x7b9   :  { %v5182_v58 = vadd.f32 %v2151_v62, %v2150_v52 }
 0x7bb   :  { %6133 = vst [vmem:[#allocation20_spill] sm:$0xff] %v5182_v58  ;;  %3293 = vtanh.f32 %v5182_v58 }
 0x7c2   :  { %v2193_v61 = vpop.f32.mrb[64].mxu0  ;;  %v2234_v60 = vpop.f32.mrb[64].mxu1 }
 0x7c3   :  { %v2241_v39 = vadd.f32 %v2193_v61, %v6134_v16  ;;  %v2243_v27 = vadd.f32 %v2234_v60, %v6135_v49  ;;  %v2195_v26 = vpop.f32.mrb[65].mxu0  ;;  %v2236_v7 = vpop.f32.mrb[65].mxu1 }
 0x7c4   :  { %v2242_v45 = vadd.f32 %v2195_v26, %v6136_v43  ;;  %v2244_v0 = vadd.f32 %v2236_v7, %v6137_v59  ;;  %v2197_v31 = vpop.f32.mrb[66].mxu0  ;;  %v2238_v38 = vpop.f32.mrb[66].mxu1 }
 0x7c5   :  { %v2245_v62 = vmul.f32 0.5, %v2241_v39  ;;  %v2198_v52 = vpop.f32.mrb[67].mxu0  ;;  %v2239_v58 = vpop.f32.mrb[67].mxu1  ;;  %v2247_v60 = vmul.f32 0.5, %v2243_v27 }
 0x7c6   :  { %v3294_v35 = vpop.eup %3293  ;;  %v2246_v51 = vmul.f32 0.5, %v2242_v45  ;;  %v6182_v52 = vld [vmem:[#allocation65_spill] sm:$0xff] }
 0x7c7   :  { %3295 = vtanh.f32 %v2245_v62  ;;  %v2154_v19 = vmul.f32 %v3294_v35, %v2148_v8  ;;  %v6180_v8 = vld [vmem:[#allocation63_spill] sm:$0xff]  ;;  %v6181_v62 = vld [vmem:[#allocation64_spill] sm:$0xff] }
 0x7c8   :  { %3297 = vtanh.f32 %v2246_v51  ;;  %v6183_v51 = vld [vmem:[#allocation66_spill] sm:$0xff] }
 0x7c9   :  { %v2264_v61 = vpack.c.bf16 %v2154_v19, %v2154_v19  ;;  %3299 = vtanh.f32 %v2244_v0 }
 0x7ca   :  { %3301 = vtanh.f32 %v2247_v60  ;;  %v6185_v60 = vld [vmem:[#allocation13_spill] sm:$0xff] }
 0x7cb   :  { %2297 = vmatprep.mubr.bf16.mxu0 %v2264_v61  ;;  %2338 = vmatprep.mubr.bf16.mxu1 %v2264_v61  ;;  %v6184_v61 = vld [vmem:[#allocation12_spill] sm:$0xff] }
 0x7d1   :  { %v3296_v16 = vpop.eup %3295 }
 0x7d2   :  { %v2251_v49 = vmul.f32 0.5, %v3296_v16  ;;  %v3298_v26 = vpop.eup %3297  ;;  %v6186_v16 = vld [vmem:[#allocation18_spill] sm:$0xff] }
 0x7d3   :  { %v2252_v43 = vmul.f32 0.5, %v3298_v26  ;;  %v3300_v53 = vpop.eup %3299  ;;  %v6188_v26 = vld [vmem:[#allocation73_spill] sm:$0xff] }
 0x7d4   :  { %v2254_v7 = vadd.f32 0.5, %v2251_v49  ;;  %v3302_v19 = vpop.eup %3301  ;;  %v6187_v49 = vld [vmem:[#allocation72_spill] sm:$0xff] }
 0x7d5   :  { %v2255_v39 = vadd.f32 0.5, %v2252_v43  ;;  %v2253_v35 = vmul.f32 0.5, %v3302_v19  ;;  %v6190_v43 = vld [vmem:[#allocation75_spill] sm:$0xff] }
 0x7d6   :  { %v2259_v59 = vmul.f32 %v3300_v53, %v2254_v7  ;;  %v6189_v7 = vld [vmem:[#allocation74_spill] sm:$0xff]  ;;  %v6191_v53 = vld [vmem:[#allocation19_spill] sm:$0xff] }
 0x7d7   :  { %v2258_v58 = vmul.f32 %v2255_v39, %v4948_v63  ;;  %v2256_v0 = vadd.f32 0.5, %v2253_v35  ;;  %v6160_v63 = vld [vmem:[#allocation48_spill] sm:$0xff] }
 0x7d9   :  { %v5190_v45 = vadd.f32 %v2259_v59, %v2258_v58  ;;  %v6192_v58 = vld [vmem:[#allocation14_spill] sm:$0xff] }
 0x7db   :  { %3303 = vtanh.f32 %v5190_v45 }
 0x7e5   :  { %v3304_v31 = vpop.eup %3303 }
 0x7e6   :  { %v2262_v27 = vmul.f32 %v3304_v31, %v2256_v0  ;;  %v6193_v31 = vld [vmem:[#allocation15_spill] sm:$0xff] }
 0x7e8   :  { %v2263_v38 = vpack.c.bf16 %v2262_v27, %v2262_v27 }
 0x7ea   :  { %2298 = vmatmul.mubr.bf16.vlgmr.msra.gmra.mrb[68].mxu0 %v2263_v38  ;;  %2339 = vmatmul.mubr.bf16.vlgmr.msra.gmra.mrb[68].mxu1 %v2263_v38 }
 0x7eb   :  { %2370 = vmatpush1.bf16.msra.mxu0 %v4775_v12  ;;  %2411 = vmatpush1.bf16.msra.mxu1 %v4778_v50  ;;  %v6139_v12 = vld [vmem:[#allocation32_spill] sm:$0xff]  ;;  %v6140_v50 = vld [vmem:[#allocation33_spill] sm:$0xff] }
 0x7ec   :  { %2371 = vmatprep.subr.bf16.mxu0 %v4781_v10  ;;  %2412 = vmatprep.subr.bf16.mxu1 %v4784_v22  ;;  %v6141_v10 = vld [vmem:[#allocation34_spill] sm:$0xff]  ;;  %v6142_v22 = vld [vmem:[#allocation35_spill] sm:$0xff] }
 0x7ed   :  { %2401 = vmatprep.mubr.bf16.mxu0 %v5776_v2  ;;  %2442 = vmatprep.mubr.bf16.mxu1 %v5776_v2  ;;  %v6138_v2 = vld [vmem:[#allocation31_spill] sm:$0xff] }
 0x7ef   :  { %2372 = vmatpush1.bf16.msra.mxu0 %v4789_v21  ;;  %2413 = vmatpush1.bf16.msra.mxu1 %v4792_v55  ;;  %v6143_v21 = vld [vmem:[#allocation36_spill] sm:$0xff]  ;;  %v6144_v55 = vld [vmem:[#allocation37_spill] sm:$0xff] }
 0x7f0   :  { %2373 = vmatprep.subr.bf16.mxu0 %v4795_v54  ;;  %2414 = vmatprep.subr.bf16.mxu1 %v4798_v56  ;;  %v6145_v54 = vld [vmem:[#allocation38_spill] sm:$0xff]  ;;  %v6146_v56 = vld [vmem:[#allocation39_spill] sm:$0xff] }
 0x7f3   :  { %2374 = vmatpush1.bf16.msra.mxu0 %v4801_v25  ;;  %2415 = vmatpush1.bf16.msra.mxu1 %v4804_v5  ;;  %v6147_v25 = vld [vmem:[#allocation40_spill] sm:$0xff]  ;;  %v6148_v5 = vld [vmem:[#allocation41_spill] sm:$0xff] }
 0x7f4   :  { %2375 = vmatprep.subr.bf16.mxu0 %v4807_v57  ;;  %2416 = vmatprep.subr.bf16.mxu1 %v4810_v41  ;;  %v6149_v57 = vld [vmem:[#allocation42_spill] sm:$0xff]  ;;  %v6150_v41 = vld [vmem:[#allocation67_spill] sm:$0xff] }
 0x7f7   :  { %2376 = vmatpush1.bf16.msra.mxu0 %v4813_v13  ;;  %2417 = vmatpush1.bf16.msra.mxu1 %v4816_v30  ;;  %v6151_v13 = vld [vmem:[#allocation68_spill] sm:$0xff]  ;;  %v6152_v30 = vld [vmem:[#allocation69_spill] sm:$0xff] }
 0x7f8   :  { %2377 = vmatprep.subr.bf16.mxu0 %v4819_v14  ;;  %2418 = vmatprep.subr.bf16.mxu1 %v6070_v23  ;;  %v6153_v14 = vld [vmem:[#allocation70_spill] sm:$0xff]  ;;  %v6161_v23 = vld [vmem:[#allocation49_spill] sm:$0xff] }
 0x7fb   :  { %2378 = vmatpush1.bf16.msra.mxu0 %v6071_v17  ;;  %2419 = vmatpush1.bf16.msra.mxu1 %v6072_v9  ;;  %v6162_v17 = vld [vmem:[#allocation50_spill] sm:$0xff]  ;;  %v6163_v9 = vld [vmem:[#allocation51_spill] sm:$0xff] }
 0x7fc   :  { %2379 = vmatprep.subr.bf16.mxu0 %v6073_v4  ;;  %2420 = vmatprep.subr.bf16.mxu1 %v6074_v1  ;;  %v6164_v4 = vld [vmem:[#allocation52_spill] sm:$0xff]  ;;  %v6165_v1 = vld [vmem:[#allocation22_spill] sm:$0xff] }
 0x7ff   :  { %2380 = vmatpush1.bf16.msra.mxu0 %v6075_v6  ;;  %2421 = vmatpush1.bf16.msra.mxu1 %v6076_v3  ;;  %v6166_v6 = vld [vmem:[#allocation80_spill] sm:$0xff]  ;;  %v6167_v3 = vld [vmem:[#allocation81_spill] sm:$0xff] }
 0x800   :  { %2381 = vmatprep.subr.bf16.mxu0 %v6077_v18  ;;  %2422 = vmatprep.subr.bf16.mxu1 %v6078_v28  ;;  %v6168_v18 = vld [vmem:[#allocation82_spill] sm:$0xff]  ;;  %v6169_v28 = vld [vmem:[#allocation83_spill] sm:$0xff] }
 0x803   :  { %2382 = vmatpush1.bf16.msra.mxu0 %v4849_v11  ;;  %2423 = vmatpush1.bf16.msra.mxu1 %v4852_v24  ;;  %v6157_v11 = vld [vmem:[#allocation45_spill] sm:$0xff]  ;;  %v6158_v24 = vld [vmem:[#allocation46_spill] sm:$0xff] }
 0x804   :  { %2383 = vmatprep.subr.bf16.mxu0 %v4855_v20  ;;  %2424 = vmatprep.subr.bf16.mxu1 %v4858_v15  ;;  %v6154_v15 = vld [vmem:[#allocation71_spill] sm:$0xff] }
 0x805   :  { %v6159_v20 = vld [vmem:[#allocation47_spill] sm:$0xff] }
 0x807   :  { %2384 = vmatpush1.bf16.msra.mxu0 %v4861_v42  ;;  %2425 = vmatpush1.bf16.msra.mxu1 %v4864_v32  ;;  %v6155_v42 = vld [vmem:[#allocation43_spill] sm:$0xff]  ;;  %v6156_v32 = vld [vmem:[#allocation44_spill] sm:$0xff] }
 0x808   :  { %2475 = vmatprep.subr.bf16.mxu0 %v4983_v29  ;;  %2516 = vmatprep.subr.bf16.mxu1 %v4986_v33  ;;  %v6170_v29 = vld [vmem:[#allocation53_spill] sm:$0xff]  ;;  %v6171_v33 = vld [vmem:[#allocation54_spill] sm:$0xff] }
 0x80a   :  { %2402 = vmatmul.mubr.bf16.vlgmr.msra.gmra.mrb[72].mxu0 %v2263_v38  ;;  %2443 = vmatmul.mubr.bf16.vlgmr.msra.gmra.mrb[72].mxu1 %v2263_v38 }
 0x80b   :  { %2476 = vmatpush1.bf16.msra.mxu0 %v4989_v34  ;;  %2517 = vmatpush1.bf16.msra.mxu1 %v4992_v36  ;;  %v6172_v34 = vld [vmem:[#allocation55_spill] sm:$0xff]  ;;  %v6173_v36 = vld [vmem:[#allocation56_spill] sm:$0xff] }
 0x80c   :  { %2477 = vmatprep.subr.bf16.mxu0 %v4995_v37  ;;  %2518 = vmatprep.subr.bf16.mxu1 %v4998_v40  ;;  %v6174_v37 = vld [vmem:[#allocation57_spill] sm:$0xff]  ;;  %v6175_v40 = vld [vmem:[#allocation58_spill] sm:$0xff] }
 0x80f   :  { %2478 = vmatpush1.bf16.msra.mxu0 %v5001_v44  ;;  %2519 = vmatpush1.bf16.msra.mxu1 %v5004_v46  ;;  %v6176_v44 = vld [vmem:[#allocation59_spill] sm:$0xff]  ;;  %v6177_v46 = vld [vmem:[#allocation60_spill] sm:$0xff] }
 0x810   :  { %2479 = vmatprep.subr.bf16.mxu0 %v5007_v47  ;;  %2520 = vmatprep.subr.bf16.mxu1 %v5010_v48  ;;  %v6178_v47 = vld [vmem:[#allocation61_spill] sm:$0xff]  ;;  %v6179_v48 = vld [vmem:[#allocation62_spill] sm:$0xff] }
 0x813   :  { %2480 = vmatpush1.bf16.msra.mxu0 %v6138_v2  ;;  %2521 = vmatpush1.bf16.msra.mxu1 %v6139_v12 }
 0x814   :  { %2481 = vmatprep.subr.bf16.mxu0 %v6140_v50  ;;  %2522 = vmatprep.subr.bf16.mxu1 %v6141_v10 }
 0x817   :  { %2482 = vmatpush1.bf16.msra.mxu0 %v6142_v22  ;;  %2523 = vmatpush1.bf16.msra.mxu1 %v6143_v21  ;;  %v6194_v21 = vld [vmem:[#allocation16_spill] sm:$0xff] }
 0x818   :  { %2483 = vmatprep.subr.bf16.mxu0 %v6144_v55  ;;  %2524 = vmatprep.subr.bf16.mxu1 %v6145_v54  ;;  %v6195_v54 = vld [vmem:[#allocation17_spill] sm:$0xff] }
 0x81b   :  { %2484 = vmatpush1.bf16.msra.mxu0 %v6146_v56  ;;  %2525 = vmatpush1.bf16.msra.mxu1 %v6147_v25 }
 0x81c   :  { %2485 = vmatprep.subr.bf16.mxu0 %v6148_v5  ;;  %2526 = vmatprep.subr.bf16.mxu1 %v6149_v57 }
 0x81f   :  { %2486 = vmatpush1.bf16.msra.mxu0 %v6150_v41  ;;  %2527 = vmatpush1.bf16.msra.mxu1 %v6151_v13 }
 0x820   :  { %2487 = vmatprep.subr.bf16.mxu0 %v6152_v30  ;;  %2528 = vmatprep.subr.bf16.mxu1 %v6153_v14 }
 0x823   :  { %2488 = vmatpush1.bf16.msra.mxu0 %v6154_v15  ;;  %2529 = vmatpush1.bf16.msra.mxu1 %v6155_v42 }
 0x824   :  { %2489 = vmatprep.subr.bf16.mxu0 %v6156_v32  ;;  %2530 = vmatprep.subr.bf16.mxu1 %v6157_v11  ;;  %v6196_v32 = vld [vmem:[#allocation20_spill] sm:$0xff] }
 0x827   :  { %2490 = vmatpush1.bf16.msra.mxu0 %v6158_v24  ;;  %2531 = vmatpush1.bf16.msra.mxu1 %v6159_v20 }
 0x828   :  { %2491 = vmatprep.subr.bf16.mxu0 %v6160_v63  ;;  %2532 = vmatprep.subr.bf16.mxu1 %v6161_v23 }
 0x82b   :  { %2492 = vmatpush1.bf16.msra.mxu0 %v6162_v17  ;;  %2533 = vmatpush1.bf16.msra.mxu1 %v6163_v9  ;;  %v6197_v9 = vld [vmem:[#allocation92_spill] sm:$0xff] }
 0x82c   :  { %2493 = vmatprep.subr.bf16.mxu0 %v6164_v4  ;;  %2534 = vmatprep.subr.bf16.mxu1 %v6165_v1  ;;  %v6198_v1 = vld [vmem:[#allocation93_spill] sm:$0xff] }
 0x82f   :  { %2494 = vmatpush1.bf16.msra.mxu0 %v6166_v6  ;;  %2535 = vmatpush1.bf16.msra.mxu1 %v6167_v3 }
 0x830   :  { %2495 = vmatprep.subr.bf16.mxu0 %v6168_v18  ;;  %2536 = vmatprep.subr.bf16.mxu1 %v6169_v28  ;;  %v6199_v28 = vld [vmem:[#allocation94_spill] sm:$0xff] }
 0x833   :  { %2496 = vmatpush1.bf16.msra.mxu0 %v6170_v29  ;;  %2537 = vmatpush1.bf16.msra.mxu1 %v6171_v33  ;;  %v6200_v33 = vld [vmem:[#allocation95_spill] sm:$0xff] }
 0x834   :  { %2497 = vmatprep.subr.bf16.mxu0 %v6172_v34  ;;  %2538 = vmatprep.subr.bf16.mxu1 %v6173_v36 }
 0x837   :  { %2498 = vmatpush1.bf16.msra.mxu0 %v6174_v37  ;;  %2539 = vmatpush1.bf16.msra.mxu1 %v6175_v40 }
 0x838   :  { %2499 = vmatprep.subr.bf16.mxu0 %v6176_v44  ;;  %2540 = vmatprep.subr.bf16.mxu1 %v6177_v46 }
 0x83b   :  { %2500 = vmatpush1.bf16.msra.mxu0 %v6178_v47  ;;  %2541 = vmatpush1.bf16.msra.mxu1 %v6179_v48 }
 0x83c   :  { %2501 = vmatprep.subr.bf16.mxu0 %v6180_v8  ;;  %2542 = vmatprep.subr.bf16.mxu1 %v6181_v62 }
 0x83f   :  { %2502 = vmatpush1.bf16.msra.mxu0 %v6182_v52  ;;  %2543 = vmatpush1.bf16.msra.mxu1 %v6183_v51 }
 0x840   :  { %2503 = vmatprep.subr.bf16.mxu0 %v6184_v61  ;;  %2544 = vmatprep.subr.bf16.mxu1 %v6185_v60 }
 0x843   :  { %2504 = vmatpush1.bf16.msra.mxu0 %v6186_v16  ;;  %2545 = vmatpush1.bf16.msra.mxu1 %v6187_v49 }
 0x844   :  { %2505 = vmatprep.subr.bf16.mxu0 %v6188_v26  ;;  %2546 = vmatprep.subr.bf16.mxu1 %v6189_v7 }
 0x847   :  { %2506 = vmatpush1.bf16.msra.mxu0 %v6190_v43  ;;  %2547 = vmatpush1.bf16.msra.mxu1 %v6191_v53 }
 0x8bd   :  { %v2299_v39 = vpop.f32.mrb[68].mxu0  ;;  %v2340_v59 = vpop.f32.mrb[68].mxu1 }
 0x8be   :  { %v2300_v19 = vadd.f32 %v2299_v39, %v6192_v58  ;;  %v2301_v35 = vpop.f32.mrb[69].mxu0  ;;  %v2342_v0 = vpop.f32.mrb[69].mxu1  ;;  %v2341_v56 = vadd.f32 %v2340_v59, %v6195_v54 }
 0x8bf   :  { %v2302_v27 = vadd.f32 %v2301_v35, %v6193_v31  ;;  %v2303_v38 = vpop.f32.mrb[70].mxu0  ;;  %v2344_v2 = vpop.f32.mrb[70].mxu1  ;;  %v2343_v55 = vadd.f32 %v2342_v0, %v6194_v21 }
 0x8c0   :  { %v2347_v12 = vmul.f32 0.5, %v2300_v19  ;;  %v2304_v50 = vpop.f32.mrb[71].mxu0  ;;  %v2345_v10 = vpop.f32.mrb[71].mxu1  ;;  %v2349_v25 = vmul.f32 0.5, %v2341_v56  ;;  %v3164_v56 = vld [vmem:[#allocation6 + $0x28] sm:$0xff]  }
 0x8c1   :  { %v2348_v22 = vmul.f32 0.5, %v2302_v27  ;;  %v3607_v50 = vmov 0.0   ;;  %v3161_v10 = vld [vmem:[#allocation6 + $0x10] sm:$0xff]  }
 0x8c2   :  { %3305 = vtanh.f32 %v2347_v12  ;;  %v3159_v12 = vld [vmem:[#allocation6] sm:$0xff]   ;;  %2958 = vmatprep.subr.bf16.mxu0 %v3607_v50  ;;  %2978 = vmatprep.subr.bf16.mxu1 %v3607_v50 }
 0x8c3   :  { %3307 = vtanh.f32 %v2348_v22  ;;  %v3162_v22 = vld [vmem:[#allocation6 + $0x18] sm:$0xff]  }
 0x8c4   :  { %3309 = vtanh.f32 %v2343_v55  ;;  %v3163_v55 = vld [vmem:[#allocation6 + $0x20] sm:$0xff]  }
 0x8c5   :  { %3311 = vtanh.f32 %v2349_v25  ;;  %v3165_v25 = vld [vmem:[#allocation6 + $0x30] sm:$0xff]  }
 0x8cc   :  { %v3306_v5 = vpop.eup %3305 }
 0x8cd   :  { %v2353_v57 = vmul.f32 0.5, %v3306_v5  ;;  %v3308_v41 = vpop.eup %3307  ;;  %v3166_v5 = vld [vmem:[#allocation6 + $0x38] sm:$0xff]  }
 0x8ce   :  { %v2354_v30 = vmul.f32 0.5, %v3308_v41  ;;  %v3310_v14 = vpop.eup %3309  ;;  %v3168_v41 = vld [vmem:[#allocation6 + $0x48] sm:$0xff]  }
 0x8cf   :  { %v2356_v13 = vadd.f32 0.5, %v2353_v57  ;;  %v3312_v20 = vpop.eup %3311  ;;  %v3167_v57 = vld [vmem:[#allocation6 + $0x40] sm:$0xff]  }
 0x8d0   :  { %v2357_v15 = vadd.f32 0.5, %v2354_v30  ;;  %v2355_v63 = vmul.f32 0.5, %v3312_v20  ;;  %v3170_v30 = vld [vmem:[#allocation6 + $0x58] sm:$0xff]  }
 0x8d1   :  { %v2361_v42 = vmul.f32 %v3310_v14, %v2356_v13  ;;  %v3169_v13 = vld [vmem:[#allocation6 + $0x50] sm:$0xff]   ;;  %v3171_v14 = vld [vmem:[#allocation6 + $0x60] sm:$0xff]  }
 0x8d2   :  { %v2360_v11 = vmul.f32 %v2357_v15, %v6196_v32  ;;  %v2358_v40 = vadd.f32 0.5, %v2355_v63  ;;  %v3172_v15 = vld [vmem:[#allocation6 + $0x68] sm:$0xff]  }
 0x8d4   :  { %v5294_v24 = vadd.f32 %v2361_v42, %v2360_v11 }
 0x8d6   :  { %3313 = vtanh.f32 %v5294_v24 }
 0x8dd   :  { %v2403_v23 = vpop.f32.mrb[72].mxu0  ;;  %v2444_v17 = vpop.f32.mrb[72].mxu1 }
 0x8de   :  { %v2451_v4 = vadd.f32 %v2403_v23, %v6197_v9  ;;  %v2453_v6 = vadd.f32 %v2444_v17, %v6198_v1  ;;  %v2405_v3 = vpop.f32.mrb[73].mxu0  ;;  %v2446_v18 = vpop.f32.mrb[73].mxu1 }
 0x8df   :  { %v2452_v29 = vadd.f32 %v2405_v3, %v6199_v28  ;;  %v2454_v34 = vadd.f32 %v2446_v18, %v6200_v33  ;;  %v2407_v36 = vpop.f32.mrb[74].mxu0  ;;  %v2448_v37 = vpop.f32.mrb[74].mxu1 }
 0x8e0   :  { %v2455_v44 = vmul.f32 0.5, %v2451_v4  ;;  %v2408_v46 = vpop.f32.mrb[75].mxu0  ;;  %v2449_v47 = vpop.f32.mrb[75].mxu1  ;;  %v2457_v51 = vmul.f32 0.5, %v2453_v6 }
 0x8e1   :  { %v3314_v48 = vpop.eup %3313  ;;  %v2456_v8 = vmul.f32 0.5, %v2452_v29 }
 0x8e2   :  { %3315 = vtanh.f32 %v2455_v44  ;;  %v2364_v62 = vmul.f32 %v3314_v48, %v2358_v40 }
 0x8e3   :  { %3317 = vtanh.f32 %v2456_v8 }
 0x8e4   :  { %v2474_v52 = vpack.c.bf16 %v2364_v62, %v2364_v62  ;;  %3319 = vtanh.f32 %v2454_v34 }
 0x8e5   :  { %3321 = vtanh.f32 %v2457_v51  ;;  %v3173_v51 = vld [vmem:[#allocation6 + $0x70] sm:$0xff]  }
 0x8e6   :  { %2507 = vmatprep.mubr.bf16.mxu0 %v2474_v52  ;;  %2548 = vmatprep.mubr.bf16.mxu1 %v2474_v52 }
 0x8ec   :  { %v3316_v61 = vpop.eup %3315 }
 0x8ed   :  { %v2461_v60 = vmul.f32 0.5, %v3316_v61  ;;  %v3318_v16 = vpop.eup %3317  ;;  %v3174_v61 = vld [vmem:[#allocation6 + $0x78] sm:$0xff]  }
 0x8ee   :  { %v2462_v26 = vmul.f32 0.5, %v3318_v16  ;;  %v3320_v7 = vpop.eup %3319 }
 0x8ef   :  { %v2464_v49 = vadd.f32 0.5, %v2461_v60  ;;  %v3322_v19 = vpop.eup %3321  ;;  %v2922_v60 = vld [vmem:[%s5346_s3 + $0x2] ss:$0 sm:$0xff] }
 0x8f0   :  { %v2465_v43 = vadd.f32 0.5, %v2462_v26  ;;  %v2463_v35 = vmul.f32 0.5, %v3322_v19 }
 0x8f1   :  { %v2469_v53 = vmul.f32 %v3320_v7, %v2464_v49 }
 0x8f2   :  { %v2468_v39 = vmul.f32 %v2465_v43, %v5190_v45  ;;  %v2466_v0 = vadd.f32 0.5, %v2463_v35  ;;  %v3160_v45 = vld [vmem:[#allocation6 + $0x8] sm:$0xff]  }
 0x8f4   :  { %v2470_v59 = vadd.f32 %v2469_v53, %v2468_v39  ;;  %v2931_v39 = vld [vmem:[%s5346_s3 + $0x3] ss:$0 sm:$0xff] }
 0x8f6   :  { %3323 = vtanh.f32 %v2470_v59 }
 0x900   :  { %v3324_v27 = vpop.eup %3323 }
 0x901   :  { %v2472_v38 = vmul.f32 %v3324_v27, %v2466_v0 }
 0x903   :  { %v2473_v2 = vpack.c.bf16 %v2472_v38, %v2472_v38 }
 0x905   :  { %2508 = vmatmul.mubr.bf16.vlgmr.msra.gmra.mrb[76].mxu0 %v2473_v2  ;;  %2549 = vmatmul.mubr.bf16.vlgmr.msra.gmra.mrb[76].mxu1 %v2473_v2 }
 0x906   :  { %2959 = vmatpush3.bf16.msra.mxu0 %v3159_v12  ;;  %2974 = vmatprep.mubr.msk.bf16.mxu0 %vm3608_vm1, %v3607_v50 }
 0x907   :  { %2960 = vmatprep.subr.bf16.mxu0 %v3607_v50  ;;  %2994 = vmatprep.mubr.msk.bf16.mxu1 %vm3608_vm1, %v3607_v50 }
 0x908   :  { %2979 = vmatpush3.bf16.msra.mxu1 %v3167_v57 }
 0x909   :  { %2980 = vmatprep.subr.bf16.mxu1 %v3607_v50 }
 0x90a   :  { %2961 = vmatpush3.bf16.msra.mxu0 %v3160_v45 }
 0x90b   :  { %2962 = vmatprep.subr.bf16.mxu0 %v3607_v50 }
 0x90c   :  { %2981 = vmatpush3.bf16.msra.mxu1 %v3168_v41 }
 0x90d   :  { %2982 = vmatprep.subr.bf16.mxu1 %v3607_v50 }
 0x90e   :  { %2963 = vmatpush3.bf16.msra.mxu0 %v3161_v10 }
 0x90f   :  { %2964 = vmatprep.subr.bf16.mxu0 %v3607_v50 }
 0x910   :  { %2983 = vmatpush3.bf16.msra.mxu1 %v3169_v13 }
 0x911   :  { %2984 = vmatprep.subr.bf16.mxu1 %v3607_v50 }
 0x912   :  { %2965 = vmatpush3.bf16.msra.mxu0 %v3162_v22 }
 0x913   :  { %2966 = vmatprep.subr.bf16.mxu0 %v3607_v50 }
 0x914   :  { %2985 = vmatpush3.bf16.msra.mxu1 %v3170_v30 }
 0x915   :  { %2986 = vmatprep.subr.bf16.mxu1 %v3607_v50 }
 0x916   :  { %2967 = vmatpush3.bf16.msra.mxu0 %v3163_v55 }
 0x917   :  { %2968 = vmatprep.subr.bf16.mxu0 %v3607_v50 }
 0x918   :  { %2987 = vmatpush3.bf16.msra.mxu1 %v3171_v14 }
 0x919   :  { %2988 = vmatprep.subr.bf16.mxu1 %v3607_v50 }
 0x91a   :  { %2969 = vmatpush3.bf16.msra.mxu0 %v3164_v56 }
 0x91b   :  { %2970 = vmatprep.subr.bf16.mxu0 %v3607_v50 }
 0x91c   :  { %2989 = vmatpush3.bf16.msra.mxu1 %v3172_v15 }
 0x91d   :  { %2990 = vmatprep.subr.bf16.mxu1 %v3607_v50 }
 0x91e   :  { %2971 = vmatpush3.bf16.msra.mxu0 %v3165_v25 }
 0x91f   :  { %2972 = vmatprep.subr.bf16.mxu0 %v3607_v50 }
 0x920   :  { %2991 = vmatpush3.bf16.msra.mxu1 %v3173_v51 }
 0x921   :  { %2992 = vmatprep.subr.bf16.mxu1 %v3607_v50 }
 0x922   :  { %2973 = vmatpush3.bf16.msra.mxu0 %v3166_v5 }
 0x924   :  { %2993 = vmatpush3.bf16.msra.mxu1 %v3174_v61 }
 0x9d8   :  { %v2509_v42 = vpop.f32.mrb[76].mxu0  ;;  %v2550_v32 = vpop.f32.mrb[76].mxu1 }
 0x9d9   :  { %v2510_v11 = vadd.f32 %v2509_v42, %v6192_v58  ;;  %v2511_v20 = vpop.f32.mrb[77].mxu0  ;;  %v2552_v63 = vpop.f32.mrb[77].mxu1  ;;  %v2551_v28 = vadd.f32 %v2550_v32, %v6195_v54 }
 0x9da   :  { %v2512_v23 = vadd.f32 %v2511_v20, %v6193_v31  ;;  %v2513_v17 = vpop.f32.mrb[78].mxu0  ;;  %v2554_v9 = vpop.f32.mrb[78].mxu1  ;;  %v2553_v18 = vadd.f32 %v2552_v63, %v6194_v21 }
 0x9db   :  { %v2557_v4 = vmul.f32 0.5, %v2510_v11  ;;  %v2514_v1 = vpop.f32.mrb[79].mxu0  ;;  %v2555_v6 = vpop.f32.mrb[79].mxu1  ;;  %v2559_v29 = vmul.f32 0.5, %v2551_v28 }
 0x9dc   :  { %v2558_v3 = vmul.f32 0.5, %v2512_v23 }
 0x9dd   :  { %3325 = vtanh.f32 %v2557_v4 }
 0x9de   :  { %3327 = vtanh.f32 %v2558_v3 }
 0x9df   :  { %3329 = vtanh.f32 %v2553_v18 }
 0x9e0   :  { %3331 = vtanh.f32 %v2559_v29 }
 0x9e7   :  { %v3326_v33 = vpop.eup %3325 }
 0x9e8   :  { %v2563_v58 = vmul.f32 0.5, %v3326_v33  ;;  %v3328_v34 = vpop.eup %3327 }
 0x9e9   :  { %v2564_v31 = vmul.f32 0.5, %v3328_v34  ;;  %v3330_v37 = vpop.eup %3329 }
 0x9ea   :  { %v2566_v36 = vadd.f32 0.5, %v2563_v58  ;;  %v3332_v48 = vpop.eup %3331 }
 0x9eb   :  { %v2567_v40 = vadd.f32 0.5, %v2564_v31  ;;  %v2565_v21 = vmul.f32 0.5, %v3332_v48 }
 0x9ec   :  { %v2571_v44 = vmul.f32 %v3330_v37, %v2566_v36 }
 0x9ed   :  { %v2570_v46 = vmul.f32 %v2567_v40, %v5294_v24  ;;  %v2568_v8 = vadd.f32 0.5, %v2565_v21 }
 0x9ef   :  { %v2572_v47 = vadd.f32 %v2571_v44, %v2570_v46 }
 0x9f1   :  { %3333 = vtanh.f32 %v2572_v47 }
 0x9fb   :  { %v3334_v62 = vpop.eup %3333 }
 0x9fc   :  { %v2574_v52 = vmul.f32 %v3334_v62, %v2568_v8 }
 0x9fe   :  { %v2609_v54 = vpack.c.bf16 %v2574_v52, %v2574_v52 }
 0xa00   :  { %2975 = vmatmul.mubr.bf16.vlgmr.msra.gmra.mrb[80].mxu0 %v2609_v54 }
 0xad3   :  { %v2696_v24 = vpop.f32.mrb[80].mxu0 }
 0xad4   :  { %v2697_v16 = vadd.f32 %v2922_v60, %v2696_v24  ;;  %v2976_v49 = vpop.f32.mrb[81].mxu0 }
 0xad5   :  { %v2699_v26 = vpop.f32.mrb[82].mxu0 }
 0xad6   :  { %v2702_v7 = vmax.f32 %v2697_v16, 0.0  ;;  %v2977_v43 = vpop.f32.mrb[83].mxu0 }
 0xad8   :  { %v2703_v53 = vpack.c.bf16 %v2702_v7, %v2702_v7 }
 0xada   :  { %2995 = vmatmul.mubr.bf16.vlgmr.msra.gmra.mrb[80].mxu1 %v2703_v53 }
 0xbad   :  { %v2790_v59 = vpop.f32.mrb[80].mxu1 }
 0xbae   :  { %v2791_v19 = vadd.f32 %v2931_v39, %v2790_v59  ;;  %v2996_v35 = vpop.f32.mrb[81].mxu1 }
 0xbaf   :  { %v2793_v0 = vpop.f32.mrb[82].mxu1 }
 0xbb0   :  { %2796 = vst [vmem:[#allocation8] sm:$0xff] %v2791_v19  ;;  %v2997_v27 = vpop.f32.mrb[83].mxu1 }
 0xbb1   :  { %3582 = shalt.err (!%p3579_p6)
}
 0xbb2   :  { %s3583_s3 = scalar_lea.hbm %s5347_s4, 128 }
 0xbb3   :  { %p3584_p7 = scmp.ne.s32.totalorder %s5347_s4, %s3583_s3  ;;  %p3587_p8 = scmp.lt.u32.totalorder %s3583_s3, %s5347_s4 }
 0xbb5   :  { %p3589_p9 = pnand %p3587_p8, %p3584_p7 }
 0xbb7   :  { %3592 = shalt.err (!%p3589_p9)
}
 0xbb8   :  { %2806 = dma.vmem_to_hbm [thread:$0]  %s2804_s1, 128, %s5347_s4, [#allocation5]  }
 0xbb9   :  { %3597 = dma.done.wait [#allocation5], 128  }
 0xbba   :  { %3598 = vsyncadd [#allocation5], 4294967168 }
 0xbbb   :  { %2810 = vsyncpa [#allocation4], 1 }
 0xbbc   :  { %2811 = vsyncpa [#allocation7], 1 }
 0xbbd   :  { %2812 = vsyncpa [#allocation5], 1 }

</bundles_post_ra>
